<compile_context>
chip_gen: v7x
topology: tpu7x:2x2x1
jax: 0.10.0
libtpu: 0.0.40
codegen_flags: <defaults>
</compile_context>

<pallas_src>
import functools

import jax
import jax.numpy as jnp
from jax.experimental import pallas as pl
from jax.experimental.pallas import tpu as pltpu


N_IMGS = 2
POSE_EPS = 0.01
ENC_CH = 64      # stand-in encoder output channels (resnet18 last stage is 512)
N_CH_DEC = 256   # matches the module's n_ch_dec
HEAD_NP = 128    # lane-dense padded width of the fused 1x1 heads
VMEM_LIMIT = 32 * 1024 * 1024   # explicit scoped-VMEM limit (safe on v5e/v6e/v7x)


def _round_up(x, m):
    return ((x + m - 1) // m) * m


# ----------------------------------------------------------------------------
# Pallas kernels
# ----------------------------------------------------------------------------
def _enc_squeeze_kernel(a_ref, w1_ref, b1_ref, w2_ref, b2_ref, o_ref):
    """Fused stand-in encoder conv (as matmul) + ReLU + 1x1 squeeze + ReLU.
    The 64-wide intermediate stays in vregs; the output is emitted in bf16."""
    h = jnp.dot(a_ref[...], w1_ref[...], preferred_element_type=jnp.float32)
    h = jnp.maximum(h + b1_ref[...], 0.0)
    y = jnp.dot(h.astype(w2_ref.dtype), w2_ref[...],
                preferred_element_type=jnp.float32)
    o_ref[...] = jnp.maximum(y + b2_ref[...], 0.0).astype(o_ref.dtype)


def _decoder_branch_kernel(x_ref, w1_ref, b1_ref, w2_ref, b2_ref,
                           wh_ref, bh_ref, o_ref, h1_ref, *, H, W):
    """Fully fused decoder branch for one (branch, batch) grid point:

        3x3 conv + ReLU -> 3x3 conv + ReLU -> masked global avg pool -> 1x1 head

    The 3x3 convs avoid im2col: the padded activation is flat (row width
    Wp = W+2, pad 1 top / 2 bottom / 1 left / 1 right) and the 9 taps are
    shifted contiguous slices.  Taps accumulate into a LOCAL f32 value and each
    block is written exactly once.  The layer-1 output is staged in a VMEM
    scratch laid out directly in the padded-flat format layer 2 reads (no HBM
    round trip, no slice/pad glue).  The pool is hoisted in front of the
    linear 1x1 head; the head stays in f32 for accuracy."""
    Wp = W + 2
    m2 = H * Wp                       # conv output rows incl. 2 junk cols/row
    Lf = h1_ref.shape[0]              # (H + 3) * Wp
    n_ch = w1_ref.shape[-1]

    col = jax.lax.broadcasted_iota(jnp.int32, (m2, 1), 0) % Wp
    valid = col < W                   # mask for the 2 junk columns per row

    # ---- layer 1: 3x3 conv (stride 1, pad 1) + ReLU ------------------------
    acc = jnp.zeros((m2, n_ch), jnp.float32)
    for t in range(9):
        ki, kj = divmod(t, 3)
        off = ki * Wp + kj
        acc = acc + jnp.dot(x_ref[0, off:off + m2, :], w1_ref[0, t],
                            preferred_element_type=jnp.float32)
    y1 = jnp.maximum(acc + b1_ref[0], 0.0)
    y1 = jnp.where(valid, y1, 0.0)    # zeroed junk cols double as halo padding

    # Stage in the padded-flat layout layer 2 reads: data at rows 1..H,
    # cols 1..W of the (H+3, Wp) padded image; every other position is zero.
    # (The masked junk columns land exactly on the right/left pad positions.)
    h1_ref[0:Wp + 1, :] = jnp.zeros((Wp + 1, n_ch), h1_ref.dtype)
    h1_ref[Wp + 1:Wp + 1 + m2, :] = y1
    h1_ref[Wp + 1 + m2:, :] = jnp.zeros((Lf - (Wp + 1 + m2), n_ch), h1_ref.dtype)

    # ---- layer 2: 3x3 conv + ReLU + masked global average pool -------------
    acc2 = jnp.zeros((m2, n_ch), jnp.float32)
    for t in range(9):
        ki, kj = divmod(t, 3)
        off = ki * Wp + kj
        a = h1_ref[off:off + m2, :].astype(w2_ref.dtype)
        acc2 = acc2 + jnp.dot(a, w2_ref[0, t],
                              preferred_element_type=jnp.float32)
    y2 = jnp.maximum(acc2 + b2_ref[0], 0.0)
    y2 = jnp.where(valid, y2, 0.0)
    pooled = jnp.sum(y2, axis=0, keepdims=True) * (1.0 / (H * W))  # (1, n_ch)

    # ---- fused 1x1 head (pool(conv1x1(y)) == conv1x1(pool(y)), kept f32) ----
    head = jnp.dot(pooled, wh_ref[0],
                   preferred_element_type=jnp.float32) + bh_ref[0]
    o_ref[0, 0] = head


# ----------------------------------------------------------------------------
# Wrappers
# ----------------------------------------------------------------------------
def _conv_w_to_mat(w_oihw):
    """(Cout, Cin, kh, kw) -> (kh*kw*Cin, Cout), row order (ki, kj, c)."""
    cout, cin, kh, kw = w_oihw.shape
    return jnp.transpose(w_oihw, (2, 3, 1, 0)).reshape(kh * kw * cin, cout)


def _conv_w_to_taps(w_oihw):
    """(Cout, Cin, 3, 3) -> (9, Cin, Cout)."""
    cout, cin, kh, kw = w_oihw.shape
    return jnp.transpose(w_oihw, (2, 3, 1, 0)).reshape(kh * kw, cin, cout)


def encode_and_squeeze(x_nhwc, w_enc, b_enc, w_sq, b_sq):
    """Fused stand-in encoder Conv(6->64, k4, s4)+ReLU and 1x1 squeeze
    (64->256)+ReLU.  k==s means im2col is a pure space-to-depth reshape."""
    B, H, W, Cin = x_nhwc.shape
    cout1 = w_enc.shape[0]
    cout2 = w_sq.shape[0]
    k = 4
    Ho, Wo = H // k, W // k

    p = x_nhwc.reshape(B, Ho, k, Wo, k, Cin).transpose(0, 1, 3, 2, 4, 5)
    a = p.reshape(B * Ho * Wo, k * k * Cin)       # (M, 96)
    M, K1 = a.shape
    K1p = _round_up(K1, 128)
    N1p = _round_up(cout1, 128)
    N2p = _round_up(cout2, 128)
    tm = min(128, _round_up(M, 16))               # cap tm (v6e vreg pressure)
    Mp = _round_up(M, tm)

    a_p = jnp.pad(a, ((0, Mp - M), (0, K1p - K1))).astype(jnp.bfloat16)
    w1 = jnp.pad(_conv_w_to_mat(w_enc),
                 ((0, K1p - K1), (0, N1p - cout1))).astype(jnp.bfloat16)
    b1 = jnp.pad(b_enc.reshape(1, -1), ((0, 0), (0, N1p - cout1))).astype(jnp.float32)
    w2 = jnp.pad(_conv_w_to_mat(w_sq),
                 ((0, N1p - cout1), (0, N2p - cout2))).astype(jnp.bfloat16)
    b2 = jnp.pad(b_sq.reshape(1, -1), ((0, 0), (0, N2p - cout2))).astype(jnp.float32)

    out = pl.pallas_call(
        _enc_squeeze_kernel,
        out_shape=jax.ShapeDtypeStruct((Mp, N2p), jnp.bfloat16),
        grid_spec=pltpu.PrefetchScalarGridSpec(
            num_scalar_prefetch=0,
            grid=(Mp // tm,),
            in_specs=[
                pl.BlockSpec((tm, K1p), lambda m: (m, 0)),
                pl.BlockSpec((K1p, N1p), lambda m: (0, 0)),
                pl.BlockSpec((1, N1p), lambda m: (0, 0)),
                pl.BlockSpec((N1p, N2p), lambda m: (0, 0)),
                pl.BlockSpec((1, N2p), lambda m: (0, 0)),
            ],
            out_specs=pl.BlockSpec((tm, N2p), lambda m: (m, 0)),
        ),
        compiler_params=pltpu.CompilerParams(
            dimension_semantics=("parallel",),
            vmem_limit_bytes=VMEM_LIMIT),
    )(a_p, w1, b1, w2, b2)
    return out[:M, :cout2].reshape(B, Ho, Wo, cout2)


def decoder_branches(featf, w1, b1, w2, b2, wh, bh, *, H, W):
    """featf: (B, (H+3)*(W+2), C) bf16 padded-flat features.
    Returns (nb, B, HEAD_NP) f32 pooled head outputs, one row per branch."""
    B, Lf, C = featf.shape
    nb = w1.shape[0]
    out = pl.pallas_call(
        functools.partial(_decoder_branch_kernel, H=H, W=W),
        out_shape=jax.ShapeDtypeStruct((nb, B, 1, HEAD_NP), jnp.float32),
        grid_spec=pltpu.PrefetchScalarGridSpec(
            num_scalar_prefetch=0,
            grid=(nb, B),     # branch outer: per-branch weights DMA'd once
            in_specs=[
                pl.BlockSpec((1, Lf, C), lambda br, b: (b, 0, 0)),
                pl.BlockSpec((1, 9, C, C), lambda br, b: (br, 0, 0, 0)),
                pl.BlockSpec((1, 1, C), lambda br, b: (br, 0, 0)),
                pl.BlockSpec((1, 9, C, C), lambda br, b: (br, 0, 0, 0)),
                pl.BlockSpec((1, 1, C), lambda br, b: (br, 0, 0)),
                pl.BlockSpec((1, C, HEAD_NP), lambda br, b: (br, 0, 0)),
                pl.BlockSpec((1, 1, HEAD_NP), lambda br, b: (br, 0, 0)),
            ],
            out_specs=pl.BlockSpec((1, 1, 1, HEAD_NP),
                                   lambda br, b: (br, b, 0, 0)),
            scratch_shapes=[pltpu.VMEM(((H + 3) * (W + 2), C), jnp.float32)],
        ),
        compiler_params=pltpu.CompilerParams(
            dimension_semantics=("parallel", "parallel"),
            vmem_limit_bytes=VMEM_LIMIT),
    )(featf, w1, b1, w2, b2, wh, bh)
    return out.reshape(nb, B, HEAD_NP)


# ----------------------------------------------------------------------------
# PoseNet: parameters + forward
# ----------------------------------------------------------------------------
def _conv_params(key, cout, cin, kh, kw, scale=0.05):
    kw_, kb_ = jax.random.split(key)
    w = scale * jax.random.normal(kw_, (cout, cin, kh, kw), jnp.float32)
    b = scale * jax.random.normal(kb_, (cout,), jnp.float32)
    return w, b


def init_params(key, learn_K):
    ks = jax.random.split(key, 16)
    p = {}
    p["enc"] = _conv_params(ks[0], ENC_CH, 3 * N_IMGS, 4, 4)     # encoder stand-in
    p["squeeze"] = _conv_params(ks[1], N_CH_DEC, ENC_CH, 1, 1)   # 1x1 squeeze
    p["pose1"] = _conv_params(ks[2], N_CH_DEC, N_CH_DEC, 3, 3)
    p["pose2"] = _conv_params(ks[3], N_CH_DEC, N_CH_DEC, 3, 3)
    p["pose3"] = _conv_params(ks[4], 6 * N_IMGS, N_CH_DEC, 1, 1)
    if learn_K:
        p["focal1"] = _conv_params(ks[5], N_CH_DEC, N_CH_DEC, 3, 3)
        p["focal2"] = _conv_params(ks[6], N_CH_DEC, N_CH_DEC, 3, 3)
        p["focal3"] = _conv_params(ks[7], 2, N_CH_DEC, 1, 1)
        p["offset1"] = _conv_params(ks[8], N_CH_DEC, N_CH_DEC, 3, 3)
        p["offset2"] = _conv_params(ks[9], N_CH_DEC, N_CH_DEC, 3, 3)
        p["offset3"] = _conv_params(ks[10], 2, N_CH_DEC, 1, 1)
    return p


def posenet_forward(params, x_nchw, learn_K):
    """x_nchw: (b, n_imgs*3, h, w) -> {'R': (b,2,3), 't': (b,2,3)[, 'fs','cs']}"""
    x = jnp.transpose(x_nchw, (0, 2, 3, 1))                        # NCHW -> NHWC
    B = x.shape[0]

    # Fused encoder stand-in + 1x1 squeeze (both + ReLU), bf16 output.
    feat = encode_and_squeeze(x, *params["enc"], *params["squeeze"])  # (B,h,w,256)
    _, Hf, Wf, C = feat.shape

    branches = ["pose"] + (["focal", "offset"] if learn_K else [])

    # Pad ONCE into the flat padded layout shared by both fused conv layers
    # (1 top, 2 bottom, 1 left, 1 right).
    featp = jnp.pad(feat, ((0, 0), (1, 2), (1, 1), (0, 0)))
    featf = featp.reshape(B, (Hf + 3) * (Wf + 2), C)

    # Stack the per-branch decoder weights: 3x3 taps as (9, Cin, Cout) bf16,
    # biases f32, and the 1x1 heads padded to one lane-dense 128-wide f32 slab.
    w1 = jnp.stack([_conv_w_to_taps(params[f"{br}1"][0]) for br in branches]
                   ).astype(jnp.bfloat16)
    b1 = jnp.stack([params[f"{br}1"][1].reshape(1, -1) for br in branches]
                   ).astype(jnp.float32)
    w2 = jnp.stack([_conv_w_to_taps(params[f"{br}2"][0]) for br in branches]
                   ).astype(jnp.bfloat16)
    b2 = jnp.stack([params[f"{br}2"][1].reshape(1, -1) for br in branches]
                   ).astype(jnp.float32)
    wh_l, bh_l = [], []
    for br in branches:
        w3, b3 = params[f"{br}3"]
        n_out = w3.shape[0]
        wh_l.append(jnp.pad(w3[:, :, 0, 0].T, ((0, 0), (0, HEAD_NP - n_out))))
        bh_l.append(jnp.pad(b3.reshape(1, -1), ((0, 0), (0, HEAD_NP - n_out))))
    wh = jnp.stack(wh_l).astype(jnp.float32)        # (nb, 256, 128)
    bh = jnp.stack(bh_l).astype(jnp.float32)        # (nb, 1, 128)

    # One fused kernel: conv1+ReLU -> conv2+ReLU -> masked pool -> 1x1 head.
    head = decoder_branches(featf, w1, b1, w2, b2, wh, bh, H=Hf, W=Wf)  # (nb,B,128)

    pose = POSE_EPS * head[0, :, :6 * N_IMGS].reshape(B, N_IMGS, 6)
    out = {"R": pose[..., :3], "t": pose[..., 3:]}
    if learn_K:
        # TODO(synk): softplus/sigmoid epilogues run as tiny (B,2) XLA ops.
        out["fs"] = jax.nn.softplus(head[1, :, :2])
        out["cs"] = jax.nn.sigmoid(head[2, :, :2])
    return out


if __name__ == "__main__":
    learn_K = True
    B, H, W = 2, 16, 16

    x = jax.random.normal(jax.random.PRNGKey(0), (B, 3 * N_IMGS, H, W), jnp.float32)
    params = init_params(jax.random.PRNGKey(42), learn_K)

    fwd = jax.jit(functools.partial(posenet_forward, learn_K=learn_K))
    out = fwd(params, x)
    out = jax.block_until_ready(out)

    assert out["R"].shape == (B, N_IMGS, 3)
    assert out["t"].shape == (B, N_IMGS, 3)
    assert out["fs"].shape == (B, 2)
    assert out["cs"].shape == (B, 2)
    assert bool(jnp.all(out["fs"] > 0.0))
    assert bool(jnp.all((out["cs"] > 0.0) & (out["cs"] < 1.0)))
    assert all(bool(jnp.all(jnp.isfinite(v))) for v in out.values())

    print("KERNEL_OK")
</pallas_src>

<mosaic_0001>
module attributes {stable_mosaic.version = 11 : i64} {
  func.func @_enc_squeeze_kernel(%arg0: i32, %arg1: memref<32x128xbf16, #tpu.memory_space<vmem>>, %arg2: memref<128x128xbf16, #tpu.memory_space<vmem>>, %arg3: memref<1x128xf32, #tpu.memory_space<vmem>>, %arg4: memref<128x256xbf16, #tpu.memory_space<vmem>>, %arg5: memref<1x256xf32, #tpu.memory_space<vmem>>, %arg6: memref<32x256xbf16, #tpu.memory_space<vmem>>) attributes {dimension_semantics = [#tpu.dimension_semantics<parallel>], iteration_bounds = array<i64: 1>, scalar_prefetch = 0 : i64, scratch_operands = 0 : i64, tpu.core_type = #tpu.core_type<tc>, window_params = [{transform_indices = @transform_0, window_bounds = array<i64: 32, 128>}, {pipeline_mode = #tpu.pipeline_mode<synchronous>, transform_indices = @transform_1, window_bounds = array<i64: 128, 128>}, {pipeline_mode = #tpu.pipeline_mode<synchronous>, transform_indices = @transform_2, window_bounds = array<i64: 1, 128>}, {pipeline_mode = #tpu.pipeline_mode<synchronous>, transform_indices = @transform_3, window_bounds = array<i64: 128, 256>}, {pipeline_mode = #tpu.pipeline_mode<synchronous>, transform_indices = @transform_4, window_bounds = array<i64: 1, 256>}, {transform_indices = @transform_5, window_bounds = array<i64: 32, 256>}]} {
    %c0 = arith.constant 0 : index
    %c0_0 = arith.constant 0 : index
    %0 = vector.load %arg1[%c0, %c0_0] : memref<32x128xbf16, #tpu.memory_space<vmem>>, vector<32x128xbf16>
    %c0_1 = arith.constant 0 : index
    %c0_2 = arith.constant 0 : index
    %1 = vector.load %arg2[%c0_1, %c0_2] : memref<128x128xbf16, #tpu.memory_space<vmem>>, vector<128x128xbf16>
    %cst = arith.constant dense<0.000000e+00> : vector<32x128xf32>
    %2 = tpu.matmul %0, %1, %cst {dimension_numbers = #tpu.dot_dimension_numbers<[1], [0], [0], [1], [0, 0, 1, 1], [], []>} : vector<32x128xbf16>, vector<128x128xbf16>, vector<32x128xf32> -> vector<32x128xf32>
    %c0_3 = arith.constant 0 : index
    %c0_4 = arith.constant 0 : index
    %3 = vector.load %arg3[%c0_3, %c0_4] : memref<1x128xf32, #tpu.memory_space<vmem>>, vector<1x128xf32>
    %4 = vector.broadcast %3 : vector<1x128xf32> to vector<32x128xf32>
    %5 = arith.addf %2, %4 : vector<32x128xf32>
    %cst_5 = arith.constant 0.000000e+00 : f32
    %6 = vector.broadcast %cst_5 : f32 to vector<32x128xf32>
    %7 = arith.maximumf %5, %6 : vector<32x128xf32>
    %8 = arith.truncf %7 : vector<32x128xf32> to vector<32x128xbf16>
    %c0_6 = arith.constant 0 : index
    %c0_7 = arith.constant 0 : index
    %9 = vector.load %arg4[%c0_6, %c0_7] : memref<128x256xbf16, #tpu.memory_space<vmem>>, vector<128x256xbf16>
    %cst_8 = arith.constant dense<0.000000e+00> : vector<32x256xf32>
    %10 = tpu.matmul %8, %9, %cst_8 {dimension_numbers = #tpu.dot_dimension_numbers<[1], [0], [0], [1], [0, 0, 1, 1], [], []>} : vector<32x128xbf16>, vector<128x256xbf16>, vector<32x256xf32> -> vector<32x256xf32>
    %c0_9 = arith.constant 0 : index
    %c0_10 = arith.constant 0 : index
    %11 = vector.load %arg5[%c0_9, %c0_10] : memref<1x256xf32, #tpu.memory_space<vmem>>, vector<1x256xf32>
    %12 = vector.broadcast %11 : vector<1x256xf32> to vector<32x256xf32>
    %13 = arith.addf %10, %12 : vector<32x256xf32>
    %cst_11 = arith.constant 0.000000e+00 : f32
    %14 = vector.broadcast %cst_11 : f32 to vector<32x256xf32>
    %15 = arith.maximumf %13, %14 : vector<32x256xf32>
    %16 = arith.truncf %15 : vector<32x256xf32> to vector<32x256xbf16>
    %c0_12 = arith.constant 0 : index
    %c0_13 = arith.constant 0 : index
    %17 = vector.load %arg6[%c0_12, %c0_13] : memref<32x256xbf16, #tpu.memory_space<vmem>>, vector<32x256xbf16>
    tpu.vector_store %arg6[%c0_12, %c0_13], %16 {strides = array<i32>} : memref<32x256xbf16, #tpu.memory_space<vmem>>, vector<32x256xbf16>,
    return
  }
  func.func @transform_0(%arg0: i32) -> (i32, i32) {
    %c0_i32 = arith.constant 0 : i32
    %c0_i32_0 = arith.constant 0 : i32
    return %arg0, %c0_i32 : i32, i32
  }
  func.func @transform_1(%arg0: i32) -> (i32, i32) {
    %c0_i32 = arith.constant 0 : i32
    %c0_i32_0 = arith.constant 0 : i32
    %c0_i32_1 = arith.constant 0 : i32
    return %c0_i32, %c0_i32_0 : i32, i32
  }
  func.func @transform_2(%arg0: i32) -> (i32, i32) {
    %c0_i32 = arith.constant 0 : i32
    %c0_i32_0 = arith.constant 0 : i32
    %c0_i32_1 = arith.constant 0 : i32
    return %c0_i32, %c0_i32_0 : i32, i32
  }
  func.func @transform_3(%arg0: i32) -> (i32, i32) {
    %c0_i32 = arith.constant 0 : i32
    %c0_i32_0 = arith.constant 0 : i32
    %c0_i32_1 = arith.constant 0 : i32
    return %c0_i32, %c0_i32_0 : i32, i32
  }
  func.func @transform_4(%arg0: i32) -> (i32, i32) {
    %c0_i32 = arith.constant 0 : i32
    %c0_i32_0 = arith.constant 0 : i32
    %c0_i32_1 = arith.constant 0 : i32
    return %c0_i32, %c0_i32_0 : i32, i32
  }
  func.func @transform_5(%arg0: i32) -> (i32, i32) {
    %c0_i32 = arith.constant 0 : i32
    %c0_i32_0 = arith.constant 0 : i32
    return %arg0, %c0_i32 : i32, i32
  }
}

module attributes {stable_mosaic.version = 11 : i64} {
  func.func @_decoder_branch_kernel(%arg0: i32, %arg1: i32, %arg2: memref<1x42x256xbf16, #tpu.memory_space<vmem>>, %arg3: memref<1x9x256x256xbf16, #tpu.memory_space<vmem>>, %arg4: memref<1x1x256xf32, #tpu.memory_space<vmem>>, %arg5: memref<1x9x256x256xbf16, #tpu.memory_space<vmem>>, %arg6: memref<1x1x256xf32, #tpu.memory_space<vmem>>, %arg7: memref<1x256x128xf32, #tpu.memory_space<vmem>>, %arg8: memref<1x1x128xf32, #tpu.memory_space<vmem>>, %arg9: memref<1x1x1x128xf32, #tpu.memory_space<vmem>>, %arg10: memref<42x256xf32, #tpu.memory_space<vmem>>) attributes {dimension_semantics = [#tpu.dimension_semantics<parallel>, #tpu.dimension_semantics<parallel>], iteration_bounds = array<i64: 3, 2>, scalar_prefetch = 0 : i64, scratch_operands = 1 : i64, tpu.core_type = #tpu.core_type<tc>, window_params = [{transform_indices = @transform_0, window_bounds = array<i64: 1, 42, 256>}, {transform_indices = @transform_1, window_bounds = array<i64: 1, 9, 256, 256>}, {transform_indices = @transform_2, window_bounds = array<i64: 1, 1, 256>}, {transform_indices = @transform_3, window_bounds = array<i64: 1, 9, 256, 256>}, {transform_indices = @transform_4, window_bounds = array<i64: 1, 1, 256>}, {transform_indices = @transform_5, window_bounds = array<i64: 1, 256, 128>}, {transform_indices = @transform_6, window_bounds = array<i64: 1, 1, 128>}, {transform_indices = @transform_7, window_bounds = array<i64: 1, 1, 1, 128>}]} {
    %0 = tpu.iota {dimensions = array<i32: 0>} : vector<24x1xi32>
    %c6_i32 = arith.constant 6 : i32
    %c0_i32 = arith.constant 0 : i32
    %1 = arith.cmpi eq, %c6_i32, %c0_i32 : i32
    %c1_i32 = arith.constant 1 : i32
    %2 = arith.select %1, %c1_i32, %c6_i32 : i32
    %3 = vector.broadcast %2 : i32 to vector<24x1xi32>
    %4 = arith.remsi %0, %3 : vector<24x1xi32>
    %c0_i32_0 = arith.constant 0 : i32
    %5 = vector.broadcast %c0_i32_0 : i32 to vector<24x1xi32>
    %6 = arith.cmpi ne, %4, %5 : vector<24x1xi32>
    %c0_i32_1 = arith.constant 0 : i32
    %7 = vector.broadcast %c0_i32_1 : i32 to vector<24x1xi32>
    %8 = arith.cmpi slt, %4, %7 : vector<24x1xi32>
    %c0_i32_2 = arith.constant 0 : i32
    %9 = arith.cmpi slt, %2, %c0_i32_2 : i32
    %10 = vector.broadcast %9 : i1 to vector<24x1xi1>
    %11 = vector.broadcast %10 : vector<24x1xi1> to vector<24x1xi1>
    %12 = arith.xori %8, %11 : vector<24x1xi1>
    %13 = arith.andi %12, %6 : vector<24x1xi1>
    %14 = vector.broadcast %2 : i32 to vector<24x1xi32>
    %15 = arith.addi %4, %14 : vector<24x1xi32>
    %16 = arith.select %13, %15, %4 : vector<24x1xi1>, vector<24x1xi32>
    %c4_i32 = arith.constant 4 : i32
    %17 = vector.broadcast %c4_i32 : i32 to vector<24x1xi32>
    %18 = arith.cmpi slt, %16, %17 : vector<24x1xi32>
    %cst = arith.constant 0.000000e+00 : f32
    %19 = vector.broadcast %cst : f32 to vector<24x256xf32>
    %c0 = arith.constant 0 : index
    %c0_3 = arith.constant 0 : index
    %c0_4 = arith.constant 0 : index
    %20 = vector.load %arg2[%c0, %c0_3, %c0_4] : memref<1x42x256xbf16, #tpu.memory_space<vmem>>, vector<1x24x256xbf16>
    %21 = vector.shape_cast %20 : vector<1x24x256xbf16> to vector<24x256xbf16>
    %c0_5 = arith.constant 0 : index
    %c0_6 = arith.constant 0 : index
    %c0_7 = arith.constant 0 : index
    %c0_8 = arith.constant 0 : index
    %22 = vector.load %arg3[%c0_5, %c0_6, %c0_7, %c0_8] : memref<1x9x256x256xbf16, #tpu.memory_space<vmem>>, vector<1x1x256x256xbf16>
    %23 = vector.shape_cast %22 : vector<1x1x256x256xbf16> to vector<256x256xbf16>
    %cst_9 = arith.constant dense<0.000000e+00> : vector<24x256xf32>
    %24 = tpu.matmul %21, %23, %cst_9 {dimension_numbers = #tpu.dot_dimension_numbers<[1], [0], [0], [1], [0, 0, 1, 1], [], []>} : vector<24x256xbf16>, vector<256x256xbf16>, vector<24x256xf32> -> vector<24x256xf32>
    %25 = arith.addf %19, %24 : vector<24x256xf32>
    %c0_10 = arith.constant 0 : index
    %c1 = arith.constant 1 : index
    %c0_11 = arith.constant 0 : index
    %26 = vector.load %arg2[%c0_10, %c1, %c0_11] : memref<1x42x256xbf16, #tpu.memory_space<vmem>>, vector<1x24x256xbf16>
    %27 = vector.shape_cast %26 : vector<1x24x256xbf16> to vector<24x256xbf16>
    %c0_12 = arith.constant 0 : index
    %c1_13 = arith.constant 1 : index
    %c0_14 = arith.constant 0 : index
    %c0_15 = arith.constant 0 : index
    %28 = vector.load %arg3[%c0_12, %c1_13, %c0_14, %c0_15] : memref<1x9x256x256xbf16, #tpu.memory_space<vmem>>, vector<1x1x256x256xbf16>
    %29 = vector.shape_cast %28 : vector<1x1x256x256xbf16> to vector<256x256xbf16>
    %cst_16 = arith.constant dense<0.000000e+00> : vector<24x256xf32>
    %30 = tpu.matmul %27, %29, %cst_16 {dimension_numbers = #tpu.dot_dimension_numbers<[1], [0], [0], [1], [0, 0, 1, 1], [], []>} : vector<24x256xbf16>, vector<256x256xbf16>, vector<24x256xf32> -> vector<24x256xf32>
    %31 = arith.addf %25, %30 : vector<24x256xf32>
    %c0_17 = arith.constant 0 : index
    %c2 = arith.constant 2 : index
    %c0_18 = arith.constant 0 : index
    %32 = vector.load %arg2[%c0_17, %c2, %c0_18] : memref<1x42x256xbf16, #tpu.memory_space<vmem>>, vector<1x24x256xbf16>
    %33 = vector.shape_cast %32 : vector<1x24x256xbf16> to vector<24x256xbf16>
    %c0_19 = arith.constant 0 : index
    %c2_20 = arith.constant 2 : index
    %c0_21 = arith.constant 0 : index
    %c0_22 = arith.constant 0 : index
    %34 = vector.load %arg3[%c0_19, %c2_20, %c0_21, %c0_22] : memref<1x9x256x256xbf16, #tpu.memory_space<vmem>>, vector<1x1x256x256xbf16>
    %35 = vector.shape_cast %34 : vector<1x1x256x256xbf16> to vector<256x256xbf16>
    %cst_23 = arith.constant dense<0.000000e+00> : vector<24x256xf32>
    %36 = tpu.matmul %33, %35, %cst_23 {dimension_numbers = #tpu.dot_dimension_numbers<[1], [0], [0], [1], [0, 0, 1, 1], [], []>} : vector<24x256xbf16>, vector<256x256xbf16>, vector<24x256xf32> -> vector<24x256xf32>
    %37 = arith.addf %31, %36 : vector<24x256xf32>
    %c0_24 = arith.constant 0 : index
    %c6 = arith.constant 6 : index
    %c0_25 = arith.constant 0 : index
    %38 = vector.load %arg2[%c0_24, %c6, %c0_25] : memref<1x42x256xbf16, #tpu.memory_space<vmem>>, vector<1x24x256xbf16>
    %39 = vector.shape_cast %38 : vector<1x24x256xbf16> to vector<24x256xbf16>
    %c0_26 = arith.constant 0 : index
    %c3 = arith.constant 3 : index
    %c0_27 = arith.constant 0 : index
    %c0_28 = arith.constant 0 : index
    %40 = vector.load %arg3[%c0_26, %c3, %c0_27, %c0_28] : memref<1x9x256x256xbf16, #tpu.memory_space<vmem>>, vector<1x1x256x256xbf16>
    %41 = vector.shape_cast %40 : vector<1x1x256x256xbf16> to vector<256x256xbf16>
    %cst_29 = arith.constant dense<0.000000e+00> : vector<24x256xf32>
    %42 = tpu.matmul %39, %41, %cst_29 {dimension_numbers = #tpu.dot_dimension_numbers<[1], [0], [0], [1], [0, 0, 1, 1], [], []>} : vector<24x256xbf16>, vector<256x256xbf16>, vector<24x256xf32> -> vector<24x256xf32>
    %43 = arith.addf %37, %42 : vector<24x256xf32>
    %c0_30 = arith.constant 0 : index
    %c7 = arith.constant 7 : index
    %c0_31 = arith.constant 0 : index
    %44 = vector.load %arg2[%c0_30, %c7, %c0_31] : memref<1x42x256xbf16, #tpu.memory_space<vmem>>, vector<1x24x256xbf16>
    %45 = vector.shape_cast %44 : vector<1x24x256xbf16> to vector<24x256xbf16>
    %c0_32 = arith.constant 0 : index
    %c4 = arith.constant 4 : index
    %c0_33 = arith.constant 0 : index
    %c0_34 = arith.constant 0 : index
    %46 = vector.load %arg3[%c0_32, %c4, %c0_33, %c0_34] : memref<1x9x256x256xbf16, #tpu.memory_space<vmem>>, vector<1x1x256x256xbf16>
    %47 = vector.shape_cast %46 : vector<1x1x256x256xbf16> to vector<256x256xbf16>
    %cst_35 = arith.constant dense<0.000000e+00> : vector<24x256xf32>
    %48 = tpu.matmul %45, %47, %cst_35 {dimension_numbers = #tpu.dot_dimension_numbers<[1], [0], [0], [1], [0, 0, 1, 1], [], []>} : vector<24x256xbf16>, vector<256x256xbf16>, vector<24x256xf32> -> vector<24x256xf32>
    %49 = arith.addf %43, %48 : vector<24x256xf32>
    %c0_36 = arith.constant 0 : index
    %c8 = arith.constant 8 : index
    %c0_37 = arith.constant 0 : index
    %50 = vector.load %arg2[%c0_36, %c8, %c0_37] : memref<1x42x256xbf16, #tpu.memory_space<vmem>>, vector<1x24x256xbf16>
    %51 = vector.shape_cast %50 : vector<1x24x256xbf16> to vector<24x256xbf16>
    %c0_38 = arith.constant 0 : index
    %c5 = arith.constant 5 : index
    %c0_39 = arith.constant 0 : index
    %c0_40 = arith.constant 0 : index
    %52 = vector.load %arg3[%c0_38, %c5, %c0_39, %c0_40] : memref<1x9x256x256xbf16, #tpu.memory_space<vmem>>, vector<1x1x256x256xbf16>
    %53 = vector.shape_cast %52 : vector<1x1x256x256xbf16> to vector<256x256xbf16>
    %cst_41 = arith.constant dense<0.000000e+00> : vector<24x256xf32>
    %54 = tpu.matmul %51, %53, %cst_41 {dimension_numbers = #tpu.dot_dimension_numbers<[1], [0], [0], [1], [0, 0, 1, 1], [], []>} : vector<24x256xbf16>, vector<256x256xbf16>, vector<24x256xf32> -> vector<24x256xf32>
    %55 = arith.addf %49, %54 : vector<24x256xf32>
    %c0_42 = arith.constant 0 : index
    %c12 = arith.constant 12 : index
    %c0_43 = arith.constant 0 : index
    %56 = vector.load %arg2[%c0_42, %c12, %c0_43] : memref<1x42x256xbf16, #tpu.memory_space<vmem>>, vector<1x24x256xbf16>
    %57 = vector.shape_cast %56 : vector<1x24x256xbf16> to vector<24x256xbf16>
    %c0_44 = arith.constant 0 : index
    %c6_45 = arith.constant 6 : index
    %c0_46 = arith.constant 0 : index
    %c0_47 = arith.constant 0 : index
    %58 = vector.load %arg3[%c0_44, %c6_45, %c0_46, %c0_47] : memref<1x9x256x256xbf16, #tpu.memory_space<vmem>>, vector<1x1x256x256xbf16>
    %59 = vector.shape_cast %58 : vector<1x1x256x256xbf16> to vector<256x256xbf16>
    %cst_48 = arith.constant dense<0.000000e+00> : vector<24x256xf32>
    %60 = tpu.matmul %57, %59, %cst_48 {dimension_numbers = #tpu.dot_dimension_numbers<[1], [0], [0], [1], [0, 0, 1, 1], [], []>} : vector<24x256xbf16>, vector<256x256xbf16>, vector<24x256xf32> -> vector<24x256xf32>
    %61 = arith.addf %55, %60 : vector<24x256xf32>
    %c0_49 = arith.constant 0 : index
    %c13 = arith.constant 13 : index
    %c0_50 = arith.constant 0 : index
    %62 = vector.load %arg2[%c0_49, %c13, %c0_50] : memref<1x42x256xbf16, #tpu.memory_space<vmem>>, vector<1x24x256xbf16>
    %63 = vector.shape_cast %62 : vector<1x24x256xbf16> to vector<24x256xbf16>
    %c0_51 = arith.constant 0 : index
    %c7_52 = arith.constant 7 : index
    %c0_53 = arith.constant 0 : index
    %c0_54 = arith.constant 0 : index
    %64 = vector.load %arg3[%c0_51, %c7_52, %c0_53, %c0_54] : memref<1x9x256x256xbf16, #tpu.memory_space<vmem>>, vector<1x1x256x256xbf16>
    %65 = vector.shape_cast %64 : vector<1x1x256x256xbf16> to vector<256x256xbf16>
    %cst_55 = arith.constant dense<0.000000e+00> : vector<24x256xf32>
    %66 = tpu.matmul %63, %65, %cst_55 {dimension_numbers = #tpu.dot_dimension_numbers<[1], [0], [0], [1], [0, 0, 1, 1], [], []>} : vector<24x256xbf16>, vector<256x256xbf16>, vector<24x256xf32> -> vector<24x256xf32>
    %67 = arith.addf %61, %66 : vector<24x256xf32>
    %c0_56 = arith.constant 0 : index
    %c14 = arith.constant 14 : index
    %c0_57 = arith.constant 0 : index
    %68 = vector.load %arg2[%c0_56, %c14, %c0_57] : memref<1x42x256xbf16, #tpu.memory_space<vmem>>, vector<1x24x256xbf16>
    %69 = vector.shape_cast %68 : vector<1x24x256xbf16> to vector<24x256xbf16>
    %c0_58 = arith.constant 0 : index
    %c8_59 = arith.constant 8 : index
    %c0_60 = arith.constant 0 : index
    %c0_61 = arith.constant 0 : index
    %70 = vector.load %arg3[%c0_58, %c8_59, %c0_60, %c0_61] : memref<1x9x256x256xbf16, #tpu.memory_space<vmem>>, vector<1x1x256x256xbf16>
    %71 = vector.shape_cast %70 : vector<1x1x256x256xbf16> to vector<256x256xbf16>
    %cst_62 = arith.constant dense<0.000000e+00> : vector<24x256xf32>
    %72 = tpu.matmul %69, %71, %cst_62 {dimension_numbers = #tpu.dot_dimension_numbers<[1], [0], [0], [1], [0, 0, 1, 1], [], []>} : vector<24x256xbf16>, vector<256x256xbf16>, vector<24x256xf32> -> vector<24x256xf32>
    %73 = arith.addf %67, %72 : vector<24x256xf32>
    %c0_63 = arith.constant 0 : index
    %c0_64 = arith.constant 0 : index
    %c0_65 = arith.constant 0 : index
    %74 = vector.load %arg4[%c0_63, %c0_64, %c0_65] : memref<1x1x256xf32, #tpu.memory_space<vmem>>, vector<1x1x256xf32>
    %75 = vector.shape_cast %74 : vector<1x1x256xf32> to vector<1x256xf32>
    %76 = vector.broadcast %75 : vector<1x256xf32> to vector<24x256xf32>
    %77 = arith.addf %73, %76 : vector<24x256xf32>
    %cst_66 = arith.constant 0.000000e+00 : f32
    %78 = vector.broadcast %cst_66 : f32 to vector<24x256xf32>
    %79 = arith.maximumf %77, %78 : vector<24x256xf32>
    %cst_67 = arith.constant 0.000000e+00 : f32
    %80 = vector.shape_cast %18 : vector<24x1xi1> to vector<24x1xi1>
    %81 = vector.broadcast %80 : vector<24x1xi1> to vector<24x256xi1>
    %82 = vector.broadcast %cst_67 : f32 to vector<24x256xf32>
    %83 = arith.select %81, %79, %82 : vector<24x256xi1>, vector<24x256xf32>
    %cst_68 = arith.constant 0.000000e+00 : f32
    %84 = vector.broadcast %cst_68 : f32 to vector<7x256xf32>
    %c0_69 = arith.constant 0 : index
    %c0_70 = arith.constant 0 : index
    %85 = vector.load %arg10[%c0_69, %c0_70] : memref<42x256xf32, #tpu.memory_space<vmem>>, vector<7x256xf32>
    tpu.vector_store %arg10[%c0_69, %c0_70], %84 {strides = array<i32>} : memref<42x256xf32, #tpu.memory_space<vmem>>, vector<7x256xf32>,
    %c7_71 = arith.constant 7 : index
    %c0_72 = arith.constant 0 : index
    %86 = vector.load %arg10[%c7_71, %c0_72] : memref<42x256xf32, #tpu.memory_space<vmem>>, vector<24x256xf32>
    tpu.vector_store %arg10[%c7_71, %c0_72], %83 {strides = array<i32>} : memref<42x256xf32, #tpu.memory_space<vmem>>, vector<24x256xf32>,
    %cst_73 = arith.constant 0.000000e+00 : f32
    %87 = vector.broadcast %cst_73 : f32 to vector<11x256xf32>
    %c31 = arith.constant 31 : index
    %c0_74 = arith.constant 0 : index
    %88 = vector.load %arg10[%c31, %c0_74] : memref<42x256xf32, #tpu.memory_space<vmem>>, vector<11x256xf32>
    tpu.vector_store %arg10[%c31, %c0_74], %87 {strides = array<i32>} : memref<42x256xf32, #tpu.memory_space<vmem>>, vector<11x256xf32>,
    %cst_75 = arith.constant 0.000000e+00 : f32
    %89 = vector.broadcast %cst_75 : f32 to vector<24x256xf32>
    %c0_76 = arith.constant 0 : index
    %c0_77 = arith.constant 0 : index
    %90 = vector.load %arg10[%c0_76, %c0_77] : memref<42x256xf32, #tpu.memory_space<vmem>>, vector<24x256xf32>
    %91 = arith.truncf %90 : vector<24x256xf32> to vector<24x256xbf16>
    %c0_78 = arith.constant 0 : index
    %c0_79 = arith.constant 0 : index
    %c0_80 = arith.constant 0 : index
    %c0_81 = arith.constant 0 : index
    %92 = vector.load %arg5[%c0_78, %c0_79, %c0_80, %c0_81] : memref<1x9x256x256xbf16, #tpu.memory_space<vmem>>, vector<1x1x256x256xbf16>
    %93 = vector.shape_cast %92 : vector<1x1x256x256xbf16> to vector<256x256xbf16>
    %cst_82 = arith.constant dense<0.000000e+00> : vector<24x256xf32>
    %94 = tpu.matmul %91, %93, %cst_82 {dimension_numbers = #tpu.dot_dimension_numbers<[1], [0], [0], [1], [0, 0, 1, 1], [], []>} : vector<24x256xbf16>, vector<256x256xbf16>, vector<24x256xf32> -> vector<24x256xf32>
    %95 = arith.addf %89, %94 : vector<24x256xf32>
    %c1_83 = arith.constant 1 : index
    %c0_84 = arith.constant 0 : index
    %96 = vector.load %arg10[%c1_83, %c0_84] : memref<42x256xf32, #tpu.memory_space<vmem>>, vector<24x256xf32>
    %97 = arith.truncf %96 : vector<24x256xf32> to vector<24x256xbf16>
    %c0_85 = arith.constant 0 : index
    %c1_86 = arith.constant 1 : index
    %c0_87 = arith.constant 0 : index
    %c0_88 = arith.constant 0 : index
    %98 = vector.load %arg5[%c0_85, %c1_86, %c0_87, %c0_88] : memref<1x9x256x256xbf16, #tpu.memory_space<vmem>>, vector<1x1x256x256xbf16>
    %99 = vector.shape_cast %98 : vector<1x1x256x256xbf16> to vector<256x256xbf16>
    %cst_89 = arith.constant dense<0.000000e+00> : vector<24x256xf32>
    %100 = tpu.matmul %97, %99, %cst_89 {dimension_numbers = #tpu.dot_dimension_numbers<[1], [0], [0], [1], [0, 0, 1, 1], [], []>} : vector<24x256xbf16>, vector<256x256xbf16>, vector<24x256xf32> -> vector<24x256xf32>
    %101 = arith.addf %95, %100 : vector<24x256xf32>
    %c2_90 = arith.constant 2 : index
    %c0_91 = arith.constant 0 : index
    %102 = vector.load %arg10[%c2_90, %c0_91] : memref<42x256xf32, #tpu.memory_space<vmem>>, vector<24x256xf32>
    %103 = arith.truncf %102 : vector<24x256xf32> to vector<24x256xbf16>
    %c0_92 = arith.constant 0 : index
    %c2_93 = arith.constant 2 : index
    %c0_94 = arith.constant 0 : index
    %c0_95 = arith.constant 0 : index
    %104 = vector.load %arg5[%c0_92, %c2_93, %c0_94, %c0_95] : memref<1x9x256x256xbf16, #tpu.memory_space<vmem>>, vector<1x1x256x256xbf16>
    %105 = vector.shape_cast %104 : vector<1x1x256x256xbf16> to vector<256x256xbf16>
    %cst_96 = arith.constant dense<0.000000e+00> : vector<24x256xf32>
    %106 = tpu.matmul %103, %105, %cst_96 {dimension_numbers = #tpu.dot_dimension_numbers<[1], [0], [0], [1], [0, 0, 1, 1], [], []>} : vector<24x256xbf16>, vector<256x256xbf16>, vector<24x256xf32> -> vector<24x256xf32>
    %107 = arith.addf %101, %106 : vector<24x256xf32>
    %c6_97 = arith.constant 6 : index
    %c0_98 = arith.constant 0 : index
    %108 = vector.load %arg10[%c6_97, %c0_98] : memref<42x256xf32, #tpu.memory_space<vmem>>, vector<24x256xf32>
    %109 = arith.truncf %108 : vector<24x256xf32> to vector<24x256xbf16>
    %c0_99 = arith.constant 0 : index
    %c3_100 = arith.constant 3 : index
    %c0_101 = arith.constant 0 : index
    %c0_102 = arith.constant 0 : index
    %110 = vector.load %arg5[%c0_99, %c3_100, %c0_101, %c0_102] : memref<1x9x256x256xbf16, #tpu.memory_space<vmem>>, vector<1x1x256x256xbf16>
    %111 = vector.shape_cast %110 : vector<1x1x256x256xbf16> to vector<256x256xbf16>
    %cst_103 = arith.constant dense<0.000000e+00> : vector<24x256xf32>
    %112 = tpu.matmul %109, %111, %cst_103 {dimension_numbers = #tpu.dot_dimension_numbers<[1], [0], [0], [1], [0, 0, 1, 1], [], []>} : vector<24x256xbf16>, vector<256x256xbf16>, vector<24x256xf32> -> vector<24x256xf32>
    %113 = arith.addf %107, %112 : vector<24x256xf32>
    %c7_104 = arith.constant 7 : index
    %c0_105 = arith.constant 0 : index
    %114 = vector.load %arg10[%c7_104, %c0_105] : memref<42x256xf32, #tpu.memory_space<vmem>>, vector<24x256xf32>
    %115 = arith.truncf %114 : vector<24x256xf32> to vector<24x256xbf16>
    %c0_106 = arith.constant 0 : index
    %c4_107 = arith.constant 4 : index
    %c0_108 = arith.constant 0 : index
    %c0_109 = arith.constant 0 : index
    %116 = vector.load %arg5[%c0_106, %c4_107, %c0_108, %c0_109] : memref<1x9x256x256xbf16, #tpu.memory_space<vmem>>, vector<1x1x256x256xbf16>
    %117 = vector.shape_cast %116 : vector<1x1x256x256xbf16> to vector<256x256xbf16>
    %cst_110 = arith.constant dense<0.000000e+00> : vector<24x256xf32>
    %118 = tpu.matmul %115, %117, %cst_110 {dimension_numbers = #tpu.dot_dimension_numbers<[1], [0], [0], [1], [0, 0, 1, 1], [], []>} : vector<24x256xbf16>, vector<256x256xbf16>, vector<24x256xf32> -> vector<24x256xf32>
    %119 = arith.addf %113, %118 : vector<24x256xf32>
    %c8_111 = arith.constant 8 : index
    %c0_112 = arith.constant 0 : index
    %120 = vector.load %arg10[%c8_111, %c0_112] : memref<42x256xf32, #tpu.memory_space<vmem>>, vector<24x256xf32>
    %121 = arith.truncf %120 : vector<24x256xf32> to vector<24x256xbf16>
    %c0_113 = arith.constant 0 : index
    %c5_114 = arith.constant 5 : index
    %c0_115 = arith.constant 0 : index
    %c0_116 = arith.constant 0 : index
    %122 = vector.load %arg5[%c0_113, %c5_114, %c0_115, %c0_116] : memref<1x9x256x256xbf16, #tpu.memory_space<vmem>>, vector<1x1x256x256xbf16>
    %123 = vector.shape_cast %122 : vector<1x1x256x256xbf16> to vector<256x256xbf16>
    %cst_117 = arith.constant dense<0.000000e+00> : vector<24x256xf32>
    %124 = tpu.matmul %121, %123, %cst_117 {dimension_numbers = #tpu.dot_dimension_numbers<[1], [0], [0], [1], [0, 0, 1, 1], [], []>} : vector<24x256xbf16>, vector<256x256xbf16>, vector<24x256xf32> -> vector<24x256xf32>
    %125 = arith.addf %119, %124 : vector<24x256xf32>
    %c12_118 = arith.constant 12 : index
    %c0_119 = arith.constant 0 : index
    %126 = vector.load %arg10[%c12_118, %c0_119] : memref<42x256xf32, #tpu.memory_space<vmem>>, vector<24x256xf32>
    %127 = arith.truncf %126 : vector<24x256xf32> to vector<24x256xbf16>
    %c0_120 = arith.constant 0 : index
    %c6_121 = arith.constant 6 : index
    %c0_122 = arith.constant 0 : index
    %c0_123 = arith.constant 0 : index
    %128 = vector.load %arg5[%c0_120, %c6_121, %c0_122, %c0_123] : memref<1x9x256x256xbf16, #tpu.memory_space<vmem>>, vector<1x1x256x256xbf16>
    %129 = vector.shape_cast %128 : vector<1x1x256x256xbf16> to vector<256x256xbf16>
    %cst_124 = arith.constant dense<0.000000e+00> : vector<24x256xf32>
    %130 = tpu.matmul %127, %129, %cst_124 {dimension_numbers = #tpu.dot_dimension_numbers<[1], [0], [0], [1], [0, 0, 1, 1], [], []>} : vector<24x256xbf16>, vector<256x256xbf16>, vector<24x256xf32> -> vector<24x256xf32>
    %131 = arith.addf %125, %130 : vector<24x256xf32>
    %c13_125 = arith.constant 13 : index
    %c0_126 = arith.constant 0 : index
    %132 = vector.load %arg10[%c13_125, %c0_126] : memref<42x256xf32, #tpu.memory_space<vmem>>, vector<24x256xf32>
    %133 = arith.truncf %132 : vector<24x256xf32> to vector<24x256xbf16>
    %c0_127 = arith.constant 0 : index
    %c7_128 = arith.constant 7 : index
    %c0_129 = arith.constant 0 : index
    %c0_130 = arith.constant 0 : index
    %134 = vector.load %arg5[%c0_127, %c7_128, %c0_129, %c0_130] : memref<1x9x256x256xbf16, #tpu.memory_space<vmem>>, vector<1x1x256x256xbf16>
    %135 = vector.shape_cast %134 : vector<1x1x256x256xbf16> to vector<256x256xbf16>
    %cst_131 = arith.constant dense<0.000000e+00> : vector<24x256xf32>
    %136 = tpu.matmul %133, %135, %cst_131 {dimension_numbers = #tpu.dot_dimension_numbers<[1], [0], [0], [1], [0, 0, 1, 1], [], []>} : vector<24x256xbf16>, vector<256x256xbf16>, vector<24x256xf32> -> vector<24x256xf32>
    %137 = arith.addf %131, %136 : vector<24x256xf32>
    %c14_132 = arith.constant 14 : index
    %c0_133 = arith.constant 0 : index
    %138 = vector.load %arg10[%c14_132, %c0_133] : memref<42x256xf32, #tpu.memory_space<vmem>>, vector<24x256xf32>
    %139 = arith.truncf %138 : vector<24x256xf32> to vector<24x256xbf16>
    %c0_134 = arith.constant 0 : index
    %c8_135 = arith.constant 8 : index
    %c0_136 = arith.constant 0 : index
    %c0_137 = arith.constant 0 : index
    %140 = vector.load %arg5[%c0_134, %c8_135, %c0_136, %c0_137] : memref<1x9x256x256xbf16, #tpu.memory_space<vmem>>, vector<1x1x256x256xbf16>
    %141 = vector.shape_cast %140 : vector<1x1x256x256xbf16> to vector<256x256xbf16>
    %cst_138 = arith.constant dense<0.000000e+00> : vector<24x256xf32>
    %142 = tpu.matmul %139, %141, %cst_138 {dimension_numbers = #tpu.dot_dimension_numbers<[1], [0], [0], [1], [0, 0, 1, 1], [], []>} : vector<24x256xbf16>, vector<256x256xbf16>, vector<24x256xf32> -> vector<24x256xf32>
    %143 = arith.addf %137, %142 : vector<24x256xf32>
    %c0_139 = arith.constant 0 : index
    %c0_140 = arith.constant 0 : index
    %c0_141 = arith.constant 0 : index
    %144 = vector.load %arg6[%c0_139, %c0_140, %c0_141] : memref<1x1x256xf32, #tpu.memory_space<vmem>>, vector<1x1x256xf32>
    %145 = vector.shape_cast %144 : vector<1x1x256xf32> to vector<1x256xf32>
    %146 = vector.broadcast %145 : vector<1x256xf32> to vector<24x256xf32>
    %147 = arith.addf %143, %146 : vector<24x256xf32>
    %cst_142 = arith.constant 0.000000e+00 : f32
    %148 = vector.broadcast %cst_142 : f32 to vector<24x256xf32>
    %149 = arith.maximumf %147, %148 : vector<24x256xf32>
    %cst_143 = arith.constant 0.000000e+00 : f32
    %150 = vector.shape_cast %18 : vector<24x1xi1> to vector<24x1xi1>
    %151 = vector.broadcast %150 : vector<24x1xi1> to vector<24x256xi1>
    %152 = vector.broadcast %cst_143 : f32 to vector<24x256xf32>
    %153 = arith.select %151, %149, %152 : vector<24x256xi1>, vector<24x256xf32>
    %cst_144 = arith.constant dense<0.000000e+00> : vector<256xf32>
    %154 = vector.multi_reduction <add>, %153, %cst_144 [0] : vector<24x256xf32> to vector<256xf32>
    %155 = vector.shape_cast %154 : vector<256xf32> to vector<1x256xf32>
    %cst_145 = arith.constant 6.250000e-02 : f32
    %156 = vector.broadcast %cst_145 : f32 to vector<1x256xf32>
    %157 = arith.mulf %155, %156 : vector<1x256xf32>
    %c0_146 = arith.constant 0 : index
    %c0_147 = arith.constant 0 : index
    %c0_148 = arith.constant 0 : index
    %158 = vector.load %arg7[%c0_146, %c0_147, %c0_148] : memref<1x256x128xf32, #tpu.memory_space<vmem>>, vector<1x256x128xf32>
    %159 = vector.shape_cast %158 : vector<1x256x128xf32> to vector<256x128xf32>
    %cst_149 = arith.constant dense<0.000000e+00> : vector<1x128xf32>
    %160 = tpu.matmul %157, %159, %cst_149 {dimension_numbers = #tpu.dot_dimension_numbers<[1], [0], [0], [1], [0, 0, 1, 1], [], []>} : vector<1x256xf32>, vector<256x128xf32>, vector<1x128xf32> -> vector<1x128xf32>
    %c0_150 = arith.constant 0 : index
    %c0_151 = arith.constant 0 : index
    %c0_152 = arith.constant 0 : index
    %161 = vector.load %arg8[%c0_150, %c0_151, %c0_152] : memref<1x1x128xf32, #tpu.memory_space<vmem>>, vector<1x1x128xf32>
    %162 = vector.shape_cast %161 : vector<1x1x128xf32> to vector<1x128xf32>
    %163 = arith.addf %160, %162 : vector<1x128xf32>
    %c0_153 = arith.constant 0 : index
    %c0_154 = arith.constant 0 : index
    %c0_155 = arith.constant 0 : index
    %c0_156 = arith.constant 0 : index
    %164 = vector.load %arg9[%c0_153, %c0_154, %c0_155, %c0_156] : memref<1x1x1x128xf32, #tpu.memory_space<vmem>>, vector<1x1x1x128xf32>
    %165 = vector.shape_cast %164 : vector<1x1x1x128xf32> to vector<1x128xf32>
    %166 = vector.shape_cast %163 : vector<1x128xf32> to vector<1x1x1x128xf32>
    tpu.vector_store %arg9[%c0_153, %c0_154, %c0_155, %c0_156], %166 {strides = array<i32>} : memref<1x1x1x128xf32, #tpu.memory_space<vmem>>, vector<1x1x1x128xf32>,
    return
  }
  func.func @transform_0(%arg0: i32, %arg1: i32) -> (i32, i32, i32) {
    %c0_i32 = arith.constant 0 : i32
    %c0_i32_0 = arith.constant 0 : i32
    %c0_i32_1 = arith.constant 0 : i32
    return %arg1, %c0_i32, %c0_i32_0 : i32, i32, i32
  }
  func.func @transform_1(%arg0: i32, %arg1: i32) -> (i32, i32, i32, i32) {
    %c0_i32 = arith.constant 0 : i32
    %c0_i32_0 = arith.constant 0 : i32
    %c0_i32_1 = arith.constant 0 : i32
    %c0_i32_2 = arith.constant 0 : i32
    return %arg0, %c0_i32, %c0_i32_0, %c0_i32_1 : i32, i32, i32, i32
  }
  func.func @transform_2(%arg0: i32, %arg1: i32) -> (i32, i32, i32) {
    %c0_i32 = arith.constant 0 : i32
    %c0_i32_0 = arith.constant 0 : i32
    %c0_i32_1 = arith.constant 0 : i32
    return %arg0, %c0_i32, %c0_i32_0 : i32, i32, i32
  }
  func.func @transform_3(%arg0: i32, %arg1: i32) -> (i32, i32, i32, i32) {
    %c0_i32 = arith.constant 0 : i32
    %c0_i32_0 = arith.constant 0 : i32
    %c0_i32_1 = arith.constant 0 : i32
    %c0_i32_2 = arith.constant 0 : i32
    return %arg0, %c0_i32, %c0_i32_0, %c0_i32_1 : i32, i32, i32, i32
  }
  func.func @transform_4(%arg0: i32, %arg1: i32) -> (i32, i32, i32) {
    %c0_i32 = arith.constant 0 : i32
    %c0_i32_0 = arith.constant 0 : i32
    %c0_i32_1 = arith.constant 0 : i32
    return %arg0, %c0_i32, %c0_i32_0 : i32, i32, i32
  }
  func.func @transform_5(%arg0: i32, %arg1: i32) -> (i32, i32, i32) {
    %c0_i32 = arith.constant 0 : i32
    %c0_i32_0 = arith.constant 0 : i32
    %c0_i32_1 = arith.constant 0 : i32
    return %arg0, %c0_i32, %c0_i32_0 : i32, i32, i32
  }
  func.func @transform_6(%arg0: i32, %arg1: i32) -> (i32, i32, i32) {
    %c0_i32 = arith.constant 0 : i32
    %c0_i32_0 = arith.constant 0 : i32
    %c0_i32_1 = arith.constant 0 : i32
    return %arg0, %c0_i32, %c0_i32_0 : i32, i32, i32
  }
  func.func @transform_7(%arg0: i32, %arg1: i32) -> (i32, i32, i32, i32) {
    %c0_i32 = arith.constant 0 : i32
    %c0_i32_0 = arith.constant 0 : i32
    %c0_i32_1 = arith.constant 0 : i32
    return %arg0, %arg1, %c0_i32, %c0_i32_0 : i32, i32, i32, i32
  }
}

</mosaic_0001>

<bundles_post_ra>
// kernel: posenet_forward.2
= control target key start
LH: loop header
LB: loop body
LE: loop exit
PB: predicated region body
PF: predicated region fallthrough
CT: control target
= control target key end

     0   :  { %10 = vsyncpa [#allocation3], 0  ;;  %s502_s18 = smov [#allocation2]   ;;  %s639_s0 = inlined_call_operand.vmem [shape: bf16[32,128], index: 0, kind: input, shape index: {}]   ;;  %s640_s1 = inlined_call_operand.vmem [shape: bf16[128,128], index: 1, kind: input, shape index: {}]   ;;  %s641_s2 = inlined_call_operand.vmem [shape: f32[1,128], index: 2, kind: input, shape index: {}]   ;;  %s642_s3 = inlined_call_operand.vmem [shape: bf16[128,256], index: 3, kind: input, shape index: {}]   ;;  %s643_s4 = inlined_call_operand.hbm [shape: f32[1,256], index: 4, kind: input, shape index: {}]   ;;  %s644_s5 = inlined_call_operand.vmem [shape: bf16[32,256], index: 5, kind: output, shape index: {}]  }
   0x1   :  { %s25_s19 = sshll.u32 %s502_s18, 4  ;;  %s478_s22 = scalar_lea.hbm %s643_s4, 32  ;;  %s26_s19 = int_to_ptr.vmem [resolvable:$true] %s25_s19 }
   0x2   :  { %p479_p0 = scmp.ne.s32.totalorder %s643_s4, %s478_s22  ;;  %p482_p1 = scmp.lt.u32.totalorder %s478_s22, %s643_s4 }
   0x4   :  { %p484_p2 = pnand %p482_p1, %p479_p0 }
   0x6   :  { %487 = shalt.err (!%p484_p2)
}
   0x7   :  { %s488_s27 = scalar_lea.vmem %s26_s19, 32  ;;  %p493_p4 = scmp.lt.s32.totalorder %s26_s19, %s26_s19 }
   0x8   :  { %p489_p3 = scmp.ne.s32.totalorder %s26_s19, %s488_s27  ;;  %p494_p5 = scmp.lt.s32.totalorder %s488_s27, %s488_s27 }
   0xa   :  { %p495_p6 = por %p494_p5, %p493_p4 }
   0xc   :  { %p496_p7 = pnand %p495_p6, %p489_p3 }
   0xe   :  { %499 = shalt.err (!%p496_p7)
}
   0xf   :  { %28 = dma.hbm_to_vmem [thread:$0]  %s643_s4, 32, %s26_s19, [#allocation3]  }
  0x10   :  { %500 = dma.done.wait [#allocation3], 32  }
  0x11   :  { %501 = vsyncadd [#allocation3], 4294967264  ;;  %v444_v0 = vld [vmem:[%s640_s1] sm:$0xff]   ;;  %v445_v1 = vld [vmem:[%s640_s1 + $0x8] sm:$0xff]   ;;  %v503_v26 = vmov 0   ;;  %v193_v42 = vlaneseq }
  0x12   :  { %422 = vmatprep.subr.bf16.mxu0 %v444_v0  ;;  %v446_v2 = vld [vmem:[%s640_s1 + $0x10] sm:$0xff]   ;;  %v447_v3 = vld [vmem:[%s640_s1 + $0x18] sm:$0xff]   ;;  %v452_v4 = vld [vmem:[%s639_s0] sm:$0xff]   ;;  %315 = vmatprep.mubr.bf16.mxu1 %v503_v26 }
  0x13   :  { %423 = vmatpush3.bf16.msra.mxu0 %v444_v0  ;;  %438 = vmatprep.mubr.bf16.mxu0 %v452_v4  ;;  %v454_v5 = vld [vmem:[%s642_s3 + $0x4] ss:$8 sps:$4 sm:$0xff]   ;;  %v456_v6 = vld [vmem:[%s642_s3] ss:$8 sps:$4 sm:$0xff]   ;;  %v457_v8 = vld [vmem:[%s642_s3 + $0x14] ss:$8 sps:$4 sm:$0xff]  }
  0x14   :  { %424 = vmatprep.subr.bf16.mxu0 %v445_v1  ;;  %v448_v7 = vld [vmem:[%s640_s1 + $0x20] sm:$0xff]   ;;  %283 = vmatprep.subr.bf16.mxu1 %v454_v5  ;;  %v459_v9 = vld [vmem:[%s642_s3 + $0x10] ss:$8 sps:$4 sm:$0xff]   ;;  %v449_v11 = vld [vmem:[%s640_s1 + $0x28] sm:$0xff]   ;;  %v194_v43 = vshrl.u32 %v193_v42, 7 }
  0x15   :  { %284 = vmatpush1.bf16.msra.mxu1 %v456_v6  ;;  %v460_v10 = vld [vmem:[%s642_s3 + $0x24] ss:$8 sps:$4 sm:$0xff]   ;;  %v462_v12 = vld [vmem:[%s642_s3 + $0x20] ss:$8 sps:$4 sm:$0xff]   ;;  %v463_v13 = vld [vmem:[%s642_s3 + $0x34] ss:$8 sps:$4 sm:$0xff]  }
  0x16   :  { %285 = vmatprep.subr.bf16.mxu1 %v457_v8  ;;  %v450_v14 = vld [vmem:[%s640_s1 + $0x30] sm:$0xff]   ;;  %v466_v16 = vld [vmem:[%s642_s3 + $0x44] ss:$8 sps:$4 sm:$0xff]   ;;  %v451_v17 = vld [vmem:[%s640_s1 + $0x38] sm:$0xff]   ;;  %v195_v44 = vsub.s32 0, %v194_v43  ;;  %v199_v46 = vsub.s32 1, %v194_v43 }
  0x17   :  { %425 = vmatpush3.bf16.msra.mxu0 %v445_v1  ;;  %v465_v15 = vld [vmem:[%s642_s3 + $0x30] ss:$8 sps:$4 sm:$0xff]   ;;  %v468_v18 = vld [vmem:[%s642_s3 + $0x40] ss:$8 sps:$4 sm:$0xff]   ;;  %v469_v19 = vld [vmem:[%s642_s3 + $0x54] ss:$8 sps:$4 sm:$0xff]  }
  0x18   :  { %426 = vmatprep.subr.bf16.mxu0 %v446_v2  ;;  %v471_v20 = vld [vmem:[%s642_s3 + $0x50] ss:$8 sps:$4 sm:$0xff]   ;;  %v453_v21 = vld [vmem:[%s639_s0 + $0x8] sm:$0xff]   ;;  %v475_v24 = vld [vmem:[%s642_s3 + $0x74] ss:$8 sps:$4 sm:$0xff]  }
  0x19   :  { %286 = vmatpush1.bf16.msra.mxu1 %v459_v9  ;;  %v472_v22 = vld [vmem:[%s642_s3 + $0x64] ss:$8 sps:$4 sm:$0xff]   ;;  %v474_v23 = vld [vmem:[%s642_s3 + $0x60] ss:$8 sps:$4 sm:$0xff]   ;;  %v477_v25 = vld [vmem:[%s642_s3 + $0x70] ss:$8 sps:$4 sm:$0xff]  }
  0x1a   :  { %287 = vmatprep.subr.bf16.mxu1 %v460_v10  ;;  %v377_v27 = vld [vmem:[%s641_s2] ss:$0 sm:$0xff] }
  0x1b   :  { %427 = vmatpush3.bf16.msra.mxu0 %v446_v2  ;;  %v191_v45 = vld [vmem:[#allocation2] sm:$0x3] }
  0x1c   :  { %428 = vmatprep.subr.bf16.mxu0 %v447_v3  ;;  %v196_v47 = vrot.slane %v191_v45, %v195_v44  ;;  %v200_v48 = vrot.slane %v191_v45, %v199_v46 }
  0x1d   :  { %288 = vmatpush1.bf16.msra.mxu1 %v462_v12 }
  0x1e   :  { %289 = vmatprep.subr.bf16.mxu1 %v463_v13 }
  0x1f   :  { %429 = vmatpush3.bf16.msra.mxu0 %v447_v3 }
  0x20   :  { %430 = vmatprep.subr.bf16.mxu0 %v448_v7 }
  0x21   :  { %290 = vmatpush1.bf16.msra.mxu1 %v465_v15 }
  0x22   :  { %291 = vmatprep.subr.bf16.mxu1 %v466_v16 }
  0x23   :  { %431 = vmatpush3.bf16.msra.mxu0 %v448_v7 }
  0x24   :  { %432 = vmatprep.subr.bf16.mxu0 %v449_v11 }
  0x25   :  { %292 = vmatpush1.bf16.msra.mxu1 %v468_v18 }
  0x26   :  { %293 = vmatprep.subr.bf16.mxu1 %v469_v19 }
  0x27   :  { %433 = vmatpush3.bf16.msra.mxu0 %v449_v11 }
  0x28   :  { %434 = vmatprep.subr.bf16.mxu0 %v450_v14 }
  0x29   :  { %294 = vmatpush1.bf16.msra.mxu1 %v471_v20 }
  0x2a   :  { %295 = vmatprep.subr.bf16.mxu1 %v472_v22 }
  0x2b   :  { %435 = vmatpush3.bf16.msra.mxu0 %v450_v14 }
  0x2c   :  { %436 = vmatprep.subr.bf16.mxu0 %v451_v17 }
  0x2d   :  { %296 = vmatpush1.bf16.msra.mxu1 %v474_v23 }
  0x2e   :  { %297 = vmatprep.subr.bf16.mxu1 %v475_v24 }
  0x2f   :  { %437 = vmatpush3.bf16.msra.mxu0 %v451_v17 }
  0x31   :  { %298 = vmatpush1.bf16.msra.mxu1 %v477_v25 }
  0x32   :  { %439 = vmatmul.mubr.bf16.vlgmr.msra.gmra.mrb[0].mxu0 %v453_v21 }
 0x105   :  { %v440_v28 = vpop.f32.mrb[0].mxu0 }
 0x106   :  { %v163_v29 = vadd.f32 %v440_v28, %v377_v27  ;;  %v154_v30 = vpop.f32.mrb[1].mxu0 }
 0x107   :  { %v155_v31 = vadd.f32 %v377_v27, %v154_v30  ;;  %v441_v32 = vpop.f32.mrb[2].mxu0 }
 0x108   :  { %v166_v33 = vadd.f32 %v441_v32, %v377_v27  ;;  %v157_v34 = vpop.f32.mrb[3].mxu0  ;;  %v171_v36 = vmax.f32 %v163_v29, 0.0 }
 0x109   :  { %v158_v35 = vadd.f32 %v377_v27, %v157_v34  ;;  %v169_v38 = vmax.f32 %v155_v31, 0.0 }
 0x10a   :  { %v172_v37 = vmax.f32 %v166_v33, 0.0 }
 0x10b   :  { %v170_v39 = vmax.f32 %v158_v35, 0.0 }
 0x10c   :  { %v174_v40 = vpack.c.bf16 %v172_v37, %v171_v36 }
 0x10d   :  { %v173_v41 = vpack.c.bf16 %v170_v39, %v169_v38 }
 0x10f   :  { %316 = vmatmul.mubr.bf16.vlgmr.msra.gmra.mrb[0].mxu1 %v173_v41 }
 0x110   :  { %325 = vmatprep.mubr.bf16.mxu1 %v503_v26 }
 0x117   :  { %326 = vmatmul.mubr.bf16.gmra.mrb[4].mxu1 %v174_v40 }
 0x1e2   :  { %v317_v49 = vpop.f32.mrb[0].mxu1 }
 0x1e3   :  { %v318_v50 = vadd.f32 %v317_v49, %v196_v47  ;;  %v319_v51 = vpop.f32.mrb[1].mxu1 }
 0x1e4   :  { %v320_v52 = vadd.f32 %v319_v51, %v200_v48  ;;  %v321_v53 = vpop.f32.mrb[2].mxu1 }
 0x1e5   :  { %v336_v54 = vmax.f32 %v318_v50, 0.0  ;;  %v322_v55 = vadd.f32 %v321_v53, %v196_v47  ;;  %v323_v56 = vpop.f32.mrb[3].mxu1 }
 0x1e6   :  { %v337_v57 = vmax.f32 %v320_v52, 0.0  ;;  %v324_v58 = vadd.f32 %v323_v56, %v200_v48 }
 0x1e7   :  { %v338_v59 = vmax.f32 %v322_v55, 0.0 }
 0x1e8   :  { %v408_v60 = vpack.c.bf16 %v337_v57, %v336_v54  ;;  %v339_v61 = vmax.f32 %v324_v58, 0.0 }
 0x1ea   :  { %368 = vst [vmem:[%s644_s5] sm:$0xff] %v408_v60  ;;  %v409_v62 = vpack.c.bf16 %v339_v61, %v338_v59  ;;  %v327_v63 = vpop.f32.mrb[4].mxu1 }
 0x1eb   :  { %v328_v0 = vadd.f32 %v327_v63, %v196_v47  ;;  %v329_v1 = vpop.f32.mrb[5].mxu1 }
 0x1ec   :  { %369 = vst [vmem:[%s644_s5 + $0x8] sm:$0xff] %v409_v62  ;;  %v330_v2 = vadd.f32 %v329_v1, %v200_v48  ;;  %v331_v3 = vpop.f32.mrb[6].mxu1 }
 0x1ed   :  { %v340_v4 = vmax.f32 %v328_v0, 0.0  ;;  %v332_v5 = vadd.f32 %v331_v3, %v196_v47  ;;  %v333_v6 = vpop.f32.mrb[7].mxu1 }
 0x1ee   :  { %v341_v7 = vmax.f32 %v330_v2, 0.0  ;;  %v334_v8 = vadd.f32 %v333_v6, %v200_v48 }
 0x1ef   :  { %v342_v9 = vmax.f32 %v332_v5, 0.0 }
 0x1f0   :  { %v410_v10 = vpack.c.bf16 %v341_v7, %v340_v4  ;;  %v343_v11 = vmax.f32 %v334_v8, 0.0 }
 0x1f2   :  { %370 = vst [vmem:[%s644_s5 + $0x10] sm:$0xff] %v410_v10  ;;  %v411_v12 = vpack.c.bf16 %v343_v11, %v342_v9 }
 0x1f4   :  { %371 = vst [vmem:[%s644_s5 + $0x18] sm:$0xff] %v411_v12 }
 0x1f5   :  { %376 = vsyncpa [#allocation3], 1 }

// kernel: posenet_forward.3
= control target key start
LH: loop header
LB: loop body
LE: loop exit
PB: predicated region body
PF: predicated region fallthrough
CT: control target
= control target key end

     0   :  { %s8079_s24 = smov 0   ;;  %s8081_s25 = smov 0   ;;  %s9252_s0 = inlined_call_operand.vmem [shape: bf16[2,42,256], index: 0, kind: input, shape index: {}]   ;;  %s9253_s1 = inlined_call_operand.vmem [shape: bf16[3,9,256,256], index: 1, kind: input, shape index: {}]   ;;  %s9254_s2 = inlined_call_operand.vmem [shape: f32[3,1,256], index: 2, kind: input, shape index: {}]   ;;  %s9255_s3 = inlined_call_operand.vmem [shape: bf16[3,9,256,256], index: 3, kind: input, shape index: {}]   ;;  %s9256_s4 = inlined_call_operand.vmem [shape: f32[3,1,256], index: 4, kind: input, shape index: {}]   ;;  %s9257_s5 = inlined_call_operand.vmem [shape: f32[3,256,128], index: 5, kind: input, shape index: {}]   ;;  %s9258_s6 = inlined_call_operand.vmem [shape: f32[3,1,128], index: 6, kind: input, shape index: {}]   ;;  %s9259_s7 = inlined_call_operand.vmem [shape: f32[3,2,1,128], index: 7, kind: output, shape index: {}]  }
   0x1   :  { %s8083_s26 = smov 0   ;;  %s8085_s27 = smov 0  }
   0x2   :  { %s8087_s28 = smov 0  }
   0x3 LB: > { %s26_s29 = sadd.s32 1, %s8028_s26  ;;  %s29_s30 = sadd.s32 1, %s8032_s27  ;;  %s8036_s28 = sphi %s8087_s28, %s17_s28   ;;  %s8032_s27 = sphi %s8085_s27, %s9273_s27   ;;  %s8028_s26 = sphi %s8083_s26, %s9272_s26   ;;  %s8024_s25 = sphi %s8081_s25, %s9271_s25   ;;  %s8020_s24 = sphi %s8079_s24, %s9270_s24  }
   0x4   : > { %p27_p0 = scmp.ge.s32.totalorder %s26_s29, 2  ;;  %p5798_p1 = scmp.ge.s32.totalorder %s8036_s28, 1 }
   0x5   : > { %p307_p2 = scmp.lt.s32.totalorder %s8036_s28, 7 }
   0x6   : > { %s9275_s29 = smov (%p27_p0, %s26_s29), 0  ;;  %s9277_s30 = smov (!%p27_p0, %s29_s30), %s8032_s27 }
   0x7   : > { %p308_p3 = pnand %p5798_p1, %p307_p2  ;;  %p31_p4 = scmp.ge.s32.totalorder %s9277_s30, 3 }
   0x8   : > { %p372_p5 = scmp.lt.s32.totalorder (!%p308_p3), %s8024_s25, 2  ;;  %p367_p6 = scmp.lt.s32.totalorder (!%p308_p3), %s8020_s24, 1  ;;  %vm545_vm0 = vsmask.f32 (!%p308_p3), 7424  ;;  %vm1047_vm1 = vcmask (!%p308_p3), 1046528   ;;  %vm1320_vm2 = vcmask (!%p308_p3), 1044480  }
   0x9   : > { %s9279_s30 = smov (%p31_p4, %s9277_s30), 0  ;;  %311 = sbr.rel (%p308_p3) target bundleno = 1818 (0x71a), region = 48 }
   0xa   : > { %vm1587_vm3 = vsmask.f32 (!%p308_p3), 4352  ;;  %vm2154_vm4 = vcmask (!%p308_p3), 1045504   ;;  %vm2421_vm5 = vsmask.f32 (!%p308_p3), 5376 }
  0x10   : > { %s9281_s25 = smov (!%p372_p5, %s8024_s25), 2  ;;  %s9283_s24 = smov (!%p367_p6, %s8020_s24), 1 }
  0x11   : > { %s7056_s8 = smul.u32 2304, %s9281_s25  ;;  %s8681_s19 = sshll.u32 %s9281_s25, 1 }
  0x12   : > { %s7055_s12 = smul.u32 48, %s9283_s24  ;;  %s380_s22 = scalar_lea.vmem %s9254_s2, %s8681_s19 }
  0x13   : > { %s8119_s11 = scalar_lea.vmem %s9253_s1, %s7056_s8  ;;  %s8625_s18 = scalar_lea.vmem %s9255_s3, %s7056_s8 }
  0x14   : > { %v7104_v0 = vld [vmem:[%s8119_s11 + $0x104] ss:$8 sps:$4 sm:$0xff]   ;;  %v7106_v1 = vld [vmem:[%s8119_s11 + $0x100] ss:$8 sps:$4 sm:$0xff]   ;;  %v7107_v2 = vld [vmem:[%s8119_s11 + $0x114] ss:$8 sps:$4 sm:$0xff]   ;;  %s8140_s15 = scalar_lea.vmem %s9252_s0, %s7055_s12  ;;  %s389_s13 = scalar_lea.vmem %s9256_s4, %s8681_s19 }
  0x15   : > { %740 = vmatprep.subr.bf16.mxu0 %v7104_v0  ;;  %v7109_v3 = vld [vmem:[%s8119_s11 + $0x110] ss:$8 sps:$4 sm:$0xff]   ;;  %v7110_v4 = vld [vmem:[%s8119_s11 + $0x124] ss:$8 sps:$4 sm:$0xff]   ;;  %v7112_v5 = vld [vmem:[%s8119_s11 + $0x120] ss:$8 sps:$4 sm:$0xff]   ;;  %s397_s16 = scalar_lea.vmem %s9258_s6, %s9281_s25  ;;  %s403_s17 = sadd.s32 %s8681_s19, %s9283_s24 }
  0x16   : > { %741 = vmatpush1.bf16.msra.mxu0 %v7106_v1  ;;  %v7113_v6 = vld [vmem:[%s8119_s11 + $0x134] ss:$8 sps:$4 sm:$0xff]   ;;  %v7115_v7 = vld [vmem:[%s8119_s11 + $0x130] ss:$8 sps:$4 sm:$0xff]   ;;  %v7116_v8 = vld [vmem:[%s8119_s11 + $0x144] ss:$8 sps:$4 sm:$0xff]   ;;  %s404_s21 = scalar_lea.vmem %s9259_s7, %s403_s17 }
  0x17   : > { %742 = vmatprep.subr.bf16.mxu0 %v7107_v2  ;;  %v7118_v9 = vld [vmem:[%s8119_s11 + $0x140] ss:$8 sps:$4 sm:$0xff]   ;;  %v7119_v10 = vld [vmem:[%s8119_s11 + $0x154] ss:$8 sps:$4 sm:$0xff]   ;;  %v7121_v11 = vld [vmem:[%s8119_s11 + $0x150] ss:$8 sps:$4 sm:$0xff]  }
  0x18   : > { %v7122_v12 = vld [vmem:[%s8119_s11 + $0x164] ss:$8 sps:$4 sm:$0xff]   ;;  %v8149_v15 = vld [vmem:[%s8140_s15 + $0x10] sm:$0xff]  ;;  %v495_v16 = vld [vmem:[%s8140_s15 + $0x18] sm:$0x11]  ;;  %s6923_s23 = sshll.u32 %s9281_s25, 8 }
  0x19   : > { %v460_v13 = vld [vmem:[%s8140_s15] sm:$0xff]  ;;  %v8146_v14 = vld [vmem:[%s8140_s15 + $0x8] sm:$0xff]  ;;  %v8157_v19 = vcombine.high %v8149_v15, %v495_v16  ;;  %v7125_v20 = vld [vmem:[%s8119_s11 + $0x174] ss:$8 sps:$4 sm:$0xff]   ;;  %v8181_v42 = vcombine.low %v8149_v15, %v495_v16  ;;  %s9170_s10 = scalar_lea.vmem %s9257_s5, %s6923_s23 }
  0x1a   : > { %743 = vmatpush1.bf16.msra.mxu0 %v7109_v3  ;;  %v8153_v17 = vcombine.high %v460_v13, %v8146_v14  ;;  %v7124_v18 = vld [vmem:[%s8119_s11 + $0x160] ss:$8 sps:$4 sm:$0xff]   ;;  %v7127_v25 = vld [vmem:[%s8119_s11 + $0x170] ss:$8 sps:$4 sm:$0xff]   ;;  %v7128_v27 = vld [vmem:[%s8119_s11 + $0x184] ss:$8 sps:$4 sm:$0xff]   ;;  %v8176_v39 = vcombine.low %v460_v13, %v8146_v14 }
  0x1b   : > { %744 = vmatprep.subr.bf16.mxu0 %v7110_v4  ;;  %v566_v23 = vshll.u32 %v8157_v19, 16  ;;  %v7130_v30 = vld [vmem:[%s8119_s11 + $0x180] ss:$8 sps:$4 sm:$0xff]   ;;  %v7131_v31 = vld [vmem:[%s8119_s11 + $0x194] ss:$8 sps:$4 sm:$0xff]   ;;  %v554_v48 = vshll.u32 %v8181_v42, 16 }
  0x1c   : > { %v559_v21 = vshrl.u32 %v8153_v17, 16  ;;  %v561_v22 = vshll.u32 %v8153_v17, 16  ;;  %v7133_v32 = vld [vmem:[%s8119_s11 + $0x190] ss:$8 sps:$4 sm:$0xff]   ;;  %v7134_v33 = vld [vmem:[%s8119_s11 + $0x1a4] ss:$8 sps:$4 sm:$0xff]  }
  0x1d   : > { %v568_v26 = vrot.slane %v566_v23, 1  ;;  %v7136_v34 = vld [vmem:[%s8119_s11 + $0x1a0] ss:$8 sps:$4 sm:$0xff]   ;;  %v7137_v35 = vld [vmem:[%s8119_s11 + $0x1b4] ss:$8 sps:$4 sm:$0xff]   ;;  %v549_v43 = vshll.u32 %v8176_v39, 16 }
  0x1e   : > { %745 = vmatpush1.bf16.msra.mxu0 %v7112_v5  ;;  %v563_v24 = vrot.slane %v561_v22, 1  ;;  %v7139_v36 = vld [vmem:[%s8119_s11 + $0x1b0] ss:$8 sps:$4 sm:$0xff]   ;;  %v7140_v37 = vld [vmem:[%s8119_s11 + $0x1c4] ss:$8 sps:$4 sm:$0xff]   ;;  %v547_v46 = vshrl.u32 %v8176_v39, 16 }
  0x1f   : > { %746 = vmatprep.subr.bf16.mxu0 %v7113_v6  ;;  %v7142_v38 = vld [vmem:[%s8119_s11 + $0x1c0] ss:$8 sps:$4 sm:$0xff]   ;;  %v7143_v40 = vld [vmem:[%s8119_s11 + $0x1d4] ss:$8 sps:$4 sm:$0xff]   ;;  %v7145_v41 = vld [vmem:[%s8119_s11 + $0x1d0] ss:$8 sps:$4 sm:$0xff]  }
  0x20   : > { %v564_v28 = vor.u32 %v563_v24, %v559_v21  ;;  %v7146_v44 = vld [vmem:[%s8119_s11 + $0x1e4] ss:$8 sps:$4 sm:$0xff]   ;;  %v7148_v45 = vld [vmem:[%s8119_s11 + $0x1e0] ss:$8 sps:$4 sm:$0xff]   ;;  %v551_v47 = vrot.slane %v549_v43, 1  ;;  %v556_v52 = vrot.slane %v554_v48, 1 }
  0x21   : > { %v7149_v49 = vld [vmem:[%s8119_s11 + $0x1f4] ss:$8 sps:$4 sm:$0xff]   ;;  %v7151_v50 = vld [vmem:[%s8119_s11 + $0x1f0] ss:$8 sps:$4 sm:$0xff]   ;;  %v573_v53 = vshrl.u32 %v8157_v19, 16  ;;  %v570_v59 = vshrl.u32 %v8181_v42, 16 }
  0x22   : > { %747 = vmatpush1.bf16.msra.mxu0 %v7115_v7  ;;  %v569_v29 = vsel %vm545_vm0, %v564_v28, %v568_v26  ;;  %v552_v51 = vor.u32 %v551_v47, %v547_v46  ;;  %v7156_v54 = vld [vmem:[%s8119_s11 + $0x4] ss:$8 sps:$4 sm:$0xff]   ;;  %v7154_v55 = vld [vmem:[%s8119_s11] ss:$8 sps:$4 sm:$0xff]   ;;  %v7161_v58 = vld [vmem:[%s8119_s11 + $0x14] ss:$8 sps:$4 sm:$0xff]  }
  0x23   : > { %748 = vmatprep.subr.bf16.mxu0 %v7116_v8  ;;  %772 = vmatprep.mubr.bf16.mxu0 %v569_v29  ;;  %v575_v57 = vor.u32 %v573_v53, %v568_v26  ;;  %v7159_v60 = vld [vmem:[%s8119_s11 + $0x10] ss:$8 sps:$4 sm:$0xff]   ;;  %v7164_v61 = vld [vmem:[%s8119_s11 + $0x24] ss:$8 sps:$4 sm:$0xff]   ;;  %v7162_v62 = vld [vmem:[%s8119_s11 + $0x20] ss:$8 sps:$4 sm:$0xff]   ;;  %v572_v63 = vor.u32 %v570_v59, %v556_v52 }
  0x24   : > { %v557_v56 = vsel %vm545_vm0, %v552_v51, %v556_v52  ;;  %v7167_v0 = vld [vmem:[%s8119_s11 + $0x34] ss:$8 sps:$4 sm:$0xff]   ;;  %v7165_v1 = vld [vmem:[%s8119_s11 + $0x30] ss:$8 sps:$4 sm:$0xff]   ;;  %v7170_v2 = vld [vmem:[%s8119_s11 + $0x44] ss:$8 sps:$4 sm:$0xff]  }
  0x25   : > { %v7168_v3 = vld [vmem:[%s8119_s11 + $0x40] ss:$8 sps:$4 sm:$0xff]   ;;  %v7173_v4 = vld [vmem:[%s8119_s11 + $0x54] ss:$8 sps:$4 sm:$0xff]   ;;  %v7171_v5 = vld [vmem:[%s8119_s11 + $0x50] ss:$8 sps:$4 sm:$0xff]  }
  0x26   : > { %749 = vmatpush1.bf16.msra.mxu0 %v7118_v9  ;;  %v7176_v6 = vld [vmem:[%s8119_s11 + $0x64] ss:$8 sps:$4 sm:$0xff]   ;;  %v7174_v7 = vld [vmem:[%s8119_s11 + $0x60] ss:$8 sps:$4 sm:$0xff]   ;;  %v7179_v8 = vld [vmem:[%s8119_s11 + $0x74] ss:$8 sps:$4 sm:$0xff]  }
  0x27   : > { %750 = vmatprep.subr.bf16.mxu0 %v7119_v10  ;;  %v7177_v9 = vld [vmem:[%s8119_s11 + $0x70] ss:$8 sps:$4 sm:$0xff]   ;;  %v7182_v10 = vld [vmem:[%s8119_s11 + $0x84] ss:$8 sps:$4 sm:$0xff]   ;;  %v7192_v22 = vld [vmem:[%s8119_s11 + $0xc0] ss:$8 sps:$4 sm:$0xff]  }
  0x28   : > { %v7183_v13 = vld [vmem:[%s8119_s11 + $0x90] ss:$8 sps:$4 sm:$0xff]   ;;  %v7188_v16 = vld [vmem:[%s8119_s11 + $0xa4] ss:$8 sps:$4 sm:$0xff]   ;;  %v7197_v23 = vld [vmem:[%s8119_s11 + $0xd4] ss:$8 sps:$4 sm:$0xff]  }
  0x29   : > { %v7194_v21 = vld [vmem:[%s8119_s11 + $0xc4] ss:$8 sps:$4 sm:$0xff]   ;;  %v7195_v24 = vld [vmem:[%s8119_s11 + $0xd0] ss:$8 sps:$4 sm:$0xff]   ;;  %v7198_v26 = vld [vmem:[%s8119_s11 + $0xe0] ss:$8 sps:$4 sm:$0xff]  }
  0x2a   : > { %751 = vmatpush1.bf16.msra.mxu0 %v7121_v11  ;;  %v7180_v11 = vld [vmem:[%s8119_s11 + $0x80] ss:$8 sps:$4 sm:$0xff]   ;;  %v7201_v28 = vld [vmem:[%s8119_s11 + $0xf0] ss:$8 sps:$4 sm:$0xff]   ;;  %v7206_v29 = vld [vmem:[%s8119_s11 + $0x204] ss:$8 sps:$4 sm:$0xff]  }
  0x2b   : > { %752 = vmatprep.subr.bf16.mxu0 %v7122_v12  ;;  %v7185_v12 = vld [vmem:[%s8119_s11 + $0x94] ss:$8 sps:$4 sm:$0xff]   ;;  %v7218_v46 = vld [vmem:[%s8119_s11 + $0x240] ss:$8 sps:$4 sm:$0xff]   ;;  %v7221_v48 = vld [vmem:[%s8119_s11 + $0x250] ss:$8 sps:$4 sm:$0xff]  }
  0x2c   : > { %v7223_v47 = vld [vmem:[%s8119_s11 + $0x254] ss:$8 sps:$4 sm:$0xff]   ;;  %v7227_v52 = vld [vmem:[%s8119_s11 + $0x270] ss:$8 sps:$4 sm:$0xff]   ;;  %v7232_v53 = vld [vmem:[%s8119_s11 + $0x284] ss:$8 sps:$4 sm:$0xff]  }
  0x2d   : > { %v7229_v51 = vld [vmem:[%s8119_s11 + $0x274] ss:$8 sps:$4 sm:$0xff]  }
  0x2e   : > { %753 = vmatpush1.bf16.msra.mxu0 %v7124_v18  ;;  %v7191_v18 = vld [vmem:[%s8119_s11 + $0xb4] ss:$8 sps:$4 sm:$0xff]  }
  0x2f   : > { %754 = vmatprep.subr.bf16.mxu0 %v7125_v20  ;;  %v7189_v20 = vld [vmem:[%s8119_s11 + $0xb0] ss:$8 sps:$4 sm:$0xff]   ;;  %v7241_v59 = vld [vmem:[%s8119_s11 + $0x2b4] ss:$8 sps:$4 sm:$0xff]  }
  0x32   : > { %755 = vmatpush1.bf16.msra.mxu0 %v7127_v25  ;;  %v7200_v25 = vld [vmem:[%s8119_s11 + $0xe4] ss:$8 sps:$4 sm:$0xff]  }
  0x33   : > { %756 = vmatprep.subr.bf16.mxu0 %v7128_v27  ;;  %v7203_v27 = vld [vmem:[%s8119_s11 + $0xf4] ss:$8 sps:$4 sm:$0xff]  }
  0x36   : > { %757 = vmatpush1.bf16.msra.mxu0 %v7130_v30  ;;  %v8228_v30 = vld [vmem:[%s8140_s15] sm:$0xee] }
  0x37   : > { %758 = vmatprep.subr.bf16.mxu0 %v7131_v31  ;;  %v7204_v31 = vld [vmem:[%s8119_s11 + $0x200] ss:$8 sps:$4 sm:$0xff]  }
  0x3a   : > { %759 = vmatpush1.bf16.msra.mxu0 %v7133_v32  ;;  %v5876_v32 = vcombine.high %v8149_v15, %v8149_v15 }
  0x3b   : > { %760 = vmatprep.subr.bf16.mxu0 %v7134_v33  ;;  %v7209_v33 = vld [vmem:[%s8119_s11 + $0x214] ss:$8 sps:$4 sm:$0xff]  }
  0x3e   : > { %761 = vmatpush1.bf16.msra.mxu0 %v7136_v34  ;;  %v5942_v34 = vcombine.high %v8228_v30, %v8146_v14 }
  0x3f   : > { %762 = vmatprep.subr.bf16.mxu0 %v7137_v35  ;;  %v7207_v35 = vld [vmem:[%s8119_s11 + $0x210] ss:$8 sps:$4 sm:$0xff]  }
  0x42   : > { %763 = vmatpush1.bf16.msra.mxu0 %v7139_v36  ;;  %v7214_v36 = vld [vmem:[%s8119_s11 + $0x224] ss:$8 sps:$4 sm:$0xff]  }
  0x43   : > { %764 = vmatprep.subr.bf16.mxu0 %v7140_v37  ;;  %v1051_v37 = vrot.slane %v5942_v34, 1  ;;  %v7283_v34 = vld [vmem:[%s8119_s11 + $0x390] ss:$8 sps:$4 sm:$0xff]  }
  0x46   : > { %765 = vmatpush1.bf16.msra.mxu0 %v7142_v38  ;;  %v1052_v38 = vrot.slane %v8157_v19, 1 }
  0x47   : > { %766 = vmatprep.subr.bf16.mxu0 %v7143_v40  ;;  %v7212_v40 = vld [vmem:[%s8119_s11 + $0x220] ss:$8 sps:$4 sm:$0xff]  }
  0x48   : > { %v1053_v43 = vsel %vm1047_vm1, %v1051_v37, %v1052_v38  ;;  %v7291_v37 = vld [vmem:[%s8119_s11 + $0x3b4] ss:$8 sps:$4 sm:$0xff]  }
  0x4a   : > { %767 = vmatpush1.bf16.msra.mxu0 %v7145_v41  ;;  %v5875_v41 = vcombine.low %v8149_v15, %v8149_v15 }
  0x4b   : > { %768 = vmatprep.subr.bf16.mxu0 %v7146_v44  ;;  %v7215_v44 = vld [vmem:[%s8119_s11 + $0x230] ss:$8 sps:$4 sm:$0xff]  }
  0x4e   : > { %769 = vmatpush1.bf16.msra.mxu0 %v7148_v45  ;;  %v7220_v45 = vld [vmem:[%s8119_s11 + $0x244] ss:$8 sps:$4 sm:$0xff]  }
  0x4f   : > { %770 = vmatprep.subr.bf16.mxu0 %v7149_v49  ;;  %v7226_v49 = vld [vmem:[%s8119_s11 + $0x264] ss:$8 sps:$4 sm:$0xff]  }
  0x52   : > { %771 = vmatpush1.bf16.msra.mxu0 %v7151_v50  ;;  %v7224_v50 = vld [vmem:[%s8119_s11 + $0x260] ss:$8 sps:$4 sm:$0xff]  }
  0x53   : > { %957 = vmatprep.subr.bf16.mxu0 %v7156_v54  ;;  %v7230_v54 = vld [vmem:[%s8119_s11 + $0x280] ss:$8 sps:$4 sm:$0xff]  }
  0x55   : > { %773 = vmatmul.mubr.bf16.vlgmr.msra.gmra.mrb[0].mxu0 %v557_v56  ;;  %v7233_v56 = vld [vmem:[%s8119_s11 + $0x290] ss:$8 sps:$4 sm:$0xff]  }
  0x56   : > { %958 = vmatpush1.bf16.msra.mxu0 %v7154_v55  ;;  %782 = vmatprep.mubr.bf16.mxu0 %v575_v57  ;;  %v7235_v55 = vld [vmem:[%s8119_s11 + $0x294] ss:$8 sps:$4 sm:$0xff]   ;;  %v7238_v57 = vld [vmem:[%s8119_s11 + $0x2a4] ss:$8 sps:$4 sm:$0xff]  }
  0x57   : > { %959 = vmatprep.subr.bf16.mxu0 %v7161_v58  ;;  %v7236_v58 = vld [vmem:[%s8119_s11 + $0x2a0] ss:$8 sps:$4 sm:$0xff]  }
  0x5a   : > { %960 = vmatpush1.bf16.msra.mxu0 %v7159_v60  ;;  %v7239_v60 = vld [vmem:[%s8119_s11 + $0x2b0] ss:$8 sps:$4 sm:$0xff]  }
  0x5b   : > { %961 = vmatprep.subr.bf16.mxu0 %v7164_v61  ;;  %v7244_v61 = vld [vmem:[%s8119_s11 + $0x2c4] ss:$8 sps:$4 sm:$0xff]  }
  0x5d   : > { %783 = vmatmul.mubr.bf16.gmra.mrb[4].mxu0 %v572_v63  ;;  %v7247_v63 = vld [vmem:[%s8119_s11 + $0x2d4] ss:$8 sps:$4 sm:$0xff]  }
  0x5e   : > { %962 = vmatpush1.bf16.msra.mxu0 %v7162_v62  ;;  %989 = vmatprep.mubr.bf16.mxu0 %v8153_v17  ;;  %v7186_v17 = vld [vmem:[%s8119_s11 + $0xa0] ss:$8 sps:$4 sm:$0xff]  }
  0x5f   : > { %963 = vmatprep.subr.bf16.mxu0 %v7167_v0  ;;  %v7242_v62 = vld [vmem:[%s8119_s11 + $0x2c0] ss:$8 sps:$4 sm:$0xff]   ;;  %v7245_v0 = vld [vmem:[%s8119_s11 + $0x2d0] ss:$8 sps:$4 sm:$0xff]  }
  0x62   : > { %964 = vmatpush1.bf16.msra.mxu0 %v7165_v1  ;;  %v7250_v1 = vld [vmem:[%s8119_s11 + $0x2e4] ss:$8 sps:$4 sm:$0xff]  }
  0x63   : > { %965 = vmatprep.subr.bf16.mxu0 %v7170_v2  ;;  %v7248_v2 = vld [vmem:[%s8119_s11 + $0x2e0] ss:$8 sps:$4 sm:$0xff]  }
  0x66   : > { %966 = vmatpush1.bf16.msra.mxu0 %v7168_v3  ;;  %v5941_v3 = vcombine.low %v8228_v30, %v8146_v14  ;;  %v7277_v30 = vld [vmem:[%s8119_s11 + $0x370] ss:$8 sps:$4 sm:$0xff]  }
  0x67   : > { %967 = vmatprep.subr.bf16.mxu0 %v7173_v4  ;;  %v7253_v4 = vld [vmem:[%s8119_s11 + $0x2f4] ss:$8 sps:$4 sm:$0xff]  }
  0x6a   : > { %968 = vmatpush1.bf16.msra.mxu0 %v7171_v5  ;;  %v7251_v5 = vld [vmem:[%s8119_s11 + $0x2f0] ss:$8 sps:$4 sm:$0xff]  }
  0x6b   : > { %969 = vmatprep.subr.bf16.mxu0 %v7176_v6  ;;  %v1048_v6 = vrot.slane %v5941_v3, 1 }
  0x6e   : > { %970 = vmatpush1.bf16.msra.mxu0 %v7174_v7  ;;  %v1049_v7 = vrot.slane %v8181_v42, 1 }
  0x6f   : > { %971 = vmatprep.subr.bf16.mxu0 %v7179_v8  ;;  %v7258_v8 = vld [vmem:[%s8119_s11 + $0x304] ss:$8 sps:$4 sm:$0xff]  }
  0x72   : > { %972 = vmatpush1.bf16.msra.mxu0 %v7177_v9  ;;  %v8277_v9 = vld [vmem:[%s8140_s15] sm:$0x88] }
  0x73   : > { %973 = vmatprep.subr.bf16.mxu0 %v7182_v10  ;;  %v8280_v10 = vld [vmem:[%s8140_s15 + $0x18] sm:$0x77] }
  0x74   : > { %v6010_v42 = vcombine.high %v8149_v15, %v8280_v10  ;;  %v7267_v15 = vld [vmem:[%s8119_s11 + $0x334] ss:$8 sps:$4 sm:$0xff]  }
  0x76   : > { %974 = vmatpush1.bf16.msra.mxu0 %v7180_v11  ;;  %v1050_v11 = vsel %vm1047_vm1, %v1048_v6, %v1049_v7 }
  0x77   : > { %975 = vmatprep.subr.bf16.mxu0 %v7185_v12  ;;  %v7256_v12 = vld [vmem:[%s8119_s11 + $0x300] ss:$8 sps:$4 sm:$0xff]  }
  0x7a   : > { %976 = vmatpush1.bf16.msra.mxu0 %v7183_v13  ;;  %v7261_v13 = vld [vmem:[%s8119_s11 + $0x314] ss:$8 sps:$4 sm:$0xff]  }
  0x7b   : > { %977 = vmatprep.subr.bf16.mxu0 %v7188_v16  ;;  %v8287_v16 = vcombine.high %v8277_v9, %v8146_v14  ;;  %v7262_v14 = vld [vmem:[%s8119_s11 + $0x320] ss:$8 sps:$4 sm:$0xff]  }
  0x7e   : > { %978 = vmatpush1.bf16.msra.mxu0 %v7186_v17  ;;  %v7259_v17 = vld [vmem:[%s8119_s11 + $0x310] ss:$8 sps:$4 sm:$0xff]  }
  0x7f   : > { %979 = vmatprep.subr.bf16.mxu0 %v7191_v18  ;;  %v7264_v18 = vld [vmem:[%s8119_s11 + $0x324] ss:$8 sps:$4 sm:$0xff]  }
  0x82   : > { %980 = vmatpush1.bf16.msra.mxu0 %v7189_v20  ;;  %v1324_v20 = vrot.slane %v8287_v16, 3 }
  0x83   : > { %981 = vmatprep.subr.bf16.mxu0 %v7194_v21  ;;  %v8296_v21 = vrot.slane %v6010_v42, 3  ;;  %v7323_v42 = vld [vmem:[%s8119_s11 + $0x450] ss:$8 sps:$4 sm:$0xff]  }
  0x85   : > { %v1326_v19 = vsel %vm1320_vm2, %v1324_v20, %v8296_v21  ;;  %v7331_v20 = vld [vmem:[%s8119_s11 + $0x474] ss:$8 sps:$4 sm:$0xff]  }
  0x86   : > { %982 = vmatpush1.bf16.msra.mxu0 %v7192_v22  ;;  %v7265_v22 = vld [vmem:[%s8119_s11 + $0x330] ss:$8 sps:$4 sm:$0xff]  }
  0x87   : > { %983 = vmatprep.subr.bf16.mxu0 %v7197_v23  ;;  %v7270_v23 = vld [vmem:[%s8119_s11 + $0x344] ss:$8 sps:$4 sm:$0xff]  }
  0x8a   : > { %984 = vmatpush1.bf16.msra.mxu0 %v7195_v24  ;;  %v7268_v24 = vld [vmem:[%s8119_s11 + $0x340] ss:$8 sps:$4 sm:$0xff]  }
  0x8b   : > { %985 = vmatprep.subr.bf16.mxu0 %v7200_v25  ;;  %v7273_v25 = vld [vmem:[%s8119_s11 + $0x354] ss:$8 sps:$4 sm:$0xff]  }
  0x8e   : > { %986 = vmatpush1.bf16.msra.mxu0 %v7198_v26  ;;  %v7271_v26 = vld [vmem:[%s8119_s11 + $0x350] ss:$8 sps:$4 sm:$0xff]  }
  0x8f   : > { %987 = vmatprep.subr.bf16.mxu0 %v7203_v27  ;;  %v7276_v27 = vld [vmem:[%s8119_s11 + $0x364] ss:$8 sps:$4 sm:$0xff]  }
  0x92   : > { %988 = vmatpush1.bf16.msra.mxu0 %v7201_v28  ;;  %v7274_v28 = vld [vmem:[%s8119_s11 + $0x360] ss:$8 sps:$4 sm:$0xff]  }
  0x93   : > { %1218 = vmatprep.subr.bf16.mxu0 %v7206_v29  ;;  %v7279_v29 = vld [vmem:[%s8119_s11 + $0x374] ss:$8 sps:$4 sm:$0xff]  }
  0x95   : > { %990 = vmatmul.mubr.bf16.vlgmr.msra.gmra.mrb[0].mxu0 %v8176_v39  ;;  %v7217_v39 = vld [vmem:[%s8119_s11 + $0x234] ss:$8 sps:$4 sm:$0xff]  }
  0x96   : > { %1219 = vmatpush1.bf16.msra.mxu0 %v7204_v31  ;;  %999 = vmatprep.mubr.bf16.mxu0 %v5876_v32  ;;  %v7282_v31 = vld [vmem:[%s8119_s11 + $0x384] ss:$8 sps:$4 sm:$0xff]   ;;  %v7280_v32 = vld [vmem:[%s8119_s11 + $0x380] ss:$8 sps:$4 sm:$0xff]  }
  0x97   : > { %1220 = vmatprep.subr.bf16.mxu0 %v7209_v33  ;;  %v7285_v33 = vld [vmem:[%s8119_s11 + $0x394] ss:$8 sps:$4 sm:$0xff]  }
  0x9a   : > { %1221 = vmatpush1.bf16.msra.mxu0 %v7207_v35  ;;  %v7288_v35 = vld [vmem:[%s8119_s11 + $0x3a4] ss:$8 sps:$4 sm:$0xff]  }
  0x9b   : > { %1222 = vmatprep.subr.bf16.mxu0 %v7214_v36  ;;  %v7286_v36 = vld [vmem:[%s8119_s11 + $0x3a0] ss:$8 sps:$4 sm:$0xff]  }
  0x9d   : > { %1000 = vmatmul.mubr.bf16.gmra.mrb[8].mxu0 %v5875_v41  ;;  %v7292_v41 = vld [vmem:[%s8119_s11 + $0x3c0] ss:$8 sps:$4 sm:$0xff]  }
  0x9e   : > { %1223 = vmatpush1.bf16.msra.mxu0 %v7212_v40  ;;  %1250 = vmatprep.mubr.bf16.mxu0 %v1053_v43  ;;  %v7294_v40 = vld [vmem:[%s8119_s11 + $0x3c4] ss:$8 sps:$4 sm:$0xff]   ;;  %v7295_v43 = vld [vmem:[%s8119_s11 + $0x3d0] ss:$8 sps:$4 sm:$0xff]  }
  0x9f   : > { %1224 = vmatprep.subr.bf16.mxu0 %v7217_v39  ;;  %v7297_v39 = vld [vmem:[%s8119_s11 + $0x3d4] ss:$8 sps:$4 sm:$0xff]  }
  0xa2   : > { %1225 = vmatpush1.bf16.msra.mxu0 %v7215_v44  ;;  %v7300_v44 = vld [vmem:[%s8119_s11 + $0x3e4] ss:$8 sps:$4 sm:$0xff]  }
  0xa3   : > { %1226 = vmatprep.subr.bf16.mxu0 %v7220_v45  ;;  %v8325_v45 = vld [vmem:[%s8140_s15 + $0x18] sm:$0xff] }
  0xa6   : > { %1227 = vmatpush1.bf16.msra.mxu0 %v7218_v46  ;;  %v7298_v46 = vld [vmem:[%s8119_s11 + $0x3e0] ss:$8 sps:$4 sm:$0xff]  }
  0xa7   : > { %1228 = vmatprep.subr.bf16.mxu0 %v7223_v47  ;;  %v8329_v47 = vld [vmem:[%s8140_s15 + $0x8] sm:$0xff] }
  0xaa   : > { %1229 = vmatpush1.bf16.msra.mxu0 %v7221_v48  ;;  %v8333_v48 = vcombine.low %v8277_v9, %v8329_v47  ;;  %v7319_v9 = vld [vmem:[%s8119_s11 + $0x434] ss:$8 sps:$4 sm:$0xff]  }
  0xab   : > { %1230 = vmatprep.subr.bf16.mxu0 %v7226_v49  ;;  %v8336_v49 = vld [vmem:[%s8140_s15 + $0x10] sm:$0xff] }
  0xae   : > { %1231 = vmatpush1.bf16.msra.mxu0 %v7224_v50  ;;  %v6009_v50 = vcombine.low %v8336_v49, %v8280_v10 }
  0xaf   : > { %1232 = vmatprep.subr.bf16.mxu0 %v7229_v51  ;;  %v7303_v51 = vld [vmem:[%s8119_s11 + $0x3f4] ss:$8 sps:$4 sm:$0xff]  }
  0xb2   : > { %1233 = vmatpush1.bf16.msra.mxu0 %v7227_v52  ;;  %v6076_v52 = vcombine.high %v8336_v49, %v8325_v45 }
  0xb3   : > { %1234 = vmatprep.subr.bf16.mxu0 %v7232_v53  ;;  %v7301_v53 = vld [vmem:[%s8119_s11 + $0x3f0] ss:$8 sps:$4 sm:$0xff]  }
  0xb6   : > { %1235 = vmatpush1.bf16.msra.mxu0 %v7230_v54  ;;  %v1322_v54 = vrot.slane %v6009_v50, 3 }
  0xb7   : > { %1236 = vmatprep.subr.bf16.mxu0 %v7235_v55  ;;  %v1321_v55 = vrot.slane %v8333_v48, 3 }
  0xba   : > { %1237 = vmatpush1.bf16.msra.mxu0 %v7233_v56  ;;  %v7310_v56 = vld [vmem:[%s8119_s11 + $0x404] ss:$8 sps:$4 sm:$0xff]  }
  0xbb   : > { %1238 = vmatprep.subr.bf16.mxu0 %v7238_v57  ;;  %v1606_v57 = vshrl.u32 %v8287_v16, 16 }
  0xbe   : > { %1239 = vmatpush1.bf16.msra.mxu0 %v7236_v58  ;;  %v1609_v58 = vshll.u32 %v8287_v16, 16  ;;  %v7325_v16 = vld [vmem:[%s8119_s11 + $0x454] ss:$8 sps:$4 sm:$0xff]  }
  0xbf   : > { %1240 = vmatprep.subr.bf16.mxu0 %v7241_v59  ;;  %v1614_v59 = vshrl.u32 %v6076_v52, 16 }
  0xc2   : > { %1241 = vmatpush1.bf16.msra.mxu0 %v7239_v60  ;;  %v1617_v60 = vshll.u32 %v6076_v52, 16  ;;  %v7353_v52 = vld [vmem:[%s8119_s11 + $0x4f0] ss:$8 sps:$4 sm:$0xff]  }
  0xc3   : > { %1242 = vmatprep.subr.bf16.mxu0 %v7244_v61  ;;  %v1323_v61 = vsel %vm1320_vm2, %v1321_v55, %v1322_v54 }
  0xc4   : > { %v1619_v3 = vrot.slane %v1617_v60, 4  ;;  %v7364_v60 = vld [vmem:[%s8119_s11 + $0x520] ss:$8 sps:$4 sm:$0xff]  }
  0xc6   : > { %1243 = vmatpush1.bf16.msra.mxu0 %v7242_v62  ;;  %v7308_v62 = vld [vmem:[%s8119_s11 + $0x400] ss:$8 sps:$4 sm:$0xff]  }
  0xc7   : > { %1244 = vmatprep.subr.bf16.mxu0 %v7247_v63  ;;  %v7313_v63 = vld [vmem:[%s8119_s11 + $0x414] ss:$8 sps:$4 sm:$0xff]  }
  0xca   : > { %1245 = vmatpush1.bf16.msra.mxu0 %v7245_v0  ;;  %v1608_v0 = vrot.slane %v1606_v57, 3  ;;  %v7363_v57 = vld [vmem:[%s8119_s11 + $0x514] ss:$8 sps:$4 sm:$0xff]  }
  0xcb   : > { %1246 = vmatprep.subr.bf16.mxu0 %v7250_v1  ;;  %v1611_v1 = vrot.slane %v1609_v58, 4  ;;  %v7361_v58 = vld [vmem:[%s8119_s11 + $0x510] ss:$8 sps:$4 sm:$0xff]  }
  0xcd   : > { %v1612_v6 = vor.u32 %v1611_v1, %v1608_v0  ;;  %v7372_v0 = vld [vmem:[%s8119_s11 + $0x544] ss:$8 sps:$4 sm:$0xff]   ;;  %v7370_v1 = vld [vmem:[%s8119_s11 + $0x540] ss:$8 sps:$4 sm:$0xff]  }
  0xce   : > { %1247 = vmatpush1.bf16.msra.mxu0 %v7248_v2  ;;  %v1616_v2 = vrot.slane %v1614_v59, 3  ;;  %v7366_v59 = vld [vmem:[%s8119_s11 + $0x524] ss:$8 sps:$4 sm:$0xff]  }
  0xcf   : > { %1248 = vmatprep.subr.bf16.mxu0 %v7253_v4  ;;  %v7311_v4 = vld [vmem:[%s8119_s11 + $0x410] ss:$8 sps:$4 sm:$0xff]  }
  0xd2   : > { %1249 = vmatpush1.bf16.msra.mxu0 %v7251_v5  ;;  %v7316_v5 = vld [vmem:[%s8119_s11 + $0x424] ss:$8 sps:$4 sm:$0xff]  }
  0xd3   : > { %1491 = vmatprep.subr.bf16.mxu0 %v7258_v8  ;;  %v7314_v8 = vld [vmem:[%s8119_s11 + $0x420] ss:$8 sps:$4 sm:$0xff]  }
  0xd5   : > { %1251 = vmatmul.mubr.bf16.vlgmr.msra.gmra.mrb[0].mxu0 %v1050_v11  ;;  %v7317_v11 = vld [vmem:[%s8119_s11 + $0x430] ss:$8 sps:$4 sm:$0xff]  }
  0xd6   : > { %1492 = vmatpush1.bf16.msra.mxu0 %v7256_v12  ;;  %1260 = vmatprep.mubr.bf16.mxu0 %v1052_v38  ;;  %v7289_v38 = vld [vmem:[%s8119_s11 + $0x3b0] ss:$8 sps:$4 sm:$0xff]   ;;  %v7322_v12 = vld [vmem:[%s8119_s11 + $0x444] ss:$8 sps:$4 sm:$0xff]  }
  0xd7   : > { %1493 = vmatprep.subr.bf16.mxu0 %v7261_v13  ;;  %v7320_v13 = vld [vmem:[%s8119_s11 + $0x440] ss:$8 sps:$4 sm:$0xff]  }
  0xda   : > { %1494 = vmatpush1.bf16.msra.mxu0 %v7259_v17  ;;  %v7328_v17 = vld [vmem:[%s8119_s11 + $0x464] ss:$8 sps:$4 sm:$0xff]  }
  0xdb   : > { %1495 = vmatprep.subr.bf16.mxu0 %v7264_v18  ;;  %v7326_v18 = vld [vmem:[%s8119_s11 + $0x460] ss:$8 sps:$4 sm:$0xff]  }
  0xdd   : > { %1261 = vmatmul.mubr.bf16.gmra.mrb[12].mxu0 %v1049_v7  ;;  %v8354_v7 = vor.u32 %v1619_v3, %v1616_v2  ;;  %v7375_v2 = vld [vmem:[%s8119_s11 + $0x554] ss:$8 sps:$4 sm:$0xff]   ;;  %v7373_v3 = vld [vmem:[%s8119_s11 + $0x550] ss:$8 sps:$4 sm:$0xff]  }
  0xde   : > { %1496 = vmatpush1.bf16.msra.mxu0 %v7262_v14  ;;  %1523 = vmatprep.mubr.bf16.mxu0 %v1326_v19  ;;  %v7334_v14 = vld [vmem:[%s8119_s11 + $0x484] ss:$8 sps:$4 sm:$0xff]  }
  0xdf   : > { %1497 = vmatprep.subr.bf16.mxu0 %v7267_v15  ;;  %v1621_v10 = vsel %vm1587_vm3, %v1612_v6, %v8354_v7  ;;  %v7381_v6 = vld [vmem:[%s8119_s11 + $0x574] ss:$8 sps:$4 sm:$0xff]  }
  0xe2   : > { %1498 = vmatpush1.bf16.msra.mxu0 %v7265_v22  ;;  %v7332_v22 = vld [vmem:[%s8119_s11 + $0x480] ss:$8 sps:$4 sm:$0xff]  }
  0xe3   : > { %1499 = vmatprep.subr.bf16.mxu0 %v7270_v23 }
  0xe6   : > { %1500 = vmatpush1.bf16.msra.mxu0 %v7268_v24  ;;  %v7337_v24 = vld [vmem:[%s8119_s11 + $0x494] ss:$8 sps:$4 sm:$0xff]  }
  0xe7   : > { %1501 = vmatprep.subr.bf16.mxu0 %v7273_v25 }
  0xea   : > { %1502 = vmatpush1.bf16.msra.mxu0 %v7271_v26  ;;  %v7335_v26 = vld [vmem:[%s8119_s11 + $0x490] ss:$8 sps:$4 sm:$0xff]  }
  0xeb   : > { %1503 = vmatprep.subr.bf16.mxu0 %v7276_v27  ;;  %v7340_v27 = vld [vmem:[%s8119_s11 + $0x4a4] ss:$8 sps:$4 sm:$0xff]  }
  0xee   : > { %1504 = vmatpush1.bf16.msra.mxu0 %v7274_v28  ;;  %v7338_v28 = vld [vmem:[%s8119_s11 + $0x4a0] ss:$8 sps:$4 sm:$0xff]  }
  0xef   : > { %1505 = vmatprep.subr.bf16.mxu0 %v7279_v29  ;;  %v7343_v29 = vld [vmem:[%s8119_s11 + $0x4b4] ss:$8 sps:$4 sm:$0xff]  }
  0xf2   : > { %1506 = vmatpush1.bf16.msra.mxu0 %v7277_v30  ;;  %v7341_v30 = vld [vmem:[%s8119_s11 + $0x4b0] ss:$8 sps:$4 sm:$0xff]  }
  0xf3   : > { %1507 = vmatprep.subr.bf16.mxu0 %v7282_v31  ;;  %v7346_v31 = vld [vmem:[%s8119_s11 + $0x4c4] ss:$8 sps:$4 sm:$0xff]  }
  0xf6   : > { %1508 = vmatpush1.bf16.msra.mxu0 %v7280_v32  ;;  %v7344_v32 = vld [vmem:[%s8119_s11 + $0x4c0] ss:$8 sps:$4 sm:$0xff]  }
  0xf7   : > { %1509 = vmatprep.subr.bf16.mxu0 %v7285_v33  ;;  %v6075_v33 = vcombine.low %v8336_v49, %v8325_v45 }
  0xfa   : > { %1510 = vmatpush1.bf16.msra.mxu0 %v7283_v34  ;;  %v7349_v34 = vld [vmem:[%s8119_s11 + $0x4d4] ss:$8 sps:$4 sm:$0xff]  }
  0xfb   : > { %1511 = vmatprep.subr.bf16.mxu0 %v7288_v35  ;;  %v7347_v35 = vld [vmem:[%s8119_s11 + $0x4d0] ss:$8 sps:$4 sm:$0xff]  }
  0xfe   : > { %1512 = vmatpush1.bf16.msra.mxu0 %v7286_v36  ;;  %v1589_v36 = vshrl.u32 %v8333_v48, 16 }
  0xff   : > { %1513 = vmatprep.subr.bf16.mxu0 %v7291_v37  ;;  %v1592_v37 = vshll.u32 %v8333_v48, 16 }
 0x102   : > { %1514 = vmatpush1.bf16.msra.mxu0 %v7289_v38  ;;  %v1597_v38 = vshrl.u32 %v6075_v33, 16 }
 0x103   : > { %1515 = vmatprep.subr.bf16.mxu0 %v7294_v40  ;;  %v1600_v40 = vshll.u32 %v6075_v33, 16  ;;  %v6141_v33 = vcombine.low %v8329_v47, %v8336_v49 }
 0x105   : > { %v1602_v50 = vrot.slane %v1600_v40, 4 }
 0x106   : > { %1516 = vmatpush1.bf16.msra.mxu0 %v7292_v41  ;;  %v7352_v41 = vld [vmem:[%s8119_s11 + $0x4e4] ss:$8 sps:$4 sm:$0xff]  }
 0x107   : > { %1517 = vmatprep.subr.bf16.mxu0 %v7297_v39  ;;  %v7350_v39 = vld [vmem:[%s8119_s11 + $0x4e0] ss:$8 sps:$4 sm:$0xff]  }
 0x10a   : > { %1518 = vmatpush1.bf16.msra.mxu0 %v7295_v43  ;;  %v1591_v43 = vrot.slane %v1589_v36, 3  ;;  %v7413_v36 = vld [vmem:[%s8119_s11 + $0x614] ss:$8 sps:$4 sm:$0xff]  }
 0x10b   : > { %1519 = vmatprep.subr.bf16.mxu0 %v7300_v44  ;;  %v1594_v44 = vrot.slane %v1592_v37, 4 }
 0x10d   : > { %v1595_v48 = vor.u32 %v1594_v44, %v1591_v43  ;;  %v7416_v43 = vld [vmem:[%s8119_s11 + $0x620] ss:$8 sps:$4 sm:$0xff]   ;;  %v7421_v44 = vld [vmem:[%s8119_s11 + $0x634] ss:$8 sps:$4 sm:$0xff]  }
 0x10e   : > { %1520 = vmatpush1.bf16.msra.mxu0 %v7298_v46  ;;  %v1599_v46 = vrot.slane %v1597_v38, 3 }
 0x10f   : > { %1521 = vmatprep.subr.bf16.mxu0 %v7303_v51  ;;  %v7355_v51 = vld [vmem:[%s8119_s11 + $0x4f4] ss:$8 sps:$4 sm:$0xff]  }
 0x112   : > { %1522 = vmatpush1.bf16.msra.mxu0 %v7301_v53  ;;  %v1603_v53 = vor.u32 %v1602_v50, %v1599_v46  ;;  %v7419_v50 = vld [vmem:[%s8119_s11 + $0x630] ss:$8 sps:$4 sm:$0xff]  }
 0x113   : > { %1786 = vmatprep.subr.bf16.mxu0 %v7310_v56  ;;  %v7358_v56 = vld [vmem:[%s8119_s11 + $0x500] ss:$8 sps:$4 sm:$0xff]  }
 0x114   : > { %v1604_v55 = vsel %vm1587_vm3, %v1595_v48, %v1603_v53  ;;  %v7427_v48 = vld [vmem:[%s8119_s11 + $0x654] ss:$8 sps:$4 sm:$0xff]  }
 0x115   : > { %1524 = vmatmul.mubr.bf16.vlgmr.msra.gmra.mrb[0].mxu0 %v1323_v61  ;;  %v6142_v61 = vcombine.high %v8329_v47, %v8336_v49  ;;  %v7411_v47 = vld [vmem:[%s8119_s11 + $0x610] ss:$8 sps:$4 sm:$0xff]   ;;  %v7418_v49 = vld [vmem:[%s8119_s11 + $0x624] ss:$8 sps:$4 sm:$0xff]  }
 0x116   : > { %1787 = vmatpush1.bf16.msra.mxu0 %v7308_v62  ;;  %1533 = vmatprep.mubr.bf16.mxu0 %v8296_v21  ;;  %v7329_v21 = vld [vmem:[%s8119_s11 + $0x470] ss:$8 sps:$4 sm:$0xff]   ;;  %v7369_v62 = vld [vmem:[%s8119_s11 + $0x534] ss:$8 sps:$4 sm:$0xff]  }
 0x117   : > { %1788 = vmatprep.subr.bf16.mxu0 %v7313_v63  ;;  %v7367_v63 = vld [vmem:[%s8119_s11 + $0x530] ss:$8 sps:$4 sm:$0xff]  }
 0x11a   : > { %1789 = vmatpush1.bf16.msra.mxu0 %v7311_v4  ;;  %v7378_v4 = vld [vmem:[%s8119_s11 + $0x564] ss:$8 sps:$4 sm:$0xff]  }
 0x11b   : > { %1790 = vmatprep.subr.bf16.mxu0 %v7316_v5  ;;  %v7376_v5 = vld [vmem:[%s8119_s11 + $0x560] ss:$8 sps:$4 sm:$0xff]  }
 0x11d   : > { %1534 = vmatmul.mubr.bf16.gmra.mrb[16].mxu0 %v1322_v54  ;;  %v7360_v54 = vld [vmem:[%s8119_s11 + $0x504] ss:$8 sps:$4 sm:$0xff]  }
 0x11e   : > { %1791 = vmatpush1.bf16.msra.mxu0 %v7314_v8  ;;  %1818 = vmatprep.mubr.bf16.mxu0 %v1621_v10  ;;  %v7384_v8 = vld [vmem:[%s8119_s11 + $0x584] ss:$8 sps:$4 sm:$0xff]  }
 0x11f   : > { %1792 = vmatprep.subr.bf16.mxu0 %v7319_v9 }
 0x122   : > { %1793 = vmatpush1.bf16.msra.mxu0 %v7317_v11 }
 0x123   : > { %1794 = vmatprep.subr.bf16.mxu0 %v7322_v12 }
 0x126   : > { %1795 = vmatpush1.bf16.msra.mxu0 %v7320_v13  ;;  %v7382_v13 = vld [vmem:[%s8119_s11 + $0x580] ss:$8 sps:$4 sm:$0xff]  }
 0x127   : > { %1796 = vmatprep.subr.bf16.mxu0 %v7325_v16 }
 0x12a   : > { %1797 = vmatpush1.bf16.msra.mxu0 %v7323_v42  ;;  %v7387_v42 = vld [vmem:[%s8119_s11 + $0x594] ss:$8 sps:$4 sm:$0xff]  }
 0x12b   : > { %1798 = vmatprep.subr.bf16.mxu0 %v7328_v17 }
 0x12e   : > { %1799 = vmatpush1.bf16.msra.mxu0 %v7326_v18  ;;  %v7385_v18 = vld [vmem:[%s8119_s11 + $0x590] ss:$8 sps:$4 sm:$0xff]  }
 0x12f   : > { %1800 = vmatprep.subr.bf16.mxu0 %v7331_v20  ;;  %v7390_v20 = vld [vmem:[%s8119_s11 + $0x5a4] ss:$8 sps:$4 sm:$0xff]  }
 0x130   : > { %v8370_v15 = vpop.f32.mrb[4].mxu0 }
 0x131   : > { %v8372_v19 = vpop.f32.mrb[5].mxu0 }
 0x132   : > { %1801 = vmatpush1.bf16.msra.mxu0 %v7329_v21  ;;  %v788_v23 = vpop.f32.mrb[6].mxu0  ;;  %v7388_v21 = vld [vmem:[%s8119_s11 + $0x5a0] ss:$8 sps:$4 sm:$0xff]  }
 0x133   : > { %1802 = vmatprep.subr.bf16.mxu0 %v7334_v14  ;;  %v789_v25 = vpop.f32.mrb[7].mxu0  ;;  %v7393_v14 = vld [vmem:[%s8119_s11 + $0x5b4] ss:$8 sps:$4 sm:$0xff]  }
 0x134   : > { %v7399_v23 = vld [vmem:[%s8119_s11 + $0x5d4] ss:$8 sps:$4 sm:$0xff]   ;;  %v7402_v25 = vld [vmem:[%s8119_s11 + $0x5e4] ss:$8 sps:$4 sm:$0xff]  }
 0x136   : > { %1803 = vmatpush1.bf16.msra.mxu0 %v7332_v22  ;;  %v7394_v22 = vld [vmem:[%s8119_s11 + $0x5c0] ss:$8 sps:$4 sm:$0xff]  }
 0x137   : > { %1804 = vmatprep.subr.bf16.mxu0 %v7337_v24  ;;  %v7397_v24 = vld [vmem:[%s8119_s11 + $0x5d0] ss:$8 sps:$4 sm:$0xff]  }
 0x13a   : > { %1805 = vmatpush1.bf16.msra.mxu0 %v7335_v26  ;;  %v7400_v26 = vld [vmem:[%s8119_s11 + $0x5e0] ss:$8 sps:$4 sm:$0xff]  }
 0x13b   : > { %1806 = vmatprep.subr.bf16.mxu0 %v7340_v27  ;;  %v7405_v27 = vld [vmem:[%s8119_s11 + $0x5f4] ss:$8 sps:$4 sm:$0xff]  }
 0x13e   : > { %1807 = vmatpush1.bf16.msra.mxu0 %v7338_v28  ;;  %v7403_v28 = vld [vmem:[%s8119_s11 + $0x5f0] ss:$8 sps:$4 sm:$0xff]  }
 0x13f   : > { %1808 = vmatprep.subr.bf16.mxu0 %v7343_v29  ;;  %v7410_v29 = vld [vmem:[%s8119_s11 + $0x604] ss:$8 sps:$4 sm:$0xff]  }
 0x142   : > { %1809 = vmatpush1.bf16.msra.mxu0 %v7341_v30  ;;  %v8437_v30 = vld [vmem:[%s8140_s15 + $0x8] sm:$0xcc] }
 0x143   : > { %1810 = vmatprep.subr.bf16.mxu0 %v7346_v31  ;;  %v8440_v31 = vld [vmem:[%s8140_s15 + $0x10] sm:$0xff] }
 0x144   : > { %v8453_v37 = vcombine.high %v8437_v30, %v8440_v31 }
 0x146   : > { %1811 = vmatpush1.bf16.msra.mxu0 %v7344_v32  ;;  %v8443_v32 = vld [vmem:[%s8140_s15 + $0x20] sm:$0x33]  ;;  %v2158_v40 = vrot.slane %v8453_v37, 2 }
 0x147   : > { %1812 = vmatprep.subr.bf16.mxu0 %v7349_v34  ;;  %v7408_v34 = vld [vmem:[%s8119_s11 + $0x600] ss:$8 sps:$4 sm:$0xff]   ;;  %v6212_v38 = vcombine.high %v8325_v45, %v8443_v32 }
 0x14a   : > { %1813 = vmatpush1.bf16.msra.mxu0 %v7347_v35  ;;  %v6144_v35 = vcombine.high %v8325_v45, %v8325_v45 }
 0x14b   : > { %1814 = vmatprep.subr.bf16.mxu0 %v7352_v41  ;;  %v8460_v41 = vrot.slane %v6212_v38, 2  ;;  %v7468_v38 = vld [vmem:[%s8119_s11 + $0x720] ss:$8 sps:$4 sm:$0xff]  }
 0x14d   : > { %v2160_v46 = vsel %vm2154_vm4, %v2158_v40, %v8460_v41  ;;  %v7471_v40 = vld [vmem:[%s8119_s11 + $0x730] ss:$8 sps:$4 sm:$0xff]  }
 0x14e   : > { %1815 = vmatpush1.bf16.msra.mxu0 %v7350_v39  ;;  %v6143_v39 = vcombine.low %v8325_v45, %v8325_v45 }
 0x14f   : > { %1816 = vmatprep.subr.bf16.mxu0 %v7355_v51  ;;  %v7424_v51 = vld [vmem:[%s8119_s11 + $0x644] ss:$8 sps:$4 sm:$0xff]  }
 0x152   : > { %1817 = vmatpush1.bf16.msra.mxu0 %v7353_v52  ;;  %v7422_v52 = vld [vmem:[%s8119_s11 + $0x640] ss:$8 sps:$4 sm:$0xff]  }
 0x153   : > { %2044 = vmatprep.subr.bf16.mxu0 %v7360_v54  ;;  %v7430_v54 = vld [vmem:[%s8119_s11 + $0x664] ss:$8 sps:$4 sm:$0xff]  }
 0x155   : > { %1819 = vmatmul.mubr.bf16.vlgmr.msra.gmra.mrb[0].mxu0 %v1604_v55  ;;  %v7428_v55 = vld [vmem:[%s8119_s11 + $0x660] ss:$8 sps:$4 sm:$0xff]  }
 0x156   : > { %2045 = vmatpush1.bf16.msra.mxu0 %v7358_v56  ;;  %1828 = vmatprep.mubr.bf16.mxu0 %v8354_v7  ;;  %v7379_v7 = vld [vmem:[%s8119_s11 + $0x570] ss:$8 sps:$4 sm:$0xff]   ;;  %v7433_v56 = vld [vmem:[%s8119_s11 + $0x674] ss:$8 sps:$4 sm:$0xff]  }
 0x157   : > { %2046 = vmatprep.subr.bf16.mxu0 %v7363_v57  ;;  %v7431_v57 = vld [vmem:[%s8119_s11 + $0x670] ss:$8 sps:$4 sm:$0xff]  }
 0x15a   : > { %2047 = vmatpush1.bf16.msra.mxu0 %v7361_v58  ;;  %v7436_v58 = vld [vmem:[%s8119_s11 + $0x684] ss:$8 sps:$4 sm:$0xff]  }
 0x15b   : > { %2048 = vmatprep.subr.bf16.mxu0 %v7366_v59 }
 0x15d   : > { %1829 = vmatmul.mubr.bf16.gmra.mrb[20].mxu0 %v1603_v53  ;;  %v7425_v53 = vld [vmem:[%s8119_s11 + $0x650] ss:$8 sps:$4 sm:$0xff]  }
 0x15e   : > { %2049 = vmatpush1.bf16.msra.mxu0 %v7364_v60  ;;  %2076 = vmatprep.mubr.bf16.mxu0 %v6142_v61 }
 0x15f   : > { %2050 = vmatprep.subr.bf16.mxu0 %v7369_v62 }
 0x162   : > { %2051 = vmatpush1.bf16.msra.mxu0 %v7367_v63  ;;  %v7434_v63 = vld [vmem:[%s8119_s11 + $0x680] ss:$8 sps:$4 sm:$0xff]  }
 0x163   : > { %2052 = vmatprep.subr.bf16.mxu0 %v7372_v0 }
 0x166   : > { %2053 = vmatpush1.bf16.msra.mxu0 %v7370_v1  ;;  %v7439_v1 = vld [vmem:[%s8119_s11 + $0x694] ss:$8 sps:$4 sm:$0xff]  }
 0x167   : > { %2054 = vmatprep.subr.bf16.mxu0 %v7375_v2 }
 0x16a   : > { %2055 = vmatpush1.bf16.msra.mxu0 %v7373_v3  ;;  %v7437_v3 = vld [vmem:[%s8119_s11 + $0x690] ss:$8 sps:$4 sm:$0xff]  }
 0x16b   : > { %2056 = vmatprep.subr.bf16.mxu0 %v7378_v4  ;;  %v7442_v4 = vld [vmem:[%s8119_s11 + $0x6a4] ss:$8 sps:$4 sm:$0xff]  }
 0x16e   : > { %2057 = vmatpush1.bf16.msra.mxu0 %v7376_v5  ;;  %v7440_v5 = vld [vmem:[%s8119_s11 + $0x6a0] ss:$8 sps:$4 sm:$0xff]  }
 0x16f   : > { %2058 = vmatprep.subr.bf16.mxu0 %v7381_v6  ;;  %v7445_v6 = vld [vmem:[%s8119_s11 + $0x6b4] ss:$8 sps:$4 sm:$0xff]  }
 0x170   : > { %v1001_v9 = vpop.f32.mrb[8].mxu0 }
 0x171   : > { %v8415_v10 = vadd.f32 %v1001_v9, %v8370_v15  ;;  %v1003_v11 = vpop.f32.mrb[9].mxu0  ;;  %v7391_v15 = vld [vmem:[%s8119_s11 + $0x5b0] ss:$8 sps:$4 sm:$0xff]   ;;  %v7446_v9 = vld [vmem:[%s8119_s11 + $0x6c0] ss:$8 sps:$4 sm:$0xff]  }
 0x172   : > { %v8418_v12 = vadd.f32 %v1003_v11, %v8372_v19  ;;  %2059 = vmatpush1.bf16.msra.mxu0 %v7379_v7  ;;  %v1005_v16 = vpop.f32.mrb[10].mxu0  ;;  %v7396_v19 = vld [vmem:[%s8119_s11 + $0x5c4] ss:$8 sps:$4 sm:$0xff]   ;;  %v7443_v7 = vld [vmem:[%s8119_s11 + $0x6b0] ss:$8 sps:$4 sm:$0xff]  }
 0x173   : > { %2060 = vmatprep.subr.bf16.mxu0 %v7384_v8  ;;  %v1006_v17 = vpop.f32.mrb[11].mxu0  ;;  %v7448_v8 = vld [vmem:[%s8119_s11 + $0x6c4] ss:$8 sps:$4 sm:$0xff]   ;;  %v7449_v11 = vld [vmem:[%s8119_s11 + $0x6d0] ss:$8 sps:$4 sm:$0xff]  }
 0x174   : > { %v7452_v16 = vld [vmem:[%s8119_s11 + $0x6e0] ss:$8 sps:$4 sm:$0xff]   ;;  %v6211_v17 = vcombine.low %v8325_v45, %v8443_v32 }
 0x176   : > { %2061 = vmatpush1.bf16.msra.mxu0 %v7382_v13  ;;  %v8497_v13 = vld [vmem:[%s8140_s15 + $0x20] sm:$0x77] }
 0x177   : > { %2062 = vmatprep.subr.bf16.mxu0 %v7387_v42  ;;  %v8502_v42 = vcombine.low %v8437_v30, %v8440_v31 }
 0x17a   : > { %2063 = vmatpush1.bf16.msra.mxu0 %v7385_v18  ;;  %v7457_v18 = vld [vmem:[%s8119_s11 + $0x6f4] ss:$8 sps:$4 sm:$0xff]  }
 0x17b   : > { %2064 = vmatprep.subr.bf16.mxu0 %v7390_v20  ;;  %v8509_v20 = vcombine.high %v8325_v45, %v8497_v13 }
 0x17e   : > { %2065 = vmatpush1.bf16.msra.mxu0 %v7388_v21  ;;  %v7455_v21 = vld [vmem:[%s8119_s11 + $0x6f0] ss:$8 sps:$4 sm:$0xff]  }
 0x17f   : > { %2066 = vmatprep.subr.bf16.mxu0 %v7393_v14  ;;  %v2156_v14 = vrot.slane %v6211_v17, 2 }
 0x182   : > { %2067 = vmatpush1.bf16.msra.mxu0 %v7391_v15  ;;  %v2155_v15 = vrot.slane %v8502_v42, 2 }
 0x183   : > { %2068 = vmatprep.subr.bf16.mxu0 %v7396_v19  ;;  %v7464_v19 = vld [vmem:[%s8119_s11 + $0x704] ss:$8 sps:$4 sm:$0xff]  }
 0x186   : > { %2069 = vmatpush1.bf16.msra.mxu0 %v7394_v22  ;;  %v2440_v22 = vshrl.u32 %v8453_v37, 16 }
 0x187   : > { %2070 = vmatprep.subr.bf16.mxu0 %v7399_v23  ;;  %v2443_v23 = vshll.u32 %v8453_v37, 16 }
 0x189   : > { %v2445_v30 = vrot.slane %v2443_v23, 3  ;;  %v7512_v23 = vld [vmem:[%s8119_s11 + $0x800] ss:$8 sps:$4 sm:$0xff]  }
 0x18a   : > { %2071 = vmatpush1.bf16.msra.mxu0 %v7397_v24  ;;  %v2448_v24 = vshrl.u32 %v8509_v20, 16 }
 0x18b   : > { %2072 = vmatprep.subr.bf16.mxu0 %v7402_v25  ;;  %v2451_v25 = vshll.u32 %v8509_v20, 16 }
 0x18c   : > { %v2450_v32 = vrot.slane %v2448_v24, 2  ;;  %v7517_v24 = vld [vmem:[%s8119_s11 + $0x814] ss:$8 sps:$4 sm:$0xff]  }
 0x18e   : > { %2073 = vmatpush1.bf16.msra.mxu0 %v7400_v26  ;;  %v2157_v26 = vsel %vm2154_vm4, %v2155_v15, %v2156_v14  ;;  %v7514_v15 = vld [vmem:[%s8119_s11 + $0x804] ss:$8 sps:$4 sm:$0xff]  }
 0x18f   : > { %2074 = vmatprep.subr.bf16.mxu0 %v7405_v27  ;;  %v7462_v27 = vld [vmem:[%s8119_s11 + $0x700] ss:$8 sps:$4 sm:$0xff]  }
 0x192   : > { %2075 = vmatpush1.bf16.msra.mxu0 %v7403_v28  ;;  %v7467_v28 = vld [vmem:[%s8119_s11 + $0x714] ss:$8 sps:$4 sm:$0xff]  }
 0x193   : > { %2325 = vmatprep.subr.bf16.mxu0 %v7410_v29  ;;  %v2442_v29 = vrot.slane %v2440_v22, 2 }
 0x195   : > { %2077 = vmatmul.mubr.bf16.vlgmr.msra.gmra.mrb[0].mxu0 %v6141_v33  ;;  %v2453_v33 = vrot.slane %v2451_v25, 3 }
 0x196   : > { %2326 = vmatpush1.bf16.msra.mxu0 %v7408_v34  ;;  %2086 = vmatprep.mubr.bf16.mxu0 %v6144_v35  ;;  %v7465_v34 = vld [vmem:[%s8119_s11 + $0x710] ss:$8 sps:$4 sm:$0xff]   ;;  %v7470_v35 = vld [vmem:[%s8119_s11 + $0x724] ss:$8 sps:$4 sm:$0xff]  }
 0x197   : > { %2327 = vmatprep.subr.bf16.mxu0 %v7413_v36  ;;  %v2446_v36 = vor.u32 %v2445_v30, %v2442_v29  ;;  %v8524_v37 = vor.u32 %v2453_v33, %v2450_v32  ;;  %v2720_v29 = vrot.slane %v8509_v20, 3  ;;  %v7518_v30 = vld [vmem:[%s8119_s11 + $0x820] ss:$8 sps:$4 sm:$0xff]   ;;  %v7523_v32 = vld [vmem:[%s8119_s11 + $0x834] ss:$8 sps:$4 sm:$0xff]  }
 0x19a   : > { %2328 = vmatpush1.bf16.msra.mxu0 %v7411_v47  ;;  %v7473_v47 = vld [vmem:[%s8119_s11 + $0x734] ss:$8 sps:$4 sm:$0xff]  }
 0x19b   : > { %2329 = vmatprep.subr.bf16.mxu0 %v7418_v49  ;;  %v2455_v49 = vsel %vm2421_vm5, %v2446_v36, %v8524_v37  ;;  %v7524_v36 = vld [vmem:[%s8119_s11 + $0x840] ss:$8 sps:$4 sm:$0xff]  }
 0x19d   : > { %2087 = vmatmul.mubr.bf16.gmra.mrb[24].mxu0 %v6143_v39  ;;  %v7474_v39 = vld [vmem:[%s8119_s11 + $0x740] ss:$8 sps:$4 sm:$0xff]  }
 0x19e   : > { %2330 = vmatpush1.bf16.msra.mxu0 %v7416_v43  ;;  %2357 = vmatprep.mubr.bf16.mxu0 %v2160_v46  ;;  %v7479_v43 = vld [vmem:[%s8119_s11 + $0x754] ss:$8 sps:$4 sm:$0xff]   ;;  %v7482_v46 = vld [vmem:[%s8119_s11 + $0x764] ss:$8 sps:$4 sm:$0xff]  }
 0x19f   : > { %2331 = vmatprep.subr.bf16.mxu0 %v7421_v44  ;;  %v7477_v44 = vld [vmem:[%s8119_s11 + $0x750] ss:$8 sps:$4 sm:$0xff]  }
 0x1a2   : > { %2332 = vmatpush1.bf16.msra.mxu0 %v7419_v50  ;;  %v7480_v50 = vld [vmem:[%s8119_s11 + $0x760] ss:$8 sps:$4 sm:$0xff]  }
 0x1a3   : > { %2333 = vmatprep.subr.bf16.mxu0 %v7424_v51  ;;  %v7485_v51 = vld [vmem:[%s8119_s11 + $0x774] ss:$8 sps:$4 sm:$0xff]  }
 0x1a6   : > { %2334 = vmatpush1.bf16.msra.mxu0 %v7422_v52  ;;  %v7483_v52 = vld [vmem:[%s8119_s11 + $0x770] ss:$8 sps:$4 sm:$0xff]  }
 0x1a7   : > { %2335 = vmatprep.subr.bf16.mxu0 %v7427_v48  ;;  %v7488_v48 = vld [vmem:[%s8119_s11 + $0x784] ss:$8 sps:$4 sm:$0xff]  }
 0x1aa   : > { %2336 = vmatpush1.bf16.msra.mxu0 %v7425_v53 }
 0x1ab   : > { %2337 = vmatprep.subr.bf16.mxu0 %v7430_v54 }
 0x1ae   : > { %2338 = vmatpush1.bf16.msra.mxu0 %v7428_v55 }
 0x1af   : > { %2339 = vmatprep.subr.bf16.mxu0 %v7433_v56 }
 0x1b0   : > { %v1262_v59 = vpop.f32.mrb[12].mxu0 }
 0x1b1   : > { %v8479_v60 = vadd.f32 %v1262_v59, %v8415_v10  ;;  %v1264_v61 = vpop.f32.mrb[13].mxu0  ;;  %v7451_v10 = vld [vmem:[%s8119_s11 + $0x6d4] ss:$8 sps:$4 sm:$0xff]  }
 0x1b2   : > { %v8482_v62 = vadd.f32 %v1264_v61, %v8418_v12  ;;  %2340 = vmatpush1.bf16.msra.mxu0 %v7431_v57  ;;  %v1266_v0 = vpop.f32.mrb[14].mxu0  ;;  %v7454_v12 = vld [vmem:[%s8119_s11 + $0x6e4] ss:$8 sps:$4 sm:$0xff]   ;;  %v7486_v57 = vld [vmem:[%s8119_s11 + $0x780] ss:$8 sps:$4 sm:$0xff]  }
 0x1b3   : > { %2341 = vmatprep.subr.bf16.mxu0 %v7436_v58  ;;  %v1267_v2 = vpop.f32.mrb[15].mxu0  ;;  %v7491_v59 = vld [vmem:[%s8119_s11 + $0x794] ss:$8 sps:$4 sm:$0xff]   ;;  %v7492_v0 = vld [vmem:[%s8119_s11 + $0x7a0] ss:$8 sps:$4 sm:$0xff]  }
 0x1b4   : > { %v7500_v2 = vld [vmem:[%s8119_s11 + $0x7c4] ss:$8 sps:$4 sm:$0xff]  }
 0x1b6   : > { %2342 = vmatpush1.bf16.msra.mxu0 %v7434_v63  ;;  %v7489_v63 = vld [vmem:[%s8119_s11 + $0x790] ss:$8 sps:$4 sm:$0xff]  }
 0x1b7   : > { %2343 = vmatprep.subr.bf16.mxu0 %v7439_v1  ;;  %v7495_v1 = vld [vmem:[%s8119_s11 + $0x7b0] ss:$8 sps:$4 sm:$0xff]  }
 0x1ba   : > { %2344 = vmatpush1.bf16.msra.mxu0 %v7437_v3  ;;  %v7498_v3 = vld [vmem:[%s8119_s11 + $0x7c0] ss:$8 sps:$4 sm:$0xff]  }
 0x1bb   : > { %2345 = vmatprep.subr.bf16.mxu0 %v7442_v4  ;;  %v8557_v4 = vcombine.low %v8325_v45, %v8497_v13  ;;  %v7504_v45 = vld [vmem:[%s8119_s11 + $0x7e0] ss:$8 sps:$4 sm:$0xff]  }
 0x1be   : > { %2346 = vmatpush1.bf16.msra.mxu0 %v7440_v5  ;;  %v7503_v5 = vld [vmem:[%s8119_s11 + $0x7d4] ss:$8 sps:$4 sm:$0xff]  }
 0x1bf   : > { %2347 = vmatprep.subr.bf16.mxu0 %v7445_v6  ;;  %v7501_v6 = vld [vmem:[%s8119_s11 + $0x7d0] ss:$8 sps:$4 sm:$0xff]  }
 0x1c2   : > { %2348 = vmatpush1.bf16.msra.mxu0 %v7443_v7  ;;  %v2423_v7 = vshrl.u32 %v8502_v42, 16 }
 0x1c3   : > { %2349 = vmatprep.subr.bf16.mxu0 %v7448_v8  ;;  %v2426_v8 = vshll.u32 %v8502_v42, 16  ;;  %v7507_v42 = vld [vmem:[%s8119_s11 + $0x7f0] ss:$8 sps:$4 sm:$0xff]  }
 0x1c5   : > { %v2428_v13 = vrot.slane %v2426_v8, 3 }
 0x1c6   : > { %2350 = vmatpush1.bf16.msra.mxu0 %v7446_v9  ;;  %v2431_v9 = vshrl.u32 %v8557_v4, 16 }
 0x1c7   : > { %2351 = vmatprep.subr.bf16.mxu0 %v7451_v10  ;;  %v2434_v10 = vshll.u32 %v8557_v4, 16 }
 0x1c9   : > { %v2436_v17 = vrot.slane %v2434_v10, 3 }
 0x1ca   : > { %2352 = vmatpush1.bf16.msra.mxu0 %v7449_v11  ;;  %v7506_v11 = vld [vmem:[%s8119_s11 + $0x7e4] ss:$8 sps:$4 sm:$0xff]  }
 0x1cb   : > { %2353 = vmatprep.subr.bf16.mxu0 %v7454_v12  ;;  %v2425_v12 = vrot.slane %v2423_v7, 2 }
 0x1ce   : > { %2354 = vmatpush1.bf16.msra.mxu0 %v7452_v16  ;;  %v2433_v16 = vrot.slane %v2431_v9, 2 }
 0x1cf   : > { %2355 = vmatprep.subr.bf16.mxu0 %v7457_v18  ;;  %v7509_v18 = vld [vmem:[%s8119_s11 + $0x7f4] ss:$8 sps:$4 sm:$0xff]  }
 0x1d2   : > { %2356 = vmatpush1.bf16.msra.mxu0 %v7455_v21  ;;  %v2429_v21 = vor.u32 %v2428_v13, %v2425_v12  ;;  %v7565_v12 = vld [vmem:[%s8625_s18 + $0x114] ss:$8 sps:$4 sm:$0xff]   ;;  %v7567_v13 = vld [vmem:[%s8625_s18 + $0x110] ss:$8 sps:$4 sm:$0xff]  }
 0x1d3   : > { %2620 = vmatprep.subr.bf16.mxu0 %v7464_v19  ;;  %v8571_v19 = vld [vmem:[%s8140_s15 + $0x8] sm:$0x88] }
 0x1d4   : > { %v6344_v25 = vcombine.high %v8571_v19, %v8440_v31 }
 0x1d5   : > { %2358 = vmatmul.mubr.bf16.vlgmr.msra.gmra.mrb[0].mxu0 %v2157_v26  ;;  %v7515_v26 = vld [vmem:[%s8119_s11 + $0x810] ss:$8 sps:$4 sm:$0xff]  }
 0x1d6   : > { %2621 = vmatpush1.bf16.msra.mxu0 %v7462_v27  ;;  %2367 = vmatprep.mubr.bf16.mxu0 %v8460_v41  ;;  %v7476_v41 = vld [vmem:[%s8119_s11 + $0x744] ss:$8 sps:$4 sm:$0xff]  }
 0x1d7   : > { %2622 = vmatprep.subr.bf16.mxu0 %v7467_v28  ;;  %v7520_v27 = vld [vmem:[%s8119_s11 + $0x824] ss:$8 sps:$4 sm:$0xff]   ;;  %v2719_v28 = vrot.slane %v6344_v25, 3  ;;  %v7585_v25 = vld [vmem:[%s8625_s18 + $0x170] ss:$8 sps:$4 sm:$0xff]  }
 0x1d9   : > { %v2721_v33 = vsel %vm1320_vm2, %v2719_v28, %v2720_v29  ;;  %v7589_v28 = vld [vmem:[%s8625_s18 + $0x194] ss:$8 sps:$4 sm:$0xff]  }
 0x1da   : > { %2623 = vmatpush1.bf16.msra.mxu0 %v7465_v34  ;;  %v7521_v34 = vld [vmem:[%s8119_s11 + $0x830] ss:$8 sps:$4 sm:$0xff]  }
 0x1db   : > { %2624 = vmatprep.subr.bf16.mxu0 %v7470_v35  ;;  %v7526_v35 = vld [vmem:[%s8119_s11 + $0x844] ss:$8 sps:$4 sm:$0xff]  }
 0x1dd   : > { %2368 = vmatmul.mubr.bf16.gmra.mrb[28].mxu0 %v2156_v14  ;;  %v2437_v14 = vor.u32 %v2436_v17, %v2433_v16  ;;  %v7568_v16 = vld [vmem:[%s8625_s18 + $0x124] ss:$8 sps:$4 sm:$0xff]   ;;  %v7570_v17 = vld [vmem:[%s8625_s18 + $0x120] ss:$8 sps:$4 sm:$0xff]  }
 0x1de   : > { %2625 = vmatpush1.bf16.msra.mxu0 %v7468_v38  ;;  %2652 = vmatprep.mubr.bf16.mxu0 %v2455_v49  ;;  %v7527_v38 = vld [vmem:[%s8119_s11 + $0x850] ss:$8 sps:$4 sm:$0xff]   ;;  %v7530_v49 = vld [vmem:[%s8119_s11 + $0x860] ss:$8 sps:$4 sm:$0xff]  }
 0x1df   : > { %2626 = vmatprep.subr.bf16.mxu0 %v7473_v47  ;;  %v2438_v22 = vsel %vm2421_vm5, %v2429_v21, %v2437_v14  ;;  %v7532_v47 = vld [vmem:[%s8119_s11 + $0x864] ss:$8 sps:$4 sm:$0xff]  }
 0x1e0   : > { %v7574_v21 = vld [vmem:[%s8625_s18 + $0x144] ss:$8 sps:$4 sm:$0xff]  }
 0x1e2   : > { %2627 = vmatpush1.bf16.msra.mxu0 %v7471_v40  ;;  %v7535_v40 = vld [vmem:[%s8119_s11 + $0x874] ss:$8 sps:$4 sm:$0xff]  }
 0x1e3   : > { %2628 = vmatprep.subr.bf16.mxu0 %v7476_v41  ;;  %v7533_v41 = vld [vmem:[%s8119_s11 + $0x870] ss:$8 sps:$4 sm:$0xff]  }
 0x1e6   : > { %2629 = vmatpush1.bf16.msra.mxu0 %v7474_v39  ;;  %v7538_v39 = vld [vmem:[%s8119_s11 + $0x884] ss:$8 sps:$4 sm:$0xff]  }
 0x1e7   : > { %2630 = vmatprep.subr.bf16.mxu0 %v7479_v43 }
 0x1ea   : > { %2631 = vmatpush1.bf16.msra.mxu0 %v7477_v44 }
 0x1eb   : > { %2632 = vmatprep.subr.bf16.mxu0 %v7482_v46 }
 0x1ee   : > { %2633 = vmatpush1.bf16.msra.mxu0 %v7480_v50 }
 0x1ef   : > { %2634 = vmatprep.subr.bf16.mxu0 %v7485_v51  ;;  %v7536_v51 = vld [vmem:[%s8119_s11 + $0x880] ss:$8 sps:$4 sm:$0xff]  }
 0x1f0   : > { %v1535_v53 = vpop.f32.mrb[16].mxu0 }
 0x1f1   : > { %v8541_v54 = vadd.f32 %v1535_v53, %v8479_v60  ;;  %v1537_v55 = vpop.f32.mrb[17].mxu0  ;;  %v7494_v60 = vld [vmem:[%s8119_s11 + $0x7a4] ss:$8 sps:$4 sm:$0xff]  }
 0x1f2   : > { %v8544_v56 = vadd.f32 %v1537_v55, %v8482_v62  ;;  %2635 = vmatpush1.bf16.msra.mxu0 %v7483_v52  ;;  %v1539_v58 = vpop.f32.mrb[18].mxu0  ;;  %v7497_v62 = vld [vmem:[%s8119_s11 + $0x7b4] ss:$8 sps:$4 sm:$0xff]   ;;  %v7539_v55 = vld [vmem:[%s8119_s11 + $0x890] ss:$8 sps:$4 sm:$0xff]  }
 0x1f3   : > { %2636 = vmatprep.subr.bf16.mxu0 %v7488_v48  ;;  %v1540_v61 = vpop.f32.mrb[19].mxu0  ;;  %v7541_v48 = vld [vmem:[%s8119_s11 + $0x894] ss:$8 sps:$4 sm:$0xff]   ;;  %v7545_v58 = vld [vmem:[%s8119_s11 + $0x8b0] ss:$8 sps:$4 sm:$0xff]  }
 0x1f4   : > { %v7548_v61 = vld [vmem:[%s8119_s11 + $0x8c0] ss:$8 sps:$4 sm:$0xff]  }
 0x1f6   : > { %2637 = vmatpush1.bf16.msra.mxu0 %v7486_v57  ;;  %v7544_v57 = vld [vmem:[%s8119_s11 + $0x8a4] ss:$8 sps:$4 sm:$0xff]  }
 0x1f7   : > { %2638 = vmatprep.subr.bf16.mxu0 %v7491_v59  ;;  %v7550_v59 = vld [vmem:[%s8119_s11 + $0x8c4] ss:$8 sps:$4 sm:$0xff]  }
 0x1fa   : > { %2639 = vmatpush1.bf16.msra.mxu0 %v7489_v63  ;;  %v7553_v63 = vld [vmem:[%s8119_s11 + $0x8d4] ss:$8 sps:$4 sm:$0xff]  }
 0x1fb   : > { %2640 = vmatprep.subr.bf16.mxu0 %v7494_v60  ;;  %v7551_v60 = vld [vmem:[%s8119_s11 + $0x8d0] ss:$8 sps:$4 sm:$0xff]  }
 0x1fe   : > { %2641 = vmatpush1.bf16.msra.mxu0 %v7492_v0  ;;  %v7556_v0 = vld [vmem:[%s8119_s11 + $0x8e4] ss:$8 sps:$4 sm:$0xff]  }
 0x1ff   : > { %2642 = vmatprep.subr.bf16.mxu0 %v7497_v62  ;;  %v7554_v62 = vld [vmem:[%s8119_s11 + $0x8e0] ss:$8 sps:$4 sm:$0xff]  }
 0x202   : > { %2643 = vmatpush1.bf16.msra.mxu0 %v7495_v1  ;;  %v6343_v1 = vcombine.low %v8571_v19, %v8440_v31  ;;  %v7579_v19 = vld [vmem:[%s8625_s18 + $0x150] ss:$8 sps:$4 sm:$0xff]  }
 0x203   : > { %2644 = vmatprep.subr.bf16.mxu0 %v7500_v2  ;;  %v7559_v2 = vld [vmem:[%s8119_s11 + $0x8f4] ss:$8 sps:$4 sm:$0xff]  }
 0x206   : > { %2645 = vmatpush1.bf16.msra.mxu0 %v7498_v3  ;;  %v7557_v3 = vld [vmem:[%s8119_s11 + $0x8f0] ss:$8 sps:$4 sm:$0xff]  }
 0x207   : > { %2646 = vmatprep.subr.bf16.mxu0 %v7503_v5  ;;  %v2716_v5 = vrot.slane %v6343_v1, 3 }
 0x20a   : > { %2647 = vmatpush1.bf16.msra.mxu0 %v7501_v6  ;;  %v2717_v6 = vrot.slane %v8557_v4, 3  ;;  %v7562_v4 = vld [vmem:[%s8625_s18 + $0x104] ss:$8 sps:$4 sm:$0xff]  }
 0x20b   : > { %2648 = vmatprep.subr.bf16.mxu0 %v7506_v11  ;;  %3297 = vmatprep.subr.bf16.mxu1 %v7562_v4  ;;  %v2943_v4 = vld [vmem:[%s380_s22] sm:$0x3] }
 0x20c   : > { %v2718_v7 = vsel %vm1320_vm2, %v2716_v5, %v2717_v6 }
 0x20e   : > { %2649 = vmatpush1.bf16.msra.mxu0 %v7504_v45  ;;  %v7564_v45 = vld [vmem:[%s8625_s18 + $0x100] ss:$8 sps:$4 sm:$0xff]  }
 0x20f   : > { %2650 = vmatprep.subr.bf16.mxu0 %v7509_v18  ;;  %3298 = vmatpush1.bf16.msra.mxu1 %v7564_v45  ;;  %v7571_v18 = vld [vmem:[%s8625_s18 + $0x134] ss:$8 sps:$4 sm:$0xff]  }
 0x210   : > { %3299 = vmatprep.subr.bf16.mxu1 %v7565_v12 }
 0x212   : > { %2651 = vmatpush1.bf16.msra.mxu0 %v7507_v42  ;;  %v7573_v42 = vld [vmem:[%s8625_s18 + $0x130] ss:$8 sps:$4 sm:$0xff]  }
 0x213   : > { %2886 = vmatprep.subr.bf16.mxu0 %v7514_v15  ;;  %3300 = vmatpush1.bf16.msra.mxu1 %v7567_v13  ;;  %v7577_v15 = vld [vmem:[%s8625_s18 + $0x154] ss:$8 sps:$4 sm:$0xff]  }
 0x214   : > { %3301 = vmatprep.subr.bf16.mxu1 %v7568_v16 }
 0x215   : > { %2653 = vmatmul.mubr.bf16.vlgmr.msra.gmra.mrb[0].mxu0 %v2438_v22  ;;  %v7580_v22 = vld [vmem:[%s8625_s18 + $0x164] ss:$8 sps:$4 sm:$0xff]  }
 0x216   : > { %2887 = vmatpush1.bf16.msra.mxu0 %v7512_v23  ;;  %2662 = vmatprep.mubr.bf16.mxu0 %v8524_v37  ;;  %v7529_v37 = vld [vmem:[%s8119_s11 + $0x854] ss:$8 sps:$4 sm:$0xff]   ;;  %v7582_v23 = vld [vmem:[%s8625_s18 + $0x160] ss:$8 sps:$4 sm:$0xff]  }
 0x217   : > { %2888 = vmatprep.subr.bf16.mxu0 %v7517_v24  ;;  %3302 = vmatpush1.bf16.msra.mxu1 %v7570_v17  ;;  %v7583_v24 = vld [vmem:[%s8625_s18 + $0x174] ss:$8 sps:$4 sm:$0xff]  }
 0x218   : > { %3303 = vmatprep.subr.bf16.mxu1 %v7571_v18 }
 0x21a   : > { %2889 = vmatpush1.bf16.msra.mxu0 %v7515_v26  ;;  %v7586_v26 = vld [vmem:[%s8625_s18 + $0x184] ss:$8 sps:$4 sm:$0xff]  }
 0x21b   : > { %2890 = vmatprep.subr.bf16.mxu0 %v7520_v27  ;;  %3304 = vmatpush1.bf16.msra.mxu1 %v7573_v42  ;;  %v7588_v27 = vld [vmem:[%s8625_s18 + $0x180] ss:$8 sps:$4 sm:$0xff]  }
 0x21c   : > { %3305 = vmatprep.subr.bf16.mxu1 %v7574_v21 }
 0x21d   : > { %2663 = vmatmul.mubr.bf16.gmra.mrb[32].mxu0 %v2437_v14  ;;  %v7576_v14 = vld [vmem:[%s8625_s18 + $0x140] ss:$8 sps:$4 sm:$0xff]  }
 0x21e   : > { %2891 = vmatpush1.bf16.msra.mxu0 %v7518_v30  ;;  %2918 = vmatprep.mubr.bf16.mxu0 %v2721_v33  ;;  %v8038_v33 = vmov 0.0  }
 0x21f   : > { %2892 = vmatprep.subr.bf16.mxu0 %v7523_v32  ;;  %3306 = vmatpush1.bf16.msra.mxu1 %v7576_v14  ;;  %v7592_v32 = vld [vmem:[%s8625_s18 + $0x1a4] ss:$8 sps:$4 sm:$0xff]   ;;  %2980 = vst [vmem:[#allocation2 + $0x8] sm:$0x7f] %v8038_v33  ;;  %2979 = vst [vmem:[#allocation2] sm:$0x7f] %v8038_v33 }
 0x220   : > { %3307 = vmatprep.subr.bf16.mxu1 %v7577_v15  ;;  %3014 = vst [vmem:[#allocation2 + $0x30] sm:$0x80] %v8038_v33  ;;  %3015 = vst [vmem:[#allocation2 + $0x38] sm:$0x80] %v8038_v33 }
 0x221   : > { %3016 = vst [vmem:[#allocation2 + $0x40] sm:$0xff] %v8038_v33  ;;  %3017 = vst [vmem:[#allocation2 + $0x48] sm:$0xff] %v8038_v33 }
 0x222   : > { %2893 = vmatpush1.bf16.msra.mxu0 %v7521_v34 }
 0x223   : > { %2894 = vmatprep.subr.bf16.mxu0 %v7526_v35  ;;  %3308 = vmatpush1.bf16.msra.mxu1 %v7579_v19 }
 0x224   : > { %3309 = vmatprep.subr.bf16.mxu1 %v7580_v22 }
 0x226   : > { %2895 = vmatpush1.bf16.msra.mxu0 %v7524_v36  ;;  %v7594_v36 = vld [vmem:[%s8625_s18 + $0x1a0] ss:$8 sps:$4 sm:$0xff]  }
 0x227   : > { %2896 = vmatprep.subr.bf16.mxu0 %v7529_v37  ;;  %3310 = vmatpush1.bf16.msra.mxu1 %v7582_v23 }
 0x228   : > { %3311 = vmatprep.subr.bf16.mxu1 %v7583_v24 }
 0x22a   : > { %2897 = vmatpush1.bf16.msra.mxu0 %v7527_v38 }
 0x22b   : > { %2898 = vmatprep.subr.bf16.mxu0 %v7532_v47  ;;  %3312 = vmatpush1.bf16.msra.mxu1 %v7585_v25 }
 0x22c   : > { %3313 = vmatprep.subr.bf16.mxu1 %v7586_v26 }
 0x22e   : > { %2899 = vmatpush1.bf16.msra.mxu0 %v7530_v49  ;;  %v7595_v49 = vld [vmem:[%s8625_s18 + $0x1b4] ss:$8 sps:$4 sm:$0xff]  }
 0x22f   : > { %2900 = vmatprep.subr.bf16.mxu0 %v7535_v40  ;;  %3314 = vmatpush1.bf16.msra.mxu1 %v7588_v27  ;;  %v7597_v40 = vld [vmem:[%s8625_s18 + $0x1b0] ss:$8 sps:$4 sm:$0xff]  }
 0x230   : > { %v1830_v43 = vpop.f32.mrb[20].mxu0  ;;  %3315 = vmatprep.subr.bf16.mxu1 %v7589_v28 }
 0x231   : > { %v1841_v44 = vadd.f32 %v1830_v43, %v8541_v54  ;;  %v1832_v46 = vpop.f32.mrb[21].mxu0  ;;  %v7542_v54 = vld [vmem:[%s8119_s11 + $0x8a0] ss:$8 sps:$4 sm:$0xff]   ;;  %v7601_v43 = vld [vmem:[%s8625_s18 + $0x1d4] ss:$8 sps:$4 sm:$0xff]  }
 0x232   : > { %v1842_v50 = vadd.f32 %v1832_v46, %v8544_v56  ;;  %2901 = vmatpush1.bf16.msra.mxu0 %v7533_v41  ;;  %v1834_v52 = vpop.f32.mrb[22].mxu0  ;;  %v7547_v56 = vld [vmem:[%s8119_s11 + $0x8b4] ss:$8 sps:$4 sm:$0xff]   ;;  %v7598_v41 = vld [vmem:[%s8625_s18 + $0x1c4] ss:$8 sps:$4 sm:$0xff]  }
 0x233   : > { %2902 = vmatprep.subr.bf16.mxu0 %v7538_v39  ;;  %v1835_v53 = vpop.f32.mrb[23].mxu0  ;;  %v7600_v39 = vld [vmem:[%s8625_s18 + $0x1c0] ss:$8 sps:$4 sm:$0xff]   ;;  %v7604_v46 = vld [vmem:[%s8625_s18 + $0x1e4] ss:$8 sps:$4 sm:$0xff]  }
 0x234   : > { %v7609_v52 = vld [vmem:[%s8625_s18 + $0x1f0] ss:$8 sps:$4 sm:$0xff]  }
 0x236   : > { %2903 = vmatpush1.bf16.msra.mxu0 %v7536_v51  ;;  %v7607_v51 = vld [vmem:[%s8625_s18 + $0x1f4] ss:$8 sps:$4 sm:$0xff]  }
 0x237   : > { %2904 = vmatprep.subr.bf16.mxu0 %v7541_v48  ;;  %v7612_v48 = vld [vmem:[%s8625_s18 + $0x4] ss:$8 sps:$4 sm:$0xff]  }
 0x23a   : > { %2905 = vmatpush1.bf16.msra.mxu0 %v7539_v55 }
 0x23b   : > { %2906 = vmatprep.subr.bf16.mxu0 %v7544_v57 }
 0x23e   : > { %2907 = vmatpush1.bf16.msra.mxu0 %v7542_v54 }
 0x23f   : > { %2908 = vmatprep.subr.bf16.mxu0 %v7547_v56 }
 0x242   : > { %2909 = vmatpush1.bf16.msra.mxu0 %v7545_v58 }
 0x243   : > { %2910 = vmatprep.subr.bf16.mxu0 %v7550_v59  ;;  %v405_v59 = vlaneseq }
 0x246   : > { %2911 = vmatpush1.bf16.msra.mxu0 %v7548_v61  ;;  %v8664_v61 = vshrl.u32 %v405_v59, 7 }
 0x247   : > { %2912 = vmatprep.subr.bf16.mxu0 %v7553_v63 }
 0x248   : > { %v407_v63 = vadd.s32 8, %v8664_v61  ;;  %v2951_v45 = vsub.s32 1, %v8664_v61 }
 0x24a   : > { %2913 = vmatpush1.bf16.msra.mxu0 %v7551_v60  ;;  %v2952_v18 = vrot.slane %v2943_v4, %v2951_v45 }
 0x24b   : > { %2914 = vmatprep.subr.bf16.mxu0 %v7556_v0  ;;  %v8668_v60 = vmul.u32.u64.low 2863311531, %v8664_v61  ;;  %v8669_v0 = vmul.u32.u64.high 2863311531, %v8664_v61, %v8668_v60 }
 0x24e   : > { %2915 = vmatpush1.bf16.msra.mxu0 %v7554_v62  ;;  %v8671_v62 = vmul.u32.u64.low 2863311531, %v407_v63  ;;  %v8672_v1 = vmul.u32.u64.high 2863311531, %v407_v63, %v8671_v62 }
 0x24f   : > { %2916 = vmatprep.subr.bf16.mxu0 %v7559_v2  ;;  %v408_v2 = vadd.s32 16, %v8664_v61 }
 0x250   : > { %v426_v5 = vshrl.u32 %v8672_v1, 2 }
 0x252   : > { %2917 = vmatpush1.bf16.msra.mxu0 %v7557_v3  ;;  %v415_v3 = vshrl.u32 %v8669_v0, 2 }
 0x255   : > { %2919 = vmatmul.mubr.bf16.vlgmr.msra.gmra.mrb[0].mxu0 %v2718_v7 }
 0x256   : > { %2928 = vmatprep.mubr.bf16.mxu0 %v2720_v29  ;;  %v7591_v29 = vld [vmem:[%s8625_s18 + $0x190] ss:$8 sps:$4 sm:$0xff]  }
 0x257   : > { %3316 = vmatpush1.bf16.msra.mxu1 %v7591_v29 }
 0x258   : > { %3317 = vmatprep.subr.bf16.mxu1 %v7592_v32 }
 0x25b   : > { %3318 = vmatpush1.bf16.msra.mxu1 %v7594_v36 }
 0x25c   : > { %3319 = vmatprep.subr.bf16.mxu1 %v7595_v49 }
 0x25d   : > { %2929 = vmatmul.mubr.bf16.gmra.mrb[36].mxu0 %v2717_v6  ;;  %v8677_v6 = vmul.u32.u64.low 2863311531, %v408_v2  ;;  %v8678_v7 = vmul.u32.u64.high 2863311531, %v408_v2, %v8677_v6 }
 0x25f   : > { %3320 = vmatpush1.bf16.msra.mxu1 %v7597_v40 }
 0x260   : > { %3321 = vmatprep.subr.bf16.mxu1 %v7598_v41 }
 0x263   : > { %3322 = vmatpush1.bf16.msra.mxu1 %v7600_v39 }
 0x264   : > { %3323 = vmatprep.subr.bf16.mxu1 %v7601_v43 }
 0x270   : > { %v2088_v8 = vpop.f32.mrb[24].mxu0 }
 0x271   : > { %v2099_v9 = vadd.f32 %v2088_v8, %v1841_v44  ;;  %v2090_v31 = vpop.f32.mrb[25].mxu0  ;;  %v7603_v44 = vld [vmem:[%s8625_s18 + $0x1d0] ss:$8 sps:$4 sm:$0xff]   ;;  %v416_v8 = vmul.u32 6, %v415_v3 }
 0x272   : > { %v2100_v10 = vadd.f32 %v2090_v31, %v1842_v50  ;;  %v2092_v11 = vpop.f32.mrb[26].mxu0  ;;  %v7606_v50 = vld [vmem:[%s8625_s18 + $0x1e0] ss:$8 sps:$4 sm:$0xff]   ;;  %3324 = vmatpush1.bf16.msra.mxu1 %v7603_v44 }
 0x273   : > { %v2093_v20 = vpop.f32.mrb[27].mxu0  ;;  %3325 = vmatprep.subr.bf16.mxu1 %v7604_v46  ;;  %v417_v31 = vsub.s32 %v8664_v61, %v416_v8  ;;  %v437_v11 = vshrl.u32 %v8678_v7, 2 }
 0x274   : > { %v2947_v20 = vsub.s32 0, %v8664_v61 }
 0x275   : > { %vm442_vm6 = vcmp.ne.s32.totalorder %v417_v31, 0  ;;  %vm445_vm7 = vcmp.lt.s32.totalorder %v417_v31, 0  ;;  %v451_v12 = vadd.s32 6, %v417_v31  ;;  %v438_v13 = vmul.u32 6, %v437_v11 }
 0x276   : > { %3326 = vmatpush1.bf16.msra.mxu1 %v7606_v50  ;;  %vm448_vm10 = vmand %vm445_vm7, %vm442_vm6  ;;  %v2948_v16 = vrot.slane %v2943_v4, %v2947_v20 }
 0x277   : > { %3327 = vmatprep.subr.bf16.mxu1 %v7607_v51  ;;  %v454_v21 = vsel %vm448_vm10, %v451_v12, %v417_v31  ;;  %v439_v14 = vsub.s32 %v408_v2, %v438_v13 }
 0x278   : > { %vm8701_vm12 = vcmp.lt.s32.totalorder %v454_v21, 4 }
 0x279   : > { %vm444_vm13 = vcmp.ne.s32.totalorder %v439_v14, 0  ;;  %vm447_vm14 = vcmp.lt.s32.totalorder %v439_v14, 0  ;;  %v453_v36 = vadd.s32 6, %v439_v14 }
 0x27a   : > { %3328 = vmatpush1.bf16.msra.mxu1 %v7609_v52  ;;  %vm8713_vm6 = vmand %vm447_vm14, %vm444_vm13 }
 0x27b   : > { %3508 = vmatprep.subr.bf16.mxu1 %v7612_v48  ;;  %v456_v50 = vsel %vm8713_vm6, %v453_v36, %v439_v14 }
 0x27c   : > { %vm8733_vm7 = vcmp.lt.s32.totalorder %v456_v50, 4 }
 0x2b0   : > { %v2369_v30 = vpop.f32.mrb[28].mxu0 }
 0x2b1   : > { %v2380_v34 = vadd.f32 %v2369_v30, %v2099_v9  ;;  %v2371_v35 = vpop.f32.mrb[29].mxu0  ;;  %v427_v9 = vmul.u32 6, %v426_v5 }
 0x2b2   : > { %v2381_v37 = vadd.f32 %v2371_v35, %v2100_v10  ;;  %v2373_v38 = vpop.f32.mrb[30].mxu0 }
 0x2b3   : > { %v2374_v47 = vpop.f32.mrb[31].mxu0  ;;  %v428_v10 = vsub.s32 %v407_v63, %v427_v9 }
 0x2b5   : > { %vm443_vm8 = vcmp.ne.s32.totalorder %v428_v10, 0  ;;  %vm446_vm9 = vcmp.lt.s32.totalorder %v428_v10, 0  ;;  %v452_v17 = vadd.s32 6, %v428_v10 }
 0x2b6   : > { %vm8695_vm11 = vmand %vm446_vm9, %vm443_vm8 }
 0x2b7   : > { %v455_v23 = vsel %vm8695_vm11, %v452_v17, %v428_v10 }
 0x2b8   : > { %vm8705_vm15 = vcmp.lt.s32.totalorder %v455_v23, 4 }
 0x2f0   : > { %v2664_v53 = vpop.f32.mrb[32].mxu0 }
 0x2f1   : > { %v8660_v55 = vadd.f32 %v2664_v53, %v2380_v34  ;;  %v2666_v57 = vpop.f32.mrb[33].mxu0 }
 0x2f2   : > { %v8662_v54 = vadd.f32 %v2666_v57, %v2381_v37  ;;  %v2668_v56 = vpop.f32.mrb[34].mxu0 }
 0x2f3   : > { %v2669_v58 = vpop.f32.mrb[35].mxu0 }
 0x328   : > { %v2920_v15 = vpop.f32.mrb[0].mxu0 }
 0x329   : > { %v2955_v19 = vadd.f32 %v2948_v16, %v2920_v15  ;;  %v2922_v22 = vpop.f32.mrb[1].mxu0 }
 0x32a   : > { %v2956_v25 = vadd.f32 %v2952_v18, %v2922_v22  ;;  %v2924_v26 = vpop.f32.mrb[2].mxu0 }
 0x32b   : > { %v2961_v27 = vmax.f32 %v2955_v19, 0.0  ;;  %v2957_v28 = vadd.f32 %v2948_v16, %v2924_v26  ;;  %v2926_v29 = vpop.f32.mrb[3].mxu0 }
 0x32c   : > { %v2962_v30 = vmax.f32 %v2956_v25, 0.0  ;;  %v2958_v33 = vadd.f32 %v2952_v18, %v2926_v29 }
 0x32d   : > { %v2973_v34 = vsel %vm8701_vm12, %v2961_v27, 0.0  ;;  %v2963_v35 = vmax.f32 %v2957_v28, 0.0 }
 0x32e   : > { %v2988_v37 = vrot.slane %v2973_v34, 1  ;;  %v2974_v38 = vsel %vm8701_vm12, %v2962_v30, 0.0  ;;  %v2964_v47 = vmax.f32 %v2958_v33, 0.0 }
 0x32f   : > { %v2989_v40 = vrot.slane %v2974_v38, 1  ;;  %v2975_v41 = vsel %vm8705_vm15, %v2963_v35, 0.0 }
 0x330   : > { %3006 = vst [vmem:[#allocation2] sm:$0x80] %v2988_v37  ;;  %v2990_v39 = vrot.slane %v2975_v41, 1  ;;  %v2976_v43 = vsel %vm8705_vm15, %v2964_v47, 0.0  ;;  %v2930_v44 = vpop.f32.mrb[36].mxu0 }
 0x331   : > { %3007 = vst [vmem:[#allocation2 + $0x8] sm:$0x80] %v2989_v40  ;;  %v2992_v46 = vrot.slane %v2976_v43, 1  ;;  %v2941_v51 = vadd.f32 %v2930_v44, %v8660_v55  ;;  %v2932_v52 = vpop.f32.mrb[37].mxu0 }
 0x332   : > { %v8725_v48 = vsel %vm1047_vm1, %v2988_v37, %v2990_v39  ;;  %v2942_v53 = vadd.f32 %v2932_v52, %v8662_v54  ;;  %v2934_v57 = vpop.f32.mrb[38].mxu0 }
 0x333   : > { %3008 = vst [vmem:[#allocation2 + $0x10] sm:$0xff] %v8725_v48  ;;  %v8730_v56 = vsel %vm1047_vm1, %v2989_v40, %v2992_v46  ;;  %v2959_v58 = vadd.f32 %v2948_v16, %v2941_v51  ;;  %v2935_v59 = vpop.f32.mrb[39].mxu0 }
 0x334   : > { %3009 = vst [vmem:[#allocation2 + $0x18] sm:$0xff] %v8730_v56  ;;  %v2960_v55 = vadd.f32 %v2952_v18, %v2942_v53 }
 0x335   : > { %v2965_v60 = vmax.f32 %v2959_v58, 0.0 }
 0x336   : > { %v2966_v0 = vmax.f32 %v2960_v55, 0.0 }
 0x337   : > { %v2977_v54 = vsel %vm8733_vm7, %v2965_v60, 0.0  ;;  %v3062_v62 = vld [vmem:[#allocation2] sm:$0xfe] }
 0x338   : > { %v2994_v1 = vrot.slane %v2977_v54, 1  ;;  %v2978_v2 = vsel %vm8733_vm7, %v2966_v0, 0.0  ;;  %v3063_v3 = vld [vmem:[#allocation2 + $0x8] sm:$0xfe]  ;;  %v3066_v5 = vpack.c.bf16 %v8725_v48, %v3062_v62  ;;  %v3559_v6 = vld [vmem:[#allocation2] sm:$0xfc] }
 0x339   : > { %v2996_v7 = vrot.slane %v2978_v2, 1  ;;  %v3067_v8 = vpack.c.bf16 %v8730_v56, %v3063_v3  ;;  %v3560_v9 = vld [vmem:[#allocation2 + $0x8] sm:$0xfc]  ;;  %v3563_v16 = vpack.c.bf16 %v8725_v48, %v3559_v6  ;;  %v3831_v17 = vld [vmem:[#allocation2] sm:$0xc0] }
 0x33a   : > { %v8744_v31 = vsel %vm1047_vm1, %v2990_v39, %v2994_v1  ;;  %3012 = vst [vmem:[#allocation2 + $0x30] sm:$0x7f] %v2994_v1  ;;  %v3106_v10 = vshll.u32 %v3066_v5, 16  ;;  %v3832_v11 = vld [vmem:[#allocation2 + $0x8] sm:$0xc0]  ;;  %v3564_v13 = vpack.c.bf16 %v8730_v56, %v3560_v9  ;;  %v3835_v14 = vpack.c.bf16 %v8725_v48, %v3831_v17 }
 0x33b   : > { %3010 = vst [vmem:[#allocation2 + $0x20] sm:$0xff] %v8744_v31  ;;  %v8748_v4 = vsel %vm1047_vm1, %v2992_v46, %v2996_v7  ;;  %3013 = vst [vmem:[#allocation2 + $0x38] sm:$0x7f] %v2996_v7  ;;  %v3118_v12 = vshll.u32 %v3067_v8, 16  ;;  %v4104_v18 = vld [vmem:[#allocation2 + $0x8] sm:$0x80]  ;;  %v3836_v42 = vpack.c.bf16 %v8730_v56, %v3832_v11  ;;  %v4401_v35 = vpack.c.bf16 %v8744_v31, %v8725_v48 }
 0x33c   : > { %3011 = vst [vmem:[#allocation2 + $0x28] sm:$0xff] %v8748_v4  ;;  %v3108_v21 = vrot.slane %v3106_v10, 1  ;;  %v4108_v15 = vpack.c.bf16 %v8730_v56, %v4104_v18  ;;  %v4103_v19 = vld [vmem:[#allocation2] sm:$0x80]  ;;  %v3104_v23 = vshrl.u32 %v3066_v5, 16  ;;  %v4402_v25 = vpack.c.bf16 %v8748_v4, %v8730_v56 }
 0x33d   : > { %v3120_v22 = vrot.slane %v3118_v12, 1  ;;  %v3116_v26 = vshrl.u32 %v3067_v8, 16  ;;  %v3607_v27 = vrot.slane %v3564_v13, 1  ;;  %v3604_v28 = vrot.slane %v3563_v16, 1  ;;  %v7610_v12 = vld [vmem:[%s8625_s18] ss:$8 sps:$4 sm:$0xff]  }
 0x33e   : > { %v3879_v29 = vrot.slane %v3836_v42, 3  ;;  %v3876_v30 = vrot.slane %v3835_v14, 3  ;;  %v4162_v33 = vshrl.u32 %v4108_v15, 16  ;;  %v4107_v34 = vpack.c.bf16 %v8725_v48, %v4103_v19 }
 0x33f   : > { %v3109_v37 = vor.u32 %v3108_v21, %v3104_v23  ;;  %v3121_v40 = vor.u32 %v3120_v22, %v3116_v26  ;;  %v4165_v57 = vshll.u32 %v4108_v15, 16  ;;  %v7615_v21 = vld [vmem:[%s8625_s18 + $0x14] ss:$8 sps:$4 sm:$0xff]  }
 0x340   : > { %v4145_v60 = vshrl.u32 %v4107_v34, 16  ;;  %v4148_v0 = vshll.u32 %v4107_v34, 16  ;;  %v4164_v14 = vrot.slane %v4162_v33, 3 }
 0x341   : > { %v3064_v36 = vld [vmem:[#allocation2 + $0x30] sm:$0x1]  ;;  %v4167_v15 = vrot.slane %v4165_v57, 4 }
 0x342   : > { %v3561_v38 = vld [vmem:[#allocation2 + $0x30] sm:$0x3]  ;;  %v3065_v49 = vld [vmem:[#allocation2 + $0x38] sm:$0x1]  ;;  %v8762_v41 = vpack.c.bf16 %v3064_v36, %v8744_v31  ;;  %v4147_v26 = vrot.slane %v4145_v60, 3  ;;  %v8821_v57 = vld [vmem:[#allocation2 + $0x20] sm:$0xff] }
 0x343   : > { %v3833_v47 = vld [vmem:[#allocation2 + $0x30] sm:$0x3f]  ;;  %v3562_v39 = vld [vmem:[#allocation2 + $0x38] sm:$0x3]  ;;  %v3565_v43 = vpack.c.bf16 %v3561_v38, %v8744_v31  ;;  %v3069_v50 = vpack.c.bf16 %v3065_v49, %v8748_v4  ;;  %v7618_v36 = vld [vmem:[%s8625_s18 + $0x24] ss:$8 sps:$4 sm:$0xff]  }
 0x344   : > { %v3834_v44 = vld [vmem:[#allocation2 + $0x38] sm:$0x3f]  ;;  %v3837_v46 = vpack.c.bf16 %v3833_v47, %v8744_v31  ;;  %v3566_v51 = vpack.c.bf16 %v3562_v39, %v8748_v4  ;;  %v4105_v58 = vld [vmem:[#allocation2 + $0x30] sm:$0x7f]  ;;  %v3111_v59 = vshll.u32 %v8762_v41, 16  ;;  %v3127_v49 = vshrl.u32 %v8762_v41, 16 }
 0x345   : > { %v3838_v52 = vpack.c.bf16 %v3834_v44, %v8748_v4  ;;  %v4106_v53 = vld [vmem:[#allocation2 + $0x38] sm:$0x7f]  ;;  %v3123_v54 = vshll.u32 %v3069_v50, 16  ;;  %v8773_v1 = vrot.slane %v3565_v43, 1  ;;  %v4109_v2 = vpack.c.bf16 %v4105_v58, %v8744_v31  ;;  %v7616_v47 = vld [vmem:[%s8625_s18 + $0x20] ss:$8 sps:$4 sm:$0xff]  }
 0x346   : > { %v4110_v55 = vpack.c.bf16 %v4106_v53, %v8748_v4  ;;  %v8771_v62 = vrot.slane %v3566_v51, 1  ;;  %v3113_v3 = vrot.slane %v3111_v59, 1  ;;  %v3130_v5 = vshrl.u32 %v3069_v50, 16  ;;  %v8814_v50 = vld [vmem:[#allocation2 + $0x28] sm:$0xff]  ;;  %v7621_v53 = vld [vmem:[%s8625_s18 + $0x34] ss:$8 sps:$4 sm:$0xff]  }
 0x347   : > { %v8776_v6 = vrot.slane %v3838_v52, 3  ;;  %v8778_v7 = vrot.slane %v3837_v46, 3  ;;  %v3125_v8 = vrot.slane %v3123_v54, 1  ;;  %v8786_v10 = vsel %vm1047_vm1, %v3604_v28, %v8773_v1  ;;  %v8812_v46 = vld [vmem:[#allocation2 + $0x38] sm:$0xff]  ;;  %v5230_v51 = vld [vmem:[#allocation2 + $0x48] sm:$0x3f] }
 0x348   : > { %v8782_v9 = vsel %vm1047_vm1, %v3607_v27, %v8771_v62  ;;  %v4170_v11 = vshrl.u32 %v4110_v55, 16  ;;  %v3114_v13 = vsel %vm545_vm0, %v3109_v37, %v3113_v3  ;;  %v4173_v22 = vshll.u32 %v4110_v55, 16  ;;  %v5228_v59 = vld [vmem:[#allocation2 + $0x18] sm:$0xc0]  ;;  %v8824_v55 = vld [vmem:[#allocation2 + $0x30] sm:$0xff] }
 0x349   : > { %v8792_v16 = vsel %vm1320_vm2, %v3879_v29, %v8776_v6  ;;  %v8796_v17 = vsel %vm1320_vm2, %v3876_v30, %v8778_v7  ;;  %v3126_v18 = vsel %vm545_vm0, %v3121_v40, %v3125_v8  ;;  %v3132_v42 = vor.u32 %v3130_v5, %v3125_v8  ;;  %v7613_v29 = vld [vmem:[%s8625_s18 + $0x10] ss:$8 sps:$4 sm:$0xff]   ;;  %v3021_v40 = vld [vmem:[#allocation2 + $0x8] sm:$0xff]  ;;  %v5227_v54 = vld [vmem:[#allocation2 + $0x10] sm:$0xc0] }
 0x34a   : > { %3329 = vmatprep.mubr.bf16.mxu1 %v3126_v18  ;;  %v4172_v19 = vrot.slane %v4170_v11, 3  ;;  %v4153_v23 = vshrl.u32 %v4109_v2, 16  ;;  %v4150_v27 = vrot.slane %v4148_v0, 4  ;;  %v4156_v28 = vshll.u32 %v4109_v2, 16  ;;  %v5229_v2 = vld [vmem:[#allocation2 + $0x40] sm:$0x3f] }
 0x34b   : > { %3330 = vmatmul.mubr.bf16.vlgmr.msra.gmra.mrb[0].mxu1 %v3114_v13  ;;  %v4175_v30 = vrot.slane %v4173_v22, 4  ;;  %v4168_v37 = vor.u32 %v4167_v15, %v4164_v14  ;;  %v3129_v52 = vor.u32 %v3127_v49, %v3113_v3  ;;  %v3027_v58 = vpack.c.bf16 %v8730_v56, %v3021_v40  ;;  %v7619_v3 = vld [vmem:[%s8625_s18 + $0x30] ss:$8 sps:$4 sm:$0xff]   ;;  %v7624_v8 = vld [vmem:[%s8625_s18 + $0x44] ss:$8 sps:$4 sm:$0xff]  }
 0x34c   : > { %3509 = vmatpush1.bf16.msra.mxu1 %v7610_v12  ;;  %3339 = vmatprep.mubr.bf16.mxu1 %v3132_v42  ;;  %v4155_v34 = vrot.slane %v4153_v23, 3  ;;  %v4158_v33 = vrot.slane %v4156_v28, 4  ;;  %v4151_v39 = vor.u32 %v4150_v27, %v4147_v26  ;;  %v5232_v60 = vpack.c.bf16 %v8814_v50, %v5228_v59  ;;  %v7622_v42 = vld [vmem:[%s8625_s18 + $0x40] ss:$8 sps:$4 sm:$0xff]   ;;  %v7627_v15 = vld [vmem:[%s8625_s18 + $0x54] ss:$8 sps:$4 sm:$0xff]  }
 0x34d   : > { %3510 = vmatprep.subr.bf16.mxu1 %v7615_v21  ;;  %v8802_v38 = vor.u32 %v4175_v30, %v4172_v19  ;;  %v5234_v0 = vpack.c.bf16 %v5230_v51, %v8812_v46  ;;  %v5231_v5 = vpack.c.bf16 %v8821_v57, %v5227_v54  ;;  %v5233_v13 = vpack.c.bf16 %v5229_v2, %v8824_v55  ;;  %v7625_v22 = vld [vmem:[%s8625_s18 + $0x50] ss:$8 sps:$4 sm:$0xff]   ;;  %v7630_v23 = vld [vmem:[%s8625_s18 + $0x64] ss:$8 sps:$4 sm:$0xff]   ;;  %v7628_v26 = vld [vmem:[%s8625_s18 + $0x60] ss:$8 sps:$4 sm:$0xff]  }
 0x34e   : > { %v8806_v43 = vor.u32 %v4158_v33, %v4155_v34  ;;  %v5275_v11 = vrot.slane %v5232_v60, 3  ;;  %v7633_v27 = vld [vmem:[%s8625_s18 + $0x74] ss:$8 sps:$4 sm:$0xff]   ;;  %v7631_v28 = vld [vmem:[%s8625_s18 + $0x70] ss:$8 sps:$4 sm:$0xff]   ;;  %v3020_v54 = vld [vmem:[#allocation2] sm:$0xff] }
 0x34f   : > { %v8810_v44 = vsel %vm1587_vm3, %v4168_v37, %v8802_v38  ;;  %v8831_v12 = vrot.slane %v5234_v0, 3  ;;  %v5272_v18 = vrot.slane %v5231_v5, 3  ;;  %v8839_v14 = vrot.slane %v5233_v13, 3  ;;  %v7634_v30 = vld [vmem:[%s8625_s18 + $0x80] ss:$8 sps:$4 sm:$0xff]  }
 0x350   : > { %3511 = vmatpush1.bf16.msra.mxu1 %v7613_v29  ;;  %v8819_v41 = vsel %vm1587_vm3, %v4151_v39, %v8806_v43  ;;  %v7636_v29 = vld [vmem:[%s8625_s18 + $0x84] ss:$8 sps:$4 sm:$0xff]   ;;  %v7639_v34 = vld [vmem:[%s8625_s18 + $0x94] ss:$8 sps:$4 sm:$0xff]   ;;  %v7640_v37 = vld [vmem:[%s8625_s18 + $0xa0] ss:$8 sps:$4 sm:$0xff]  }
 0x351   : > { %3512 = vmatprep.subr.bf16.mxu1 %v7618_v36  ;;  %v8837_v21 = vsel %vm1320_vm2, %v5275_v11, %v8831_v12  ;;  %v8844_v19 = vsel %vm1320_vm2, %v5272_v18, %v8839_v14  ;;  %v7637_v36 = vld [vmem:[%s8625_s18 + $0x90] ss:$8 sps:$4 sm:$0xff]   ;;  %v7642_v33 = vld [vmem:[%s8625_s18 + $0xa4] ss:$8 sps:$4 sm:$0xff]   ;;  %v7646_v39 = vld [vmem:[%s8625_s18 + $0xc0] ss:$8 sps:$4 sm:$0xff]  }
 0x352   : > { %v7643_v49 = vld [vmem:[%s8625_s18 + $0xb0] ss:$8 sps:$4 sm:$0xff]   ;;  %v7648_v40 = vld [vmem:[%s8625_s18 + $0xc4] ss:$8 sps:$4 sm:$0xff]   ;;  %v7651_v51 = vld [vmem:[%s8625_s18 + $0xd4] ss:$8 sps:$4 sm:$0xff]  }
 0x353   : > { %3340 = vmatmul.mubr.bf16.gmra.mrb[4].mxu1 %v3129_v52  ;;  %v7649_v52 = vld [vmem:[%s8625_s18 + $0xd0] ss:$8 sps:$4 sm:$0xff]   ;;  %v7657_v59 = vld [vmem:[%s8625_s18 + $0xf4] ss:$8 sps:$4 sm:$0xff]   ;;  %v7660_v0 = vld [vmem:[%s8625_s18 + $0x204] ss:$8 sps:$4 sm:$0xff]  }
 0x354   : > { %3513 = vmatpush1.bf16.msra.mxu1 %v7616_v47  ;;  %3540 = vmatprep.mubr.bf16.mxu1 %v3027_v58  ;;  %v7645_v47 = vld [vmem:[%s8625_s18 + $0xb4] ss:$8 sps:$4 sm:$0xff]   ;;  %v7652_v58 = vld [vmem:[%s8625_s18 + $0xe0] ss:$8 sps:$4 sm:$0xff]   ;;  %v7655_v60 = vld [vmem:[%s8625_s18 + $0xf0] ss:$8 sps:$4 sm:$0xff]  }
 0x355   : > { %3514 = vmatprep.subr.bf16.mxu1 %v7621_v53  ;;  %v7654_v53 = vld [vmem:[%s8625_s18 + $0xe4] ss:$8 sps:$4 sm:$0xff]   ;;  %v7658_v2 = vld [vmem:[%s8625_s18 + $0x200] ss:$8 sps:$4 sm:$0xff]   ;;  %v7663_v5 = vld [vmem:[%s8625_s18 + $0x214] ss:$8 sps:$4 sm:$0xff]  }
 0x356   : > { %v7661_v11 = vld [vmem:[%s8625_s18 + $0x210] ss:$8 sps:$4 sm:$0xff]   ;;  %v7666_v13 = vld [vmem:[%s8625_s18 + $0x224] ss:$8 sps:$4 sm:$0xff]   ;;  %v7664_v18 = vld [vmem:[%s8625_s18 + $0x220] ss:$8 sps:$4 sm:$0xff]  }
 0x357   : > { %v7825_v56 = vld [vmem:[%s8625_s18 + $0x574] ss:$8 sps:$4 sm:$0xff]  }
 0x358   : > { %3515 = vmatpush1.bf16.msra.mxu1 %v7619_v3  ;;  %v3026_v3 = vpack.c.bf16 %v8725_v48, %v3020_v54  ;;  %v7705_v54 = vld [vmem:[%s8625_s18 + $0x2f4] ss:$8 sps:$4 sm:$0xff]   ;;  %v4403_v48 = vpack.c.bf16 %v8824_v55, %v8824_v55 }
 0x359   : > { %3516 = vmatprep.subr.bf16.mxu1 %v7624_v8  ;;  %v3029_v8 = vpack.c.bf16 %v8748_v4, %v8748_v4  ;;  %v7823_v4 = vld [vmem:[%s8625_s18 + $0x570] ss:$8 sps:$4 sm:$0xff]  }
 0x35c   : > { %3517 = vmatpush1.bf16.msra.mxu1 %v7622_v42  ;;  %v3028_v42 = vpack.c.bf16 %v8744_v31, %v8744_v31  ;;  %v7861_v31 = vld [vmem:[%s8625_s18 + $0x634] ss:$8 sps:$4 sm:$0xff]  }
 0x35d   : > { %3518 = vmatprep.subr.bf16.mxu1 %v7627_v15  ;;  %v7669_v15 = vld [vmem:[%s8625_s18 + $0x234] ss:$8 sps:$4 sm:$0xff]  }
 0x360   : > { %3519 = vmatpush1.bf16.msra.mxu1 %v7625_v22  ;;  %v7667_v22 = vld [vmem:[%s8625_s18 + $0x230] ss:$8 sps:$4 sm:$0xff]  }
 0x361   : > { %3520 = vmatprep.subr.bf16.mxu1 %v7630_v23  ;;  %v7672_v23 = vld [vmem:[%s8625_s18 + $0x244] ss:$8 sps:$4 sm:$0xff]  }
 0x364   : > { %3521 = vmatpush1.bf16.msra.mxu1 %v7628_v26  ;;  %v7670_v26 = vld [vmem:[%s8625_s18 + $0x240] ss:$8 sps:$4 sm:$0xff]  }
 0x365   : > { %3522 = vmatprep.subr.bf16.mxu1 %v7633_v27  ;;  %v7675_v27 = vld [vmem:[%s8625_s18 + $0x254] ss:$8 sps:$4 sm:$0xff]  }
 0x368   : > { %3523 = vmatpush1.bf16.msra.mxu1 %v7631_v28  ;;  %v7673_v28 = vld [vmem:[%s8625_s18 + $0x250] ss:$8 sps:$4 sm:$0xff]  }
 0x369   : > { %3524 = vmatprep.subr.bf16.mxu1 %v7636_v29  ;;  %v7678_v29 = vld [vmem:[%s8625_s18 + $0x264] ss:$8 sps:$4 sm:$0xff]  }
 0x36c   : > { %3525 = vmatpush1.bf16.msra.mxu1 %v7634_v30  ;;  %v7676_v30 = vld [vmem:[%s8625_s18 + $0x260] ss:$8 sps:$4 sm:$0xff]  }
 0x36d   : > { %3526 = vmatprep.subr.bf16.mxu1 %v7639_v34  ;;  %v7679_v34 = vld [vmem:[%s8625_s18 + $0x270] ss:$8 sps:$4 sm:$0xff]  }
 0x370   : > { %3527 = vmatpush1.bf16.msra.mxu1 %v7637_v36  ;;  %v7684_v36 = vld [vmem:[%s8625_s18 + $0x284] ss:$8 sps:$4 sm:$0xff]  }
 0x371   : > { %3528 = vmatprep.subr.bf16.mxu1 %v7642_v33  ;;  %v7682_v33 = vld [vmem:[%s8625_s18 + $0x280] ss:$8 sps:$4 sm:$0xff]  }
 0x374   : > { %3529 = vmatpush1.bf16.msra.mxu1 %v7640_v37  ;;  %v7687_v37 = vld [vmem:[%s8625_s18 + $0x294] ss:$8 sps:$4 sm:$0xff]  }
 0x375   : > { %3530 = vmatprep.subr.bf16.mxu1 %v7645_v47  ;;  %v7685_v47 = vld [vmem:[%s8625_s18 + $0x290] ss:$8 sps:$4 sm:$0xff]  }
 0x378   : > { %3531 = vmatpush1.bf16.msra.mxu1 %v7643_v49  ;;  %v7690_v49 = vld [vmem:[%s8625_s18 + $0x2a4] ss:$8 sps:$4 sm:$0xff]  }
 0x379   : > { %3532 = vmatprep.subr.bf16.mxu1 %v7648_v40  ;;  %v7688_v40 = vld [vmem:[%s8625_s18 + $0x2a0] ss:$8 sps:$4 sm:$0xff]  }
 0x37c   : > { %3533 = vmatpush1.bf16.msra.mxu1 %v7646_v39  ;;  %v7693_v39 = vld [vmem:[%s8625_s18 + $0x2b4] ss:$8 sps:$4 sm:$0xff]  }
 0x37d   : > { %3534 = vmatprep.subr.bf16.mxu1 %v7651_v51  ;;  %v7691_v51 = vld [vmem:[%s8625_s18 + $0x2b0] ss:$8 sps:$4 sm:$0xff]  }
 0x380   : > { %3535 = vmatpush1.bf16.msra.mxu1 %v7649_v52  ;;  %v7696_v52 = vld [vmem:[%s8625_s18 + $0x2c4] ss:$8 sps:$4 sm:$0xff]  }
 0x381   : > { %3536 = vmatprep.subr.bf16.mxu1 %v7654_v53  ;;  %v7694_v53 = vld [vmem:[%s8625_s18 + $0x2c0] ss:$8 sps:$4 sm:$0xff]  }
 0x384   : > { %3537 = vmatpush1.bf16.msra.mxu1 %v7652_v58  ;;  %v7699_v58 = vld [vmem:[%s8625_s18 + $0x2d4] ss:$8 sps:$4 sm:$0xff]  }
 0x385   : > { %3538 = vmatprep.subr.bf16.mxu1 %v7657_v59  ;;  %v7697_v59 = vld [vmem:[%s8625_s18 + $0x2d0] ss:$8 sps:$4 sm:$0xff]  }
 0x388   : > { %3539 = vmatpush1.bf16.msra.mxu1 %v7655_v60  ;;  %v7702_v60 = vld [vmem:[%s8625_s18 + $0x2e4] ss:$8 sps:$4 sm:$0xff]  }
 0x389   : > { %3774 = vmatprep.subr.bf16.mxu1 %v7660_v0  ;;  %v7700_v0 = vld [vmem:[%s8625_s18 + $0x2e0] ss:$8 sps:$4 sm:$0xff]  }
 0x38b   : > { %3541 = vmatmul.mubr.bf16.vlgmr.msra.gmra.mrb[0].mxu1 %v3026_v3  ;;  %v7708_v3 = vld [vmem:[%s8625_s18 + $0x304] ss:$8 sps:$4 sm:$0xff]  }
 0x38c   : > { %3550 = vmatprep.mubr.bf16.mxu1 %v3029_v8  ;;  %3775 = vmatpush1.bf16.msra.mxu1 %v7658_v2  ;;  %v7703_v2 = vld [vmem:[%s8625_s18 + $0x2f0] ss:$8 sps:$4 sm:$0xff]   ;;  %v7711_v8 = vld [vmem:[%s8625_s18 + $0x314] ss:$8 sps:$4 sm:$0xff]  }
 0x38d   : > { %3776 = vmatprep.subr.bf16.mxu1 %v7663_v5  ;;  %v7706_v5 = vld [vmem:[%s8625_s18 + $0x300] ss:$8 sps:$4 sm:$0xff]  }
 0x390   : > { %3777 = vmatpush1.bf16.msra.mxu1 %v7661_v11  ;;  %v7709_v11 = vld [vmem:[%s8625_s18 + $0x310] ss:$8 sps:$4 sm:$0xff]  }
 0x391   : > { %3778 = vmatprep.subr.bf16.mxu1 %v7666_v13  ;;  %v7714_v13 = vld [vmem:[%s8625_s18 + $0x324] ss:$8 sps:$4 sm:$0xff]  }
 0x393   : > { %3551 = vmatmul.mubr.bf16.gmra.mrb[8].mxu1 %v3028_v42  ;;  %v7717_v42 = vld [vmem:[%s8625_s18 + $0x334] ss:$8 sps:$4 sm:$0xff]  }
 0x394   : > { %3779 = vmatpush1.bf16.msra.mxu1 %v7664_v18  ;;  %3806 = vmatprep.mubr.bf16.mxu1 %v8782_v9  ;;  %v7681_v9 = vld [vmem:[%s8625_s18 + $0x274] ss:$8 sps:$4 sm:$0xff]   ;;  %v7712_v18 = vld [vmem:[%s8625_s18 + $0x320] ss:$8 sps:$4 sm:$0xff]  }
 0x395   : > { %3780 = vmatprep.subr.bf16.mxu1 %v7669_v15  ;;  %v7718_v15 = vld [vmem:[%s8625_s18 + $0x340] ss:$8 sps:$4 sm:$0xff]  }
 0x398   : > { %3781 = vmatpush1.bf16.msra.mxu1 %v7667_v22  ;;  %v7723_v22 = vld [vmem:[%s8625_s18 + $0x354] ss:$8 sps:$4 sm:$0xff]  }
 0x399   : > { %3782 = vmatprep.subr.bf16.mxu1 %v7672_v23  ;;  %v7721_v23 = vld [vmem:[%s8625_s18 + $0x350] ss:$8 sps:$4 sm:$0xff]  }
 0x39c   : > { %3783 = vmatpush1.bf16.msra.mxu1 %v7670_v26  ;;  %v7724_v26 = vld [vmem:[%s8625_s18 + $0x360] ss:$8 sps:$4 sm:$0xff]  }
 0x39d   : > { %3784 = vmatprep.subr.bf16.mxu1 %v7675_v27  ;;  %v7727_v27 = vld [vmem:[%s8625_s18 + $0x370] ss:$8 sps:$4 sm:$0xff]  }
 0x3a0   : > { %3785 = vmatpush1.bf16.msra.mxu1 %v7673_v28  ;;  %v7732_v28 = vld [vmem:[%s8625_s18 + $0x384] ss:$8 sps:$4 sm:$0xff]  }
 0x3a1   : > { %3786 = vmatprep.subr.bf16.mxu1 %v7678_v29  ;;  %v7730_v29 = vld [vmem:[%s8625_s18 + $0x380] ss:$8 sps:$4 sm:$0xff]  }
 0x3a4   : > { %3787 = vmatpush1.bf16.msra.mxu1 %v7676_v30  ;;  %v7735_v30 = vld [vmem:[%s8625_s18 + $0x394] ss:$8 sps:$4 sm:$0xff]  }
 0x3a5   : > { %3788 = vmatprep.subr.bf16.mxu1 %v7681_v9  ;;  %v7733_v9 = vld [vmem:[%s8625_s18 + $0x390] ss:$8 sps:$4 sm:$0xff]  }
 0x3a8   : > { %3789 = vmatpush1.bf16.msra.mxu1 %v7679_v34  ;;  %v7738_v34 = vld [vmem:[%s8625_s18 + $0x3a4] ss:$8 sps:$4 sm:$0xff]  }
 0x3a9   : > { %3790 = vmatprep.subr.bf16.mxu1 %v7684_v36  ;;  %v7736_v36 = vld [vmem:[%s8625_s18 + $0x3a0] ss:$8 sps:$4 sm:$0xff]  }
 0x3ac   : > { %3791 = vmatpush1.bf16.msra.mxu1 %v7682_v33  ;;  %v7741_v33 = vld [vmem:[%s8625_s18 + $0x3b4] ss:$8 sps:$4 sm:$0xff]  }
 0x3ad   : > { %3792 = vmatprep.subr.bf16.mxu1 %v7687_v37  ;;  %v7739_v37 = vld [vmem:[%s8625_s18 + $0x3b0] ss:$8 sps:$4 sm:$0xff]  }
 0x3b0   : > { %3793 = vmatpush1.bf16.msra.mxu1 %v7685_v47  ;;  %v7744_v47 = vld [vmem:[%s8625_s18 + $0x3c4] ss:$8 sps:$4 sm:$0xff]  }
 0x3b1   : > { %3794 = vmatprep.subr.bf16.mxu1 %v7690_v49  ;;  %v7742_v49 = vld [vmem:[%s8625_s18 + $0x3c0] ss:$8 sps:$4 sm:$0xff]  }
 0x3b4   : > { %3795 = vmatpush1.bf16.msra.mxu1 %v7688_v40  ;;  %v7747_v40 = vld [vmem:[%s8625_s18 + $0x3d4] ss:$8 sps:$4 sm:$0xff]  }
 0x3b5   : > { %3796 = vmatprep.subr.bf16.mxu1 %v7693_v39  ;;  %v7745_v39 = vld [vmem:[%s8625_s18 + $0x3d0] ss:$8 sps:$4 sm:$0xff]  }
 0x3b8   : > { %3797 = vmatpush1.bf16.msra.mxu1 %v7691_v51  ;;  %v7750_v51 = vld [vmem:[%s8625_s18 + $0x3e4] ss:$8 sps:$4 sm:$0xff]  }
 0x3b9   : > { %3798 = vmatprep.subr.bf16.mxu1 %v7696_v52  ;;  %v7748_v52 = vld [vmem:[%s8625_s18 + $0x3e0] ss:$8 sps:$4 sm:$0xff]  }
 0x3bc   : > { %3799 = vmatpush1.bf16.msra.mxu1 %v7694_v53  ;;  %v7753_v53 = vld [vmem:[%s8625_s18 + $0x3f4] ss:$8 sps:$4 sm:$0xff]  }
 0x3bd   : > { %3800 = vmatprep.subr.bf16.mxu1 %v7699_v58  ;;  %v7751_v58 = vld [vmem:[%s8625_s18 + $0x3f0] ss:$8 sps:$4 sm:$0xff]  }
 0x3c0   : > { %3801 = vmatpush1.bf16.msra.mxu1 %v7697_v59  ;;  %v7756_v59 = vld [vmem:[%s8625_s18 + $0x404] ss:$8 sps:$4 sm:$0xff]  }
 0x3c1   : > { %3802 = vmatprep.subr.bf16.mxu1 %v7702_v60  ;;  %v7754_v60 = vld [vmem:[%s8625_s18 + $0x400] ss:$8 sps:$4 sm:$0xff]  }
 0x3c4   : > { %3803 = vmatpush1.bf16.msra.mxu1 %v7700_v0  ;;  %v7759_v0 = vld [vmem:[%s8625_s18 + $0x414] ss:$8 sps:$4 sm:$0xff]  }
 0x3c5   : > { %3804 = vmatprep.subr.bf16.mxu1 %v7705_v54  ;;  %v7757_v54 = vld [vmem:[%s8625_s18 + $0x410] ss:$8 sps:$4 sm:$0xff]  }
 0x3c8   : > { %3805 = vmatpush1.bf16.msra.mxu1 %v7703_v2  ;;  %v7762_v2 = vld [vmem:[%s8625_s18 + $0x424] ss:$8 sps:$4 sm:$0xff]  }
 0x3c9   : > { %4046 = vmatprep.subr.bf16.mxu1 %v7708_v3  ;;  %v7760_v3 = vld [vmem:[%s8625_s18 + $0x420] ss:$8 sps:$4 sm:$0xff]  }
 0x3cb   : > { %3807 = vmatmul.mubr.bf16.vlgmr.msra.gmra.mrb[0].mxu1 %v8786_v10  ;;  %v7720_v10 = vld [vmem:[%s8625_s18 + $0x344] ss:$8 sps:$4 sm:$0xff]  }
 0x3cc   : > { %3816 = vmatprep.mubr.bf16.mxu1 %v8771_v62  ;;  %4047 = vmatpush1.bf16.msra.mxu1 %v7706_v5  ;;  %v7715_v62 = vld [vmem:[%s8625_s18 + $0x330] ss:$8 sps:$4 sm:$0xff]   ;;  %v7765_v5 = vld [vmem:[%s8625_s18 + $0x434] ss:$8 sps:$4 sm:$0xff]  }
 0x3cd   : > { %4048 = vmatprep.subr.bf16.mxu1 %v7711_v8  ;;  %v7766_v8 = vld [vmem:[%s8625_s18 + $0x440] ss:$8 sps:$4 sm:$0xff]  }
 0x3d0   : > { %4049 = vmatpush1.bf16.msra.mxu1 %v7709_v11  ;;  %v7771_v11 = vld [vmem:[%s8625_s18 + $0x454] ss:$8 sps:$4 sm:$0xff]  }
 0x3d1   : > { %4050 = vmatprep.subr.bf16.mxu1 %v7714_v13  ;;  %v7769_v13 = vld [vmem:[%s8625_s18 + $0x450] ss:$8 sps:$4 sm:$0xff]  }
 0x3d3   : > { %3817 = vmatmul.mubr.bf16.gmra.mrb[12].mxu1 %v8773_v1  ;;  %v7726_v1 = vld [vmem:[%s8625_s18 + $0x364] ss:$8 sps:$4 sm:$0xff]  }
 0x3d4   : > { %4051 = vmatpush1.bf16.msra.mxu1 %v7712_v18  ;;  %4078 = vmatprep.mubr.bf16.mxu1 %v8792_v16  ;;  %v7729_v16 = vld [vmem:[%s8625_s18 + $0x374] ss:$8 sps:$4 sm:$0xff]   ;;  %v7774_v18 = vld [vmem:[%s8625_s18 + $0x464] ss:$8 sps:$4 sm:$0xff]  }
 0x3d5   : > { %4052 = vmatprep.subr.bf16.mxu1 %v7717_v42  ;;  %v7775_v42 = vld [vmem:[%s8625_s18 + $0x470] ss:$8 sps:$4 sm:$0xff]  }
 0x3d8   : > { %4053 = vmatpush1.bf16.msra.mxu1 %v7715_v62  ;;  %v7780_v62 = vld [vmem:[%s8625_s18 + $0x484] ss:$8 sps:$4 sm:$0xff]  }
 0x3d9   : > { %4054 = vmatprep.subr.bf16.mxu1 %v7720_v10 }
 0x3dc   : > { %4055 = vmatpush1.bf16.msra.mxu1 %v7718_v15 }
 0x3dd   : > { %4056 = vmatprep.subr.bf16.mxu1 %v7723_v22 }
 0x3e0   : > { %4057 = vmatpush1.bf16.msra.mxu1 %v7721_v23  ;;  %v7778_v23 = vld [vmem:[%s8625_s18 + $0x480] ss:$8 sps:$4 sm:$0xff]  }
 0x3e1   : > { %4058 = vmatprep.subr.bf16.mxu1 %v7726_v1 }
 0x3e4   : > { %4059 = vmatpush1.bf16.msra.mxu1 %v7724_v26  ;;  %v7783_v26 = vld [vmem:[%s8625_s18 + $0x494] ss:$8 sps:$4 sm:$0xff]  }
 0x3e5   : > { %4060 = vmatprep.subr.bf16.mxu1 %v7729_v16  ;;  %v7781_v16 = vld [vmem:[%s8625_s18 + $0x490] ss:$8 sps:$4 sm:$0xff]  }
 0x3e8   : > { %4061 = vmatpush1.bf16.msra.mxu1 %v7727_v27  ;;  %v7786_v27 = vld [vmem:[%s8625_s18 + $0x4a4] ss:$8 sps:$4 sm:$0xff]  }
 0x3e9   : > { %4062 = vmatprep.subr.bf16.mxu1 %v7732_v28  ;;  %v7784_v28 = vld [vmem:[%s8625_s18 + $0x4a0] ss:$8 sps:$4 sm:$0xff]  }
 0x3ec   : > { %4063 = vmatpush1.bf16.msra.mxu1 %v7730_v29  ;;  %v7789_v29 = vld [vmem:[%s8625_s18 + $0x4b4] ss:$8 sps:$4 sm:$0xff]  }
 0x3ed   : > { %4064 = vmatprep.subr.bf16.mxu1 %v7735_v30  ;;  %v7787_v30 = vld [vmem:[%s8625_s18 + $0x4b0] ss:$8 sps:$4 sm:$0xff]  }
 0x3f0   : > { %4065 = vmatpush1.bf16.msra.mxu1 %v7733_v9  ;;  %v7792_v9 = vld [vmem:[%s8625_s18 + $0x4c4] ss:$8 sps:$4 sm:$0xff]  }
 0x3f1   : > { %4066 = vmatprep.subr.bf16.mxu1 %v7738_v34  ;;  %v7790_v34 = vld [vmem:[%s8625_s18 + $0x4c0] ss:$8 sps:$4 sm:$0xff]  }
 0x3f4   : > { %4067 = vmatpush1.bf16.msra.mxu1 %v7736_v36  ;;  %v7795_v36 = vld [vmem:[%s8625_s18 + $0x4d4] ss:$8 sps:$4 sm:$0xff]  }
 0x3f5   : > { %4068 = vmatprep.subr.bf16.mxu1 %v7741_v33  ;;  %v7793_v33 = vld [vmem:[%s8625_s18 + $0x4d0] ss:$8 sps:$4 sm:$0xff]  }
 0x3f8   : > { %4069 = vmatpush1.bf16.msra.mxu1 %v7739_v37  ;;  %v7798_v37 = vld [vmem:[%s8625_s18 + $0x4e4] ss:$8 sps:$4 sm:$0xff]  }
 0x3f9   : > { %4070 = vmatprep.subr.bf16.mxu1 %v7744_v47  ;;  %v7796_v47 = vld [vmem:[%s8625_s18 + $0x4e0] ss:$8 sps:$4 sm:$0xff]  }
 0x3fc   : > { %4071 = vmatpush1.bf16.msra.mxu1 %v7742_v49  ;;  %v7801_v49 = vld [vmem:[%s8625_s18 + $0x4f4] ss:$8 sps:$4 sm:$0xff]  }
 0x3fd   : > { %4072 = vmatprep.subr.bf16.mxu1 %v7747_v40  ;;  %v7799_v40 = vld [vmem:[%s8625_s18 + $0x4f0] ss:$8 sps:$4 sm:$0xff]  }
 0x400   : > { %4073 = vmatpush1.bf16.msra.mxu1 %v7745_v39  ;;  %v7804_v39 = vld [vmem:[%s8625_s18 + $0x504] ss:$8 sps:$4 sm:$0xff]  }
 0x401   : > { %4074 = vmatprep.subr.bf16.mxu1 %v7750_v51  ;;  %v7802_v51 = vld [vmem:[%s8625_s18 + $0x500] ss:$8 sps:$4 sm:$0xff]  }
 0x404   : > { %4075 = vmatpush1.bf16.msra.mxu1 %v7748_v52  ;;  %v7807_v52 = vld [vmem:[%s8625_s18 + $0x514] ss:$8 sps:$4 sm:$0xff]  }
 0x405   : > { %4076 = vmatprep.subr.bf16.mxu1 %v7753_v53  ;;  %v7805_v53 = vld [vmem:[%s8625_s18 + $0x510] ss:$8 sps:$4 sm:$0xff]  }
 0x408   : > { %4077 = vmatpush1.bf16.msra.mxu1 %v7751_v58  ;;  %v7810_v58 = vld [vmem:[%s8625_s18 + $0x524] ss:$8 sps:$4 sm:$0xff]  }
 0x409   : > { %4342 = vmatprep.subr.bf16.mxu1 %v7756_v59  ;;  %v7808_v59 = vld [vmem:[%s8625_s18 + $0x520] ss:$8 sps:$4 sm:$0xff]  }
 0x40b   : > { %4079 = vmatmul.mubr.bf16.vlgmr.msra.gmra.mrb[0].mxu1 %v8796_v17  ;;  %v7768_v17 = vld [vmem:[%s8625_s18 + $0x444] ss:$8 sps:$4 sm:$0xff]  }
 0x40c   : > { %4088 = vmatprep.mubr.bf16.mxu1 %v8776_v6  ;;  %4343 = vmatpush1.bf16.msra.mxu1 %v7754_v60  ;;  %v7763_v6 = vld [vmem:[%s8625_s18 + $0x430] ss:$8 sps:$4 sm:$0xff]   ;;  %v7813_v60 = vld [vmem:[%s8625_s18 + $0x534] ss:$8 sps:$4 sm:$0xff]  }
 0x40d   : > { %4344 = vmatprep.subr.bf16.mxu1 %v7759_v0  ;;  %v7814_v0 = vld [vmem:[%s8625_s18 + $0x540] ss:$8 sps:$4 sm:$0xff]  }
 0x410   : > { %4345 = vmatpush1.bf16.msra.mxu1 %v7757_v54  ;;  %v7819_v54 = vld [vmem:[%s8625_s18 + $0x554] ss:$8 sps:$4 sm:$0xff]  }
 0x411   : > { %4346 = vmatprep.subr.bf16.mxu1 %v7762_v2  ;;  %v7817_v2 = vld [vmem:[%s8625_s18 + $0x550] ss:$8 sps:$4 sm:$0xff]  }
 0x413   : > { %4089 = vmatmul.mubr.bf16.gmra.mrb[16].mxu1 %v8778_v7  ;;  %v7772_v7 = vld [vmem:[%s8625_s18 + $0x460] ss:$8 sps:$4 sm:$0xff]  }
 0x414   : > { %4347 = vmatpush1.bf16.msra.mxu1 %v7760_v3  ;;  %4374 = vmatprep.mubr.bf16.mxu1 %v8810_v44  ;;  %v7777_v44 = vld [vmem:[%s8625_s18 + $0x474] ss:$8 sps:$4 sm:$0xff]   ;;  %v7820_v3 = vld [vmem:[%s8625_s18 + $0x560] ss:$8 sps:$4 sm:$0xff]  }
 0x415   : > { %4348 = vmatprep.subr.bf16.mxu1 %v7765_v5 }
 0x418   : > { %4349 = vmatpush1.bf16.msra.mxu1 %v7763_v6 }
 0x419   : > { %4350 = vmatprep.subr.bf16.mxu1 %v7768_v17 }
 0x41c   : > { %4351 = vmatpush1.bf16.msra.mxu1 %v7766_v8 }
 0x41d   : > { %4352 = vmatprep.subr.bf16.mxu1 %v7771_v11 }
 0x420   : > { %4353 = vmatpush1.bf16.msra.mxu1 %v7769_v13  ;;  %v7826_v13 = vld [vmem:[%s8625_s18 + $0x580] ss:$8 sps:$4 sm:$0xff]  }
 0x421   : > { %4354 = vmatprep.subr.bf16.mxu1 %v7774_v18 }
 0x424   : > { %4355 = vmatpush1.bf16.msra.mxu1 %v7772_v7  ;;  %v7831_v7 = vld [vmem:[%s8625_s18 + $0x594] ss:$8 sps:$4 sm:$0xff]  }
 0x425   : > { %4356 = vmatprep.subr.bf16.mxu1 %v7777_v44  ;;  %v7829_v44 = vld [vmem:[%s8625_s18 + $0x590] ss:$8 sps:$4 sm:$0xff]  }
 0x426   : > { %v8962_v10 = vpop.f32.mrb[4].mxu1 }
 0x427   : > { %v8964_v15 = vpop.f32.mrb[5].mxu1 }
 0x428   : > { %4357 = vmatpush1.bf16.msra.mxu1 %v7775_v42  ;;  %v3345_v22 = vpop.f32.mrb[6].mxu1  ;;  %v7834_v42 = vld [vmem:[%s8625_s18 + $0x5a4] ss:$8 sps:$4 sm:$0xff]  }
 0x429   : > { %v3346_v1 = vpop.f32.mrb[7].mxu1  ;;  %4358 = vmatprep.subr.bf16.mxu1 %v7780_v62  ;;  %v7832_v62 = vld [vmem:[%s8625_s18 + $0x5a0] ss:$8 sps:$4 sm:$0xff]   ;;  %v7840_v22 = vld [vmem:[%s8625_s18 + $0x5c4] ss:$8 sps:$4 sm:$0xff]  }
 0x42a   : > { %v7843_v1 = vld [vmem:[%s8625_s18 + $0x5d4] ss:$8 sps:$4 sm:$0xff]  }
 0x42c   : > { %4359 = vmatpush1.bf16.msra.mxu1 %v7778_v23  ;;  %v7838_v23 = vld [vmem:[%s8625_s18 + $0x5c0] ss:$8 sps:$4 sm:$0xff]  }
 0x42d   : > { %4360 = vmatprep.subr.bf16.mxu1 %v7783_v26  ;;  %v7841_v26 = vld [vmem:[%s8625_s18 + $0x5d0] ss:$8 sps:$4 sm:$0xff]  }
 0x430   : > { %4361 = vmatpush1.bf16.msra.mxu1 %v7781_v16  ;;  %v7846_v16 = vld [vmem:[%s8625_s18 + $0x5e4] ss:$8 sps:$4 sm:$0xff]  }
 0x431   : > { %4362 = vmatprep.subr.bf16.mxu1 %v7786_v27  ;;  %v7844_v27 = vld [vmem:[%s8625_s18 + $0x5e0] ss:$8 sps:$4 sm:$0xff]  }
 0x434   : > { %4363 = vmatpush1.bf16.msra.mxu1 %v7784_v28  ;;  %v7849_v28 = vld [vmem:[%s8625_s18 + $0x5f4] ss:$8 sps:$4 sm:$0xff]  }
 0x435   : > { %4364 = vmatprep.subr.bf16.mxu1 %v7789_v29  ;;  %v7847_v29 = vld [vmem:[%s8625_s18 + $0x5f0] ss:$8 sps:$4 sm:$0xff]  }
 0x438   : > { %4365 = vmatpush1.bf16.msra.mxu1 %v7787_v30  ;;  %v7852_v30 = vld [vmem:[%s8625_s18 + $0x604] ss:$8 sps:$4 sm:$0xff]  }
 0x439   : > { %4366 = vmatprep.subr.bf16.mxu1 %v7792_v9  ;;  %v7850_v9 = vld [vmem:[%s8625_s18 + $0x600] ss:$8 sps:$4 sm:$0xff]  }
 0x43c   : > { %4367 = vmatpush1.bf16.msra.mxu1 %v7790_v34  ;;  %v4662_v34 = vld [vmem:[#allocation2 + $0x48] sm:$0xf] }
 0x43d   : > { %4368 = vmatprep.subr.bf16.mxu1 %v7795_v36  ;;  %v7855_v36 = vld [vmem:[%s8625_s18 + $0x614] ss:$8 sps:$4 sm:$0xff]  }
 0x440   : > { %4369 = vmatpush1.bf16.msra.mxu1 %v7793_v33  ;;  %v4404_v33 = vpack.c.bf16 %v8812_v46, %v8812_v46 }
 0x441   : > { %4370 = vmatprep.subr.bf16.mxu1 %v7798_v37  ;;  %v4656_v37 = vld [vmem:[#allocation2 + $0x18] sm:$0xf0] }
 0x444   : > { %4371 = vmatpush1.bf16.msra.mxu1 %v7796_v47  ;;  %v4664_v47 = vpack.c.bf16 %v8814_v50, %v4656_v37  ;;  %v7900_v37 = vld [vmem:[%s8625_s18 + $0x704] ss:$8 sps:$4 sm:$0xff]  }
 0x445   : > { %4372 = vmatprep.subr.bf16.mxu1 %v7801_v49  ;;  %v4666_v49 = vpack.c.bf16 %v4662_v34, %v8812_v46 }
 0x448   : > { %4373 = vmatpush1.bf16.msra.mxu1 %v7799_v40  ;;  %v7853_v40 = vld [vmem:[%s8625_s18 + $0x610] ss:$8 sps:$4 sm:$0xff]  }
 0x449   : > { %4598 = vmatprep.subr.bf16.mxu1 %v7804_v39  ;;  %v7858_v39 = vld [vmem:[%s8625_s18 + $0x624] ss:$8 sps:$4 sm:$0xff]  }
 0x44b   : > { %4375 = vmatmul.mubr.bf16.vlgmr.msra.gmra.mrb[0].mxu1 %v8819_v41  ;;  %v7816_v41 = vld [vmem:[%s8625_s18 + $0x544] ss:$8 sps:$4 sm:$0xff]  }
 0x44c   : > { %4384 = vmatprep.mubr.bf16.mxu1 %v8802_v38  ;;  %4599 = vmatpush1.bf16.msra.mxu1 %v7802_v51  ;;  %v7811_v38 = vld [vmem:[%s8625_s18 + $0x530] ss:$8 sps:$4 sm:$0xff]   ;;  %v4707_v51 = vrot.slane %v4664_v47, 2 }
 0x44d   : > { %4600 = vmatprep.subr.bf16.mxu1 %v7807_v52  ;;  %v9037_v52 = vrot.slane %v4666_v49, 2 }
 0x450   : > { %4601 = vmatpush1.bf16.msra.mxu1 %v7805_v53  ;;  %v7856_v53 = vld [vmem:[%s8625_s18 + $0x620] ss:$8 sps:$4 sm:$0xff]  }
 0x451   : > { %4602 = vmatprep.subr.bf16.mxu1 %v7810_v58  ;;  %v7859_v58 = vld [vmem:[%s8625_s18 + $0x630] ss:$8 sps:$4 sm:$0xff]  }
 0x453   : > { %4385 = vmatmul.mubr.bf16.gmra.mrb[20].mxu1 %v8806_v43  ;;  %v7822_v43 = vld [vmem:[%s8625_s18 + $0x564] ss:$8 sps:$4 sm:$0xff]  }
 0x454   : > { %4603 = vmatpush1.bf16.msra.mxu1 %v7808_v59  ;;  %4630 = vmatprep.mubr.bf16.mxu1 %v4402_v25  ;;  %v7828_v25 = vld [vmem:[%s8625_s18 + $0x584] ss:$8 sps:$4 sm:$0xff]  }
 0x455   : > { %4604 = vmatprep.subr.bf16.mxu1 %v7813_v60  ;;  %v7864_v59 = vld [vmem:[%s8625_s18 + $0x644] ss:$8 sps:$4 sm:$0xff]   ;;  %v7862_v60 = vld [vmem:[%s8625_s18 + $0x640] ss:$8 sps:$4 sm:$0xff]  }
 0x458   : > { %4605 = vmatpush1.bf16.msra.mxu1 %v7811_v38  ;;  %v7867_v38 = vld [vmem:[%s8625_s18 + $0x654] ss:$8 sps:$4 sm:$0xff]  }
 0x459   : > { %4606 = vmatprep.subr.bf16.mxu1 %v7816_v41  ;;  %v7865_v41 = vld [vmem:[%s8625_s18 + $0x650] ss:$8 sps:$4 sm:$0xff]  }
 0x45c   : > { %4607 = vmatpush1.bf16.msra.mxu1 %v7814_v0  ;;  %v7870_v0 = vld [vmem:[%s8625_s18 + $0x664] ss:$8 sps:$4 sm:$0xff]  }
 0x45d   : > { %4608 = vmatprep.subr.bf16.mxu1 %v7819_v54  ;;  %v7868_v54 = vld [vmem:[%s8625_s18 + $0x660] ss:$8 sps:$4 sm:$0xff]  }
 0x460   : > { %4609 = vmatpush1.bf16.msra.mxu1 %v7817_v2  ;;  %v7873_v2 = vld [vmem:[%s8625_s18 + $0x674] ss:$8 sps:$4 sm:$0xff]  }
 0x461   : > { %4610 = vmatprep.subr.bf16.mxu1 %v7822_v43  ;;  %v7871_v43 = vld [vmem:[%s8625_s18 + $0x670] ss:$8 sps:$4 sm:$0xff]  }
 0x464   : > { %4611 = vmatpush1.bf16.msra.mxu1 %v7820_v3  ;;  %v7876_v3 = vld [vmem:[%s8625_s18 + $0x684] ss:$8 sps:$4 sm:$0xff]  }
 0x465   : > { %4612 = vmatprep.subr.bf16.mxu1 %v7825_v56 }
 0x466   : > { %v3552_v5 = vpop.f32.mrb[8].mxu1 }
 0x467   : > { %v9005_v6 = vadd.f32 %v3552_v5, %v8962_v10  ;;  %v3554_v17 = vpop.f32.mrb[9].mxu1  ;;  %v7837_v10 = vld [vmem:[%s8625_s18 + $0x5b4] ss:$8 sps:$4 sm:$0xff]  }
 0x468   : > { %v9008_v8 = vadd.f32 %v3554_v17, %v8964_v15  ;;  %v3556_v11 = vpop.f32.mrb[10].mxu1  ;;  %4613 = vmatpush1.bf16.msra.mxu1 %v7823_v4  ;;  %v7835_v15 = vld [vmem:[%s8625_s18 + $0x5b0] ss:$8 sps:$4 sm:$0xff]  }
 0x469   : > { %v3557_v18 = vpop.f32.mrb[11].mxu1  ;;  %4614 = vmatprep.subr.bf16.mxu1 %v7828_v25  ;;  %v7874_v11 = vld [vmem:[%s8625_s18 + $0x680] ss:$8 sps:$4 sm:$0xff]  }
 0x46a   : > { %v7879_v18 = vld [vmem:[%s8625_s18 + $0x694] ss:$8 sps:$4 sm:$0xff]  }
 0x46c   : > { %4615 = vmatpush1.bf16.msra.mxu1 %v7826_v13 }
 0x46d   : > { %4616 = vmatprep.subr.bf16.mxu1 %v7831_v7  ;;  %v7877_v7 = vld [vmem:[%s8625_s18 + $0x690] ss:$8 sps:$4 sm:$0xff]  }
 0x470   : > { %4617 = vmatpush1.bf16.msra.mxu1 %v7829_v44  ;;  %v7880_v44 = vld [vmem:[%s8625_s18 + $0x6a0] ss:$8 sps:$4 sm:$0xff]  }
 0x471   : > { %4618 = vmatprep.subr.bf16.mxu1 %v7834_v42  ;;  %v7883_v42 = vld [vmem:[%s8625_s18 + $0x6b0] ss:$8 sps:$4 sm:$0xff]  }
 0x474   : > { %4619 = vmatpush1.bf16.msra.mxu1 %v7832_v62  ;;  %v7888_v62 = vld [vmem:[%s8625_s18 + $0x6c4] ss:$8 sps:$4 sm:$0xff]  }
 0x475   : > { %4620 = vmatprep.subr.bf16.mxu1 %v7837_v10  ;;  %v7886_v10 = vld [vmem:[%s8625_s18 + $0x6c0] ss:$8 sps:$4 sm:$0xff]  }
 0x478   : > { %4621 = vmatpush1.bf16.msra.mxu1 %v7835_v15  ;;  %v7891_v15 = vld [vmem:[%s8625_s18 + $0x6d4] ss:$8 sps:$4 sm:$0xff]  }
 0x479   : > { %4622 = vmatprep.subr.bf16.mxu1 %v7840_v22  ;;  %v7889_v22 = vld [vmem:[%s8625_s18 + $0x6d0] ss:$8 sps:$4 sm:$0xff]  }
 0x47c   : > { %4623 = vmatpush1.bf16.msra.mxu1 %v7838_v23  ;;  %v7894_v23 = vld [vmem:[%s8625_s18 + $0x6e4] ss:$8 sps:$4 sm:$0xff]  }
 0x47d   : > { %4624 = vmatprep.subr.bf16.mxu1 %v7843_v1  ;;  %v4661_v1 = vld [vmem:[#allocation2 + $0x40] sm:$0xf] }
 0x480   : > { %4625 = vmatpush1.bf16.msra.mxu1 %v7841_v26  ;;  %v7892_v26 = vld [vmem:[%s8625_s18 + $0x6e0] ss:$8 sps:$4 sm:$0xff]  }
 0x481   : > { %4626 = vmatprep.subr.bf16.mxu1 %v7846_v16  ;;  %v4934_v16 = vld [vmem:[#allocation2 + $0x48] sm:$0x1f] }
 0x484   : > { %4627 = vmatpush1.bf16.msra.mxu1 %v7844_v27  ;;  %v7897_v27 = vld [vmem:[%s8625_s18 + $0x6f4] ss:$8 sps:$4 sm:$0xff]  }
 0x485   : > { %4628 = vmatprep.subr.bf16.mxu1 %v7849_v28  ;;  %v4655_v28 = vld [vmem:[#allocation2 + $0x10] sm:$0xf0] }
 0x488   : > { %4629 = vmatpush1.bf16.msra.mxu1 %v7847_v29  ;;  %v4663_v29 = vpack.c.bf16 %v8821_v57, %v4655_v28  ;;  %v7939_v28 = vld [vmem:[%s8625_s18 + $0x7d4] ss:$8 sps:$4 sm:$0xff]  }
 0x489   : > { %4874 = vmatprep.subr.bf16.mxu1 %v7852_v30  ;;  %v4665_v30 = vpack.c.bf16 %v4661_v1, %v8824_v55  ;;  %v7898_v55 = vld [vmem:[%s8625_s18 + $0x700] ss:$8 sps:$4 sm:$0xff]   ;;  %v7933_v1 = vld [vmem:[%s8625_s18 + $0x7b4] ss:$8 sps:$4 sm:$0xff]  }
 0x48a   : > { %v4704_v47 = vrot.slane %v4663_v29, 2  ;;  %v4931_v29 = vld [vmem:[#allocation2 + $0x10] sm:$0xe0] }
 0x48b   : > { %4631 = vmatmul.mubr.bf16.vlgmr.msra.gmra.mrb[0].mxu1 %v4401_v35  ;;  %v4709_v35 = vsel %vm2154_vm4, %v4707_v51, %v9037_v52  ;;  %v4705_v49 = vrot.slane %v4665_v30, 2  ;;  %v7996_v30 = vld [vmem:[#allocation2 + $0x20] sm:$0xff] }
 0x48c   : > { %4640 = vmatprep.mubr.bf16.mxu1 %v4404_v33  ;;  %4875 = vmatpush1.bf16.msra.mxu1 %v7850_v9  ;;  %v4932_v9 = vld [vmem:[#allocation2 + $0x18] sm:$0xe0]  ;;  %v7895_v33 = vld [vmem:[%s8625_s18 + $0x6f0] ss:$8 sps:$4 sm:$0xff]  }
 0x48d   : > { %4876 = vmatprep.subr.bf16.mxu1 %v7855_v36  ;;  %v4936_v34 = vpack.c.bf16 %v8814_v50, %v4932_v9  ;;  %v4938_v36 = vpack.c.bf16 %v4934_v16, %v8812_v46  ;;  %v4706_v50 = vsel %vm2154_vm4, %v4704_v47, %v4705_v49  ;;  %v4933_v16 = vld [vmem:[#allocation2 + $0x40] sm:$0x1f]  ;;  %v4935_v9 = vpack.c.bf16 %v7996_v30, %v4931_v29 }
 0x48e   : > { %v7990_v29 = vld [vmem:[%s8625_s18 + $0x8e4] ss:$8 sps:$4 sm:$0xff]   ;;  %v7988_v30 = vld [vmem:[%s8625_s18 + $0x8e0] ss:$8 sps:$4 sm:$0xff]  }
 0x48f   : > { %v4998_v51 = vshrl.u32 %v4938_v36, 16  ;;  %v5001_v57 = vshll.u32 %v4938_v36, 16  ;;  %v4973_v47 = vshrl.u32 %v4935_v9, 16 }
 0x490   : > { %4877 = vmatpush1.bf16.msra.mxu1 %v7853_v40  ;;  %v4990_v40 = vshrl.u32 %v4936_v34, 16 }
 0x491   : > { %4878 = vmatprep.subr.bf16.mxu1 %v7858_v39  ;;  %v4993_v39 = vshll.u32 %v4936_v34, 16  ;;  %v7997_v34 = vld [vmem:[#allocation2 + $0x30] sm:$0xff] }
 0x492   : > { %v4992_v46 = vrot.slane %v4990_v40, 2  ;;  %v4937_v36 = vpack.c.bf16 %v4933_v16, %v7997_v34  ;;  %v7982_v16 = vld [vmem:[%s8625_s18 + $0x8c0] ss:$8 sps:$4 sm:$0xff]   ;;  %v7991_v34 = vld [vmem:[%s8625_s18 + $0x8f0] ss:$8 sps:$4 sm:$0xff]  }
 0x493   : > { %4641 = vmatmul.mubr.bf16.gmra.mrb[24].mxu1 %v4403_v48  ;;  %v4995_v48 = vrot.slane %v4993_v39, 3 }
 0x494   : > { %4879 = vmatpush1.bf16.msra.mxu1 %v7856_v53  ;;  %4906 = vmatprep.mubr.bf16.mxu1 %v4709_v35  ;;  %v7903_v53 = vld [vmem:[%s8625_s18 + $0x714] ss:$8 sps:$4 sm:$0xff]   ;;  %v5003_v35 = vrot.slane %v5001_v57, 3  ;;  %v4981_v40 = vshrl.u32 %v4937_v36, 16  ;;  %v4984_v39 = vshll.u32 %v4937_v36, 16 }
 0x495   : > { %4880 = vmatprep.subr.bf16.mxu1 %v7861_v31  ;;  %v5000_v31 = vrot.slane %v4998_v51, 2  ;;  %v7940_v51 = vld [vmem:[%s8625_s18 + $0x7e0] ss:$8 sps:$4 sm:$0xff]   ;;  %v7945_v57 = vld [vmem:[%s8625_s18 + $0x7f4] ss:$8 sps:$4 sm:$0xff]  }
 0x498   : > { %4881 = vmatpush1.bf16.msra.mxu1 %v7859_v58  ;;  %v7901_v58 = vld [vmem:[%s8625_s18 + $0x710] ss:$8 sps:$4 sm:$0xff]  }
 0x499   : > { %4882 = vmatprep.subr.bf16.mxu1 %v7864_v59  ;;  %v7906_v59 = vld [vmem:[%s8625_s18 + $0x724] ss:$8 sps:$4 sm:$0xff]  }
 0x49c   : > { %4883 = vmatpush1.bf16.msra.mxu1 %v7862_v60  ;;  %v4996_v60 = vor.u32 %v4995_v48, %v4992_v46  ;;  %v4986_v46 = vrot.slane %v4984_v39, 3  ;;  %v7943_v48 = vld [vmem:[%s8625_s18 + $0x7f0] ss:$8 sps:$4 sm:$0xff]  }
 0x49d   : > { %4884 = vmatprep.subr.bf16.mxu1 %v7867_v38  ;;  %v9087_v38 = vor.u32 %v5003_v35, %v5000_v31  ;;  %v7948_v31 = vld [vmem:[%s8625_s18 + $0x804] ss:$8 sps:$4 sm:$0xff]  }
 0x4a0   : > { %4885 = vmatpush1.bf16.msra.mxu1 %v7865_v41  ;;  %v7904_v41 = vld [vmem:[%s8625_s18 + $0x720] ss:$8 sps:$4 sm:$0xff]  }
 0x4a1   : > { %4886 = vmatprep.subr.bf16.mxu1 %v7870_v0  ;;  %v7909_v0 = vld [vmem:[%s8625_s18 + $0x734] ss:$8 sps:$4 sm:$0xff]  }
 0x4a4   : > { %4887 = vmatpush1.bf16.msra.mxu1 %v7868_v54  ;;  %v7907_v54 = vld [vmem:[%s8625_s18 + $0x730] ss:$8 sps:$4 sm:$0xff]  }
 0x4a5   : > { %4888 = vmatprep.subr.bf16.mxu1 %v7873_v2  ;;  %v7912_v2 = vld [vmem:[%s8625_s18 + $0x744] ss:$8 sps:$4 sm:$0xff]  }
 0x4a6   : > { %v3818_v56 = vpop.f32.mrb[12].mxu1 }
 0x4a7   : > { %v9056_v4 = vadd.f32 %v3818_v56, %v9005_v6  ;;  %v3820_v25 = vpop.f32.mrb[13].mxu1  ;;  %v7882_v6 = vld [vmem:[%s8625_s18 + $0x6a4] ss:$8 sps:$4 sm:$0xff]   ;;  %v7913_v56 = vld [vmem:[%s8625_s18 + $0x750] ss:$8 sps:$4 sm:$0xff]  }
 0x4a8   : > { %v9059_v5 = vadd.f32 %v3820_v25, %v9008_v8  ;;  %v3822_v17 = vpop.f32.mrb[14].mxu1  ;;  %4889 = vmatpush1.bf16.msra.mxu1 %v7871_v43  ;;  %v7885_v8 = vld [vmem:[%s8625_s18 + $0x6b4] ss:$8 sps:$4 sm:$0xff]   ;;  %v7910_v43 = vld [vmem:[%s8625_s18 + $0x740] ss:$8 sps:$4 sm:$0xff]  }
 0x4a9   : > { %v3823_v13 = vpop.f32.mrb[15].mxu1  ;;  %4890 = vmatprep.subr.bf16.mxu1 %v7876_v3  ;;  %v7915_v3 = vld [vmem:[%s8625_s18 + $0x754] ss:$8 sps:$4 sm:$0xff]   ;;  %v7918_v25 = vld [vmem:[%s8625_s18 + $0x764] ss:$8 sps:$4 sm:$0xff]  }
 0x4aa   : > { %v7916_v17 = vld [vmem:[%s8625_s18 + $0x760] ss:$8 sps:$4 sm:$0xff]   ;;  %v7919_v13 = vld [vmem:[%s8625_s18 + $0x770] ss:$8 sps:$4 sm:$0xff]  }
 0x4ac   : > { %4891 = vmatpush1.bf16.msra.mxu1 %v7874_v11  ;;  %v7921_v11 = vld [vmem:[%s8625_s18 + $0x774] ss:$8 sps:$4 sm:$0xff]  }
 0x4ad   : > { %4892 = vmatprep.subr.bf16.mxu1 %v7879_v18  ;;  %v7924_v18 = vld [vmem:[%s8625_s18 + $0x784] ss:$8 sps:$4 sm:$0xff]  }
 0x4b0   : > { %4893 = vmatpush1.bf16.msra.mxu1 %v7877_v7 }
 0x4b1   : > { %4894 = vmatprep.subr.bf16.mxu1 %v7882_v6 }
 0x4b4   : > { %4895 = vmatpush1.bf16.msra.mxu1 %v7880_v44 }
 0x4b5   : > { %4896 = vmatprep.subr.bf16.mxu1 %v7885_v8 }
 0x4b8   : > { %4897 = vmatpush1.bf16.msra.mxu1 %v7883_v42 }
 0x4b9   : > { %4898 = vmatprep.subr.bf16.mxu1 %v7888_v62  ;;  %v7922_v62 = vld [vmem:[%s8625_s18 + $0x780] ss:$8 sps:$4 sm:$0xff]  }
 0x4bc   : > { %4899 = vmatpush1.bf16.msra.mxu1 %v7886_v10 }
 0x4bd   : > { %4900 = vmatprep.subr.bf16.mxu1 %v7891_v15  ;;  %v7927_v15 = vld [vmem:[%s8625_s18 + $0x794] ss:$8 sps:$4 sm:$0xff]  }
 0x4c0   : > { %4901 = vmatpush1.bf16.msra.mxu1 %v7889_v22  ;;  %v7925_v22 = vld [vmem:[%s8625_s18 + $0x790] ss:$8 sps:$4 sm:$0xff]  }
 0x4c1   : > { %4902 = vmatprep.subr.bf16.mxu1 %v7894_v23  ;;  %v7928_v23 = vld [vmem:[%s8625_s18 + $0x7a0] ss:$8 sps:$4 sm:$0xff]  }
 0x4c4   : > { %4903 = vmatpush1.bf16.msra.mxu1 %v7892_v26  ;;  %v7936_v26 = vld [vmem:[%s8625_s18 + $0x7c4] ss:$8 sps:$4 sm:$0xff]  }
 0x4c5   : > { %4904 = vmatprep.subr.bf16.mxu1 %v7897_v27  ;;  %v7934_v27 = vld [vmem:[%s8625_s18 + $0x7c0] ss:$8 sps:$4 sm:$0xff]  }
 0x4c8   : > { %4905 = vmatpush1.bf16.msra.mxu1 %v7895_v33  ;;  %v7937_v33 = vld [vmem:[%s8625_s18 + $0x7d0] ss:$8 sps:$4 sm:$0xff]  }
 0x4c9   : > { %5170 = vmatprep.subr.bf16.mxu1 %v7900_v37  ;;  %v7942_v37 = vld [vmem:[%s8625_s18 + $0x7e4] ss:$8 sps:$4 sm:$0xff]  }
 0x4cb   : > { %4907 = vmatmul.mubr.bf16.vlgmr.msra.gmra.mrb[0].mxu1 %v4706_v50  ;;  %v4983_v50 = vrot.slane %v4981_v40, 2 }
 0x4cc   : > { %4916 = vmatprep.mubr.bf16.mxu1 %v9037_v52  ;;  %5171 = vmatpush1.bf16.msra.mxu1 %v7898_v55  ;;  %v5005_v52 = vsel %vm2421_vm5, %v4996_v60, %v9087_v38  ;;  %v4975_v55 = vrot.slane %v4973_v47, 2  ;;  %v7951_v60 = vld [vmem:[%s8625_s18 + $0x814] ss:$8 sps:$4 sm:$0xff]  }
 0x4cd   : > { %5172 = vmatprep.subr.bf16.mxu1 %v7903_v53 }
 0x4d0   : > { %5173 = vmatpush1.bf16.msra.mxu1 %v7901_v58  ;;  %v4987_v58 = vor.u32 %v4986_v46, %v4983_v50 }
 0x4d1   : > { %5174 = vmatprep.subr.bf16.mxu1 %v7906_v59  ;;  %v7946_v59 = vld [vmem:[%s8625_s18 + $0x800] ss:$8 sps:$4 sm:$0xff]  }
 0x4d3   : > { %4917 = vmatmul.mubr.bf16.gmra.mrb[28].mxu1 %v4705_v49  ;;  %v4976_v49 = vshll.u32 %v4935_v9, 16  ;;  %v7993_v9 = vld [vmem:[%s8625_s18 + $0x8f4] ss:$8 sps:$4 sm:$0xff]  }
 0x4d4   : > { %5175 = vmatpush1.bf16.msra.mxu1 %v7904_v41  ;;  %5202 = vmatprep.mubr.bf16.mxu1 %v5005_v52  ;;  %v7954_v52 = vld [vmem:[%s8625_s18 + $0x824] ss:$8 sps:$4 sm:$0xff]  }
 0x4d5   : > { %5176 = vmatprep.subr.bf16.mxu1 %v7909_v0  ;;  %v4978_v53 = vrot.slane %v4976_v49, 3  ;;  %v7949_v0 = vld [vmem:[%s8625_s18 + $0x810] ss:$8 sps:$4 sm:$0xff]  }
 0x4d7   : > { %v4979_v35 = vor.u32 %v4978_v53, %v4975_v55  ;;  %v5564_v55 = vld [vmem:[%s9170_s10 + $0x88] sm:$0xff]  ;;  %v5547_v53 = vld [vmem:[%s9170_s10] sm:$0xff] }
 0x4d8   : > { %5177 = vmatpush1.bf16.msra.mxu1 %v7907_v54  ;;  %v7952_v54 = vld [vmem:[%s8625_s18 + $0x820] ss:$8 sps:$4 sm:$0xff]  }
 0x4d9   : > { %5178 = vmatprep.subr.bf16.mxu1 %v7912_v2  ;;  %v4988_v41 = vsel %vm2421_vm5, %v4979_v35, %v4987_v58  ;;  %v7957_v2 = vld [vmem:[%s8625_s18 + $0x834] ss:$8 sps:$4 sm:$0xff]  }
 0x4da   : > { %v5566_v35 = vld [vmem:[%s9170_s10 + $0x98] sm:$0xff] }
 0x4dc   : > { %5179 = vmatpush1.bf16.msra.mxu1 %v7910_v43  ;;  %v7955_v43 = vld [vmem:[%s8625_s18 + $0x830] ss:$8 sps:$4 sm:$0xff]  }
 0x4dd   : > { %5180 = vmatprep.subr.bf16.mxu1 %v7915_v3  ;;  %v7958_v3 = vld [vmem:[%s8625_s18 + $0x840] ss:$8 sps:$4 sm:$0xff]  }
 0x4e0   : > { %5181 = vmatpush1.bf16.msra.mxu1 %v7913_v56  ;;  %v7963_v56 = vld [vmem:[%s8625_s18 + $0x854] ss:$8 sps:$4 sm:$0xff]  }
 0x4e1   : > { %5182 = vmatprep.subr.bf16.mxu1 %v7918_v25  ;;  %v7961_v25 = vld [vmem:[%s8625_s18 + $0x850] ss:$8 sps:$4 sm:$0xff]  }
 0x4e4   : > { %5183 = vmatpush1.bf16.msra.mxu1 %v7916_v17  ;;  %v7966_v17 = vld [vmem:[%s8625_s18 + $0x864] ss:$8 sps:$4 sm:$0xff]  }
 0x4e5   : > { %5184 = vmatprep.subr.bf16.mxu1 %v7921_v11  ;;  %v7964_v11 = vld [vmem:[%s8625_s18 + $0x860] ss:$8 sps:$4 sm:$0xff]  }
 0x4e6   : > { %v4090_v7 = vpop.f32.mrb[16].mxu1 }
 0x4e7   : > { %v9104_v6 = vadd.f32 %v4090_v7, %v9056_v4  ;;  %v4092_v44 = vpop.f32.mrb[17].mxu1  ;;  %v7930_v4 = vld [vmem:[%s8625_s18 + $0x7a4] ss:$8 sps:$4 sm:$0xff]  }
 0x4e8   : > { %v9107_v8 = vadd.f32 %v4092_v44, %v9059_v5  ;;  %v4094_v42 = vpop.f32.mrb[18].mxu1  ;;  %5185 = vmatpush1.bf16.msra.mxu1 %v7919_v13  ;;  %v7931_v5 = vld [vmem:[%s8625_s18 + $0x7b0] ss:$8 sps:$4 sm:$0xff]   ;;  %v7969_v13 = vld [vmem:[%s8625_s18 + $0x874] ss:$8 sps:$4 sm:$0xff]  }
 0x4e9   : > { %v4095_v10 = vpop.f32.mrb[19].mxu1  ;;  %5186 = vmatprep.subr.bf16.mxu1 %v7924_v18  ;;  %v7972_v18 = vld [vmem:[%s8625_s18 + $0x884] ss:$8 sps:$4 sm:$0xff]  }
 0x4ec   : > { %5187 = vmatpush1.bf16.msra.mxu1 %v7922_v62 }
 0x4ed   : > { %5188 = vmatprep.subr.bf16.mxu1 %v7927_v15  ;;  %v7970_v15 = vld [vmem:[%s8625_s18 + $0x880] ss:$8 sps:$4 sm:$0xff]  }
 0x4f0   : > { %5189 = vmatpush1.bf16.msra.mxu1 %v7925_v22 }
 0x4f1   : > { %5190 = vmatprep.subr.bf16.mxu1 %v7930_v4  ;;  %v7975_v4 = vld [vmem:[%s8625_s18 + $0x894] ss:$8 sps:$4 sm:$0xff]  }
 0x4f4   : > { %5191 = vmatpush1.bf16.msra.mxu1 %v7928_v23  ;;  %v7973_v23 = vld [vmem:[%s8625_s18 + $0x890] ss:$8 sps:$4 sm:$0xff]  }
 0x4f5   : > { %5192 = vmatprep.subr.bf16.mxu1 %v7933_v1  ;;  %v7978_v1 = vld [vmem:[%s8625_s18 + $0x8a4] ss:$8 sps:$4 sm:$0xff]  }
 0x4f8   : > { %5193 = vmatpush1.bf16.msra.mxu1 %v7931_v5  ;;  %v7979_v5 = vld [vmem:[%s8625_s18 + $0x8b0] ss:$8 sps:$4 sm:$0xff]  }
 0x4f9   : > { %5194 = vmatprep.subr.bf16.mxu1 %v7936_v26  ;;  %v7984_v26 = vld [vmem:[%s8625_s18 + $0x8c4] ss:$8 sps:$4 sm:$0xff]  }
 0x4fc   : > { %5195 = vmatpush1.bf16.msra.mxu1 %v7934_v27  ;;  %v7987_v27 = vld [vmem:[%s8625_s18 + $0x8d4] ss:$8 sps:$4 sm:$0xff]  }
 0x4fd   : > { %5196 = vmatprep.subr.bf16.mxu1 %v7939_v28  ;;  %v7985_v28 = vld [vmem:[%s8625_s18 + $0x8d0] ss:$8 sps:$4 sm:$0xff]  }
 0x500   : > { %5197 = vmatpush1.bf16.msra.mxu1 %v7937_v33 }
 0x501   : > { %5198 = vmatprep.subr.bf16.mxu1 %v7942_v37 }
 0x504   : > { %5199 = vmatpush1.bf16.msra.mxu1 %v7940_v51 }
 0x505   : > { %5200 = vmatprep.subr.bf16.mxu1 %v7945_v57 }
 0x508   : > { %5201 = vmatpush1.bf16.msra.mxu1 %v7943_v48  ;;  %v5548_v48 = vld [vmem:[%s9170_s10 + $0x8] sm:$0xff] }
 0x509   : > { %5442 = vmatprep.subr.bf16.mxu1 %v7948_v31  ;;  %v5565_v31 = vld [vmem:[%s9170_s10 + $0x90] sm:$0xff] }
 0x50b   : > { %5203 = vmatmul.mubr.bf16.vlgmr.msra.gmra.mrb[0].mxu1 %v4988_v41  ;;  %v5550_v41 = vld [vmem:[%s9170_s10 + $0x18] sm:$0xff] }
 0x50c   : > { %5212 = vmatprep.mubr.bf16.mxu1 %v9087_v38  ;;  %5443 = vmatpush1.bf16.msra.mxu1 %v7946_v59  ;;  %v7960_v38 = vld [vmem:[%s8625_s18 + $0x844] ss:$8 sps:$4 sm:$0xff]   ;;  %v6963_v59 = vpack.c.bf16 %v5566_v35, %v5565_v31 }
 0x50d   : > { %5444 = vmatprep.subr.bf16.mxu1 %v7951_v60  ;;  %v5549_v60 = vld [vmem:[%s9170_s10 + $0x10] sm:$0xff] }
 0x510   : > { %5445 = vmatpush1.bf16.msra.mxu1 %v7949_v0  ;;  %v6965_v0 = vpack.c.bf16 %v5550_v41, %v5549_v60 }
 0x511   : > { %5446 = vmatprep.subr.bf16.mxu1 %v7954_v52  ;;  %v5567_v52 = vld [vmem:[%s9170_s10 + $0xa0] sm:$0xff] }
 0x513   : > { %5213 = vmatmul.mubr.bf16.gmra.mrb[32].mxu1 %v4987_v58  ;;  %v6961_v58 = vpack.c.bf16 %v5548_v48, %v5547_v53 }
 0x514   : > { %5447 = vmatpush1.bf16.msra.mxu1 %v7952_v54  ;;  %5474 = vmatprep.mubr.bf16.mxu1 %v8837_v21  ;;  %v7967_v21 = vld [vmem:[%s8625_s18 + $0x870] ss:$8 sps:$4 sm:$0xff]   ;;  %v5568_v54 = vld [vmem:[%s9170_s10 + $0xa8] sm:$0xff] }
 0x515   : > { %5448 = vmatprep.subr.bf16.mxu1 %v7957_v2  ;;  %v6967_v2 = vpack.c.bf16 %v5568_v54, %v5567_v52 }
 0x518   : > { %5449 = vmatpush1.bf16.msra.mxu1 %v7955_v43  ;;  %v5551_v43 = vld [vmem:[%s9170_s10 + $0x20] sm:$0xff] }
 0x519   : > { %5450 = vmatprep.subr.bf16.mxu1 %v7960_v38  ;;  %v5552_v38 = vld [vmem:[%s9170_s10 + $0x28] sm:$0xff] }
 0x51c   : > { %5451 = vmatpush1.bf16.msra.mxu1 %v7958_v3  ;;  %v6969_v3 = vpack.c.bf16 %v5552_v38, %v5551_v43 }
 0x51d   : > { %5452 = vmatprep.subr.bf16.mxu1 %v7963_v56  ;;  %v5569_v56 = vld [vmem:[%s9170_s10 + $0xb0] sm:$0xff] }
 0x520   : > { %5453 = vmatpush1.bf16.msra.mxu1 %v7961_v25  ;;  %v5570_v25 = vld [vmem:[%s9170_s10 + $0xb8] sm:$0xff] }
 0x521   : > { %5454 = vmatprep.subr.bf16.mxu1 %v7966_v17  ;;  %v5553_v17 = vld [vmem:[%s9170_s10 + $0x30] sm:$0xff] }
 0x524   : > { %5455 = vmatpush1.bf16.msra.mxu1 %v7964_v11  ;;  %v6971_v11 = vpack.c.bf16 %v5570_v25, %v5569_v56 }
 0x525   : > { %5456 = vmatprep.subr.bf16.mxu1 %v7969_v13  ;;  %v5554_v13 = vld [vmem:[%s9170_s10 + $0x38] sm:$0xff] }
 0x526   : > { %v4386_v7 = vpop.f32.mrb[20].mxu1 }
 0x527   : > { %v4397_v44 = vadd.f32 %v4386_v7, %v9104_v6  ;;  %v4388_v42 = vpop.f32.mrb[21].mxu1  ;;  %v7976_v6 = vld [vmem:[%s8625_s18 + $0x8a0] ss:$8 sps:$4 sm:$0xff]   ;;  %v6973_v7 = vpack.c.bf16 %v5554_v13, %v5553_v17 }
 0x528   : > { %v4398_v62 = vadd.f32 %v4388_v42, %v9107_v8  ;;  %v4390_v10 = vpop.f32.mrb[22].mxu1  ;;  %5457 = vmatpush1.bf16.msra.mxu1 %v7967_v21  ;;  %v7981_v8 = vld [vmem:[%s8625_s18 + $0x8b4] ss:$8 sps:$4 sm:$0xff]   ;;  %v5571_v21 = vld [vmem:[%s9170_s10 + $0xc0] sm:$0xff] }
 0x529   : > { %v4391_v22 = vpop.f32.mrb[23].mxu1  ;;  %5458 = vmatprep.subr.bf16.mxu1 %v7972_v18  ;;  %v5572_v18 = vld [vmem:[%s9170_s10 + $0xc8] sm:$0xff]  ;;  %v5555_v42 = vld [vmem:[%s9170_s10 + $0x40] sm:$0xff]  ;;  %v5573_v10 = vld [vmem:[%s9170_s10 + $0xd0] sm:$0xff] }
 0x52c   : > { %5459 = vmatpush1.bf16.msra.mxu1 %v7970_v15  ;;  %v5574_v15 = vld [vmem:[%s9170_s10 + $0xd8] sm:$0xff] }
 0x52d   : > { %5460 = vmatprep.subr.bf16.mxu1 %v7975_v4  ;;  %v6979_v4 = vpack.c.bf16 %v5574_v15, %v5573_v10 }
 0x530   : > { %5461 = vmatpush1.bf16.msra.mxu1 %v7973_v23  ;;  %v5557_v23 = vld [vmem:[%s9170_s10 + $0x50] sm:$0xff] }
 0x531   : > { %5462 = vmatprep.subr.bf16.mxu1 %v7978_v1  ;;  %v5558_v1 = vld [vmem:[%s9170_s10 + $0x58] sm:$0xff] }
 0x534   : > { %5463 = vmatpush1.bf16.msra.mxu1 %v7976_v6  ;;  %v5575_v6 = vld [vmem:[%s9170_s10 + $0xe0] sm:$0xff] }
 0x535   : > { %5464 = vmatprep.subr.bf16.mxu1 %v7981_v8  ;;  %v5576_v8 = vld [vmem:[%s9170_s10 + $0xe8] sm:$0xff] }
 0x538   : > { %5465 = vmatpush1.bf16.msra.mxu1 %v7979_v5  ;;  %v6981_v5 = vpack.c.bf16 %v5558_v1, %v5557_v23 }
 0x539   : > { %5466 = vmatprep.subr.bf16.mxu1 %v7984_v26  ;;  %v6983_v26 = vpack.c.bf16 %v5576_v8, %v5575_v6 }
 0x53c   : > { %5467 = vmatpush1.bf16.msra.mxu1 %v7982_v16  ;;  %v5559_v16 = vld [vmem:[%s9170_s10 + $0x60] sm:$0xff] }
 0x53d   : > { %5468 = vmatprep.subr.bf16.mxu1 %v7987_v27  ;;  %v5560_v27 = vld [vmem:[%s9170_s10 + $0x68] sm:$0xff] }
 0x540   : > { %5469 = vmatpush1.bf16.msra.mxu1 %v7985_v28  ;;  %v5577_v28 = vld [vmem:[%s9170_s10 + $0xf0] sm:$0xff] }
 0x541   : > { %5470 = vmatprep.subr.bf16.mxu1 %v7990_v29  ;;  %v5578_v29 = vld [vmem:[%s9170_s10 + $0xf8] sm:$0xff] }
 0x544   : > { %5471 = vmatpush1.bf16.msra.mxu1 %v7988_v30  ;;  %v6985_v30 = vpack.c.bf16 %v5560_v27, %v5559_v16  ;;  %v5579_v27 = vld [vmem:[%s397_s16] sm:$0x1] }
 0x545   : > { %5472 = vmatprep.subr.bf16.mxu1 %v7993_v9  ;;  %v6987_v9 = vpack.c.bf16 %v5578_v29, %v5577_v28 }
 0x548   : > { %5473 = vmatpush1.bf16.msra.mxu1 %v7991_v34  ;;  %v5561_v34 = vld [vmem:[%s9170_s10 + $0x70] sm:$0xff] }
 0x54b   : > { %5475 = vmatmul.mubr.bf16.vlgmr.msra.gmra.mrb[0].mxu1 %v8844_v19  ;;  %v5563_v19 = vld [vmem:[%s9170_s10 + $0x80] sm:$0xff] }
 0x54c   : > { %5484 = vmatprep.mubr.bf16.mxu1 %v8831_v12  ;;  %v6959_v46 = vpack.c.bf16 %v5564_v55, %v5563_v19 }
 0x54e   : > { %6960 = vmatprep.subr.bf16.mxu0 %v6959_v46 }
 0x54f   : > { %6962 = vmatpush3.bf16.msra.mxu0 %v6961_v58 }
 0x550   : > { %6964 = vmatprep.subr.bf16.mxu0 %v6963_v59 }
 0x553   : > { %5485 = vmatmul.mubr.bf16.gmra.mrb[36].mxu1 %v8839_v14  ;;  %6966 = vmatpush3.bf16.msra.mxu0 %v6965_v0 }
 0x554   : > { %6968 = vmatprep.subr.bf16.mxu0 %v6967_v2 }
 0x557   : > { %6970 = vmatpush3.bf16.msra.mxu0 %v6969_v3 }
 0x558   : > { %6972 = vmatprep.subr.bf16.mxu0 %v6971_v11 }
 0x55b   : > { %6974 = vmatpush3.bf16.msra.mxu0 %v6973_v7 }
 0x566   : > { %v4642_v36 = vpop.f32.mrb[24].mxu1 }
 0x567   : > { %v4653_v33 = vadd.f32 %v4642_v36, %v4397_v44  ;;  %v4644_v37 = vpop.f32.mrb[25].mxu1  ;;  %v6975_v44 = vpack.c.bf16 %v5572_v18, %v5571_v21  ;;  %v5562_v36 = vld [vmem:[%s9170_s10 + $0x78] sm:$0xff] }
 0x568   : > { %v4654_v47 = vadd.f32 %v4644_v37, %v4398_v62  ;;  %v4646_v49 = vpop.f32.mrb[26].mxu1  ;;  %v5556_v62 = vld [vmem:[%s9170_s10 + $0x48] sm:$0xff] }
 0x569   : > { %v4647_v40 = vpop.f32.mrb[27].mxu1  ;;  %v6977_v22 = vpack.c.bf16 %v5556_v62, %v5555_v42  ;;  %6976 = vmatprep.subr.bf16.mxu0 %v6975_v44 }
 0x56b   : > { %6978 = vmatpush3.bf16.msra.mxu0 %v6977_v22 }
 0x56c   : > { %6980 = vmatprep.subr.bf16.mxu0 %v6979_v4 }
 0x56f   : > { %6982 = vmatpush3.bf16.msra.mxu0 %v6981_v5 }
 0x570   : > { %6984 = vmatprep.subr.bf16.mxu0 %v6983_v26 }
 0x573   : > { %6986 = vmatpush3.bf16.msra.mxu0 %v6985_v30 }
 0x574   : > { %6988 = vmatprep.subr.bf16.mxu0 %v6987_v9 }
 0x5a6   : > { %v4918_v39 = vpop.f32.mrb[28].mxu1 }
 0x5a7   : > { %v9165_v51 = vadd.f32 %v4918_v39, %v4653_v33  ;;  %v4920_v57 = vpop.f32.mrb[29].mxu1  ;;  %v6989_v33 = vpack.c.bf16 %v5562_v36, %v5561_v34 }
 0x5a8   : > { %v9172_v12 = vadd.f32 %v4920_v57, %v4654_v47  ;;  %v4922_v14 = vpop.f32.mrb[30].mxu1 }
 0x5a9   : > { %v4923_v50 = vpop.f32.mrb[31].mxu1  ;;  %6990 = vmatpush3.bf16.msra.mxu0 %v6989_v33  ;;  %v5499_v14 = vld [vmem:[%s389_s13] sm:$0x3] }
 0x5aa   : > { %v5504_v19 = vrot.slane %v5499_v14, %v2947_v20  ;;  %v5508_v55 = vrot.slane %v5499_v14, %v2951_v45 }
 0x5e6   : > { %v5214_v37 = vpop.f32.mrb[32].mxu1 }
 0x5e7   : > { %v5225_v47 = vadd.f32 %v5214_v37, %v9165_v51  ;;  %v5216_v49 = vpop.f32.mrb[33].mxu1 }
 0x5e8   : > { %v5226_v40 = vadd.f32 %v5216_v49, %v9172_v12  ;;  %v5218_v39 = vpop.f32.mrb[34].mxu1 }
 0x5e9   : > { %v5219_v57 = vpop.f32.mrb[35].mxu1 }
 0x61e   : > { %v5476_v53 = vpop.f32.mrb[0].mxu1 }
 0x61f   : > { %v5511_v50 = vadd.f32 %v5504_v19, %v5476_v53  ;;  %v5478_v46 = vpop.f32.mrb[1].mxu1 }
 0x620   : > { %v5512_v51 = vadd.f32 %v5508_v55, %v5478_v46  ;;  %v5480_v48 = vpop.f32.mrb[2].mxu1 }
 0x621   : > { %v5517_v31 = vmax.f32 %v5511_v50, 0.0  ;;  %v5513_v12 = vadd.f32 %v5504_v19, %v5480_v48  ;;  %v5482_v35 = vpop.f32.mrb[3].mxu1 }
 0x622   : > { %v5518_v58 = vmax.f32 %v5512_v51, 0.0  ;;  %v5514_v59 = vadd.f32 %v5508_v55, %v5482_v35 }
 0x623   : > { %v5519_v60 = vmax.f32 %v5513_v12, 0.0  ;;  %v5523_v0 = vsel %vm8701_vm12, %v5517_v31, 0.0 }
 0x624   : > { %v5520_v41 = vmax.f32 %v5514_v59, 0.0  ;;  %v5524_v61 = vsel %vm8701_vm12, %v5518_v58, 0.0 }
 0x625   : > { %v5525_v20 = vsel %vm8705_vm15, %v5519_v60, 0.0 }
 0x626   : > { %v5529_v45 = vadd.f32 %v5525_v20, %v5523_v0  ;;  %v5526_v52 = vsel %vm8705_vm15, %v5520_v41, 0.0  ;;  %v5486_v54 = vpop.f32.mrb[36].mxu1 }
 0x627   : > { %v5537_v2 = vadd.f32 %v5526_v52, %v5524_v61  ;;  %v5497_v43 = vadd.f32 %v5486_v54, %v5225_v47  ;;  %v5488_v38 = vpop.f32.mrb[37].mxu1 }
 0x628   : > { %v5498_v3 = vadd.f32 %v5488_v38, %v5226_v40  ;;  %v5490_v56 = vpop.f32.mrb[38].mxu1 }
 0x629   : > { %v5515_v25 = vadd.f32 %v5504_v19, %v5497_v43  ;;  %v5491_v17 = vpop.f32.mrb[39].mxu1 }
 0x62a   : > { %v5516_v11 = vadd.f32 %v5508_v55, %v5498_v3 }
 0x62b   : > { %v5521_v13 = vmax.f32 %v5515_v25, 0.0 }
 0x62c   : > { %v5522_v21 = vmax.f32 %v5516_v11, 0.0 }
 0x62d   : > { %v5527_v18 = vsel %vm8733_vm7, %v5521_v13, 0.0 }
 0x62e   : > { %v5530_v24 = vadd.f32 %v5529_v45, %v5527_v18  ;;  %v5528_v7 = vsel %vm8733_vm7, %v5522_v21, 0.0 }
 0x62f   : > { %v5538_v32 = vadd.f32 %v5537_v2, %v5528_v7 }
 0x630   : > { %v5531_v44 = vrot.slane %v5530_v24, 4 }
 0x631   : > { %v5539_v42 = vrot.slane %v5538_v32, 4 }
 0x632   : > { %v5532_v62 = vadd.f32 %v5531_v44, %v5530_v24 }
 0x633   : > { %v5540_v10 = vadd.f32 %v5539_v42, %v5538_v32 }
 0x634   : > { %v5533_v15 = vrot.slane %v5532_v62, 2 }
 0x635   : > { %v5541_v22 = vrot.slane %v5540_v10, 2 }
 0x636   : > { %v5534_v4 = vadd.f32 %v5533_v15, %v5532_v62 }
 0x637   : > { %v5542_v23 = vadd.f32 %v5541_v22, %v5540_v10 }
 0x638   : > { %v5535_v1 = vrot.slane %v5534_v4, 1 }
 0x639   : > { %v5543_v6 = vrot.slane %v5542_v23, 1 }
 0x63a   : > { %v5536_v8 = vadd.f32 %v5535_v1, %v5534_v4 }
 0x63b   : > { %v5544_v5 = vadd.f32 %v5543_v6, %v5542_v23 }
 0x63c   : > { %v5545_v16 = vmul.f32 0.0625, %v5536_v8 }
 0x63d   : > { %v5546_v26 = vmul.f32 0.0625, %v5544_v5 }
 0x63f   : > { %5644 = vmatprep.mubr.f32.mxu0 %v5546_v26 }
 0x640   : > { %5645 = vmatmul.mubr.f32.vlgmr.msra.gmra.mrb[40].mxu0 %v5545_v16 }
 0x713   : > { %v6956_v63 = vpop.f32.mrb[40].mxu0 }
 0x714   : > { %v6957_v28 = vpop.f32.mrb[41].mxu0 }
 0x715   : > { %v6958_v29 = vadd.f32 %v6957_v28, %v6956_v63 }
 0x717   : > { %v5647_v30 = vadd.f32 %v6958_v29, %v5579_v27 }
 0x719   : > { %5650 = vst [vmem:[%s404_s21] sm:$0x1] %v5647_v30 }
 0x71a PF: > { %s17_s28 = sadd.s32 1, %s8036_s28   ;;  %s9270_s24 = smov %s8028_s26 }
 0x71b   : > { %p14_p7 = scmp.ge.s32.totalorder %s17_s28, 8   ;;  %s9271_s25 = smov %s8032_s27 }
 0x71c   : > { %s9272_s26 = smov %s9275_s29  ;;  %s9273_s27 = smov %s9279_s30 }
 0x71d   :  { %16 = sbr.rel (!%p14_p7) target bundleno = 3 (0x3), region = 112 }

</bundles_post_ra>
